<compile_context>
chip_gen: v6e
topology: v6e:2x2x1
jax: 0.10.0
libtpu: 0.0.40
codegen_flags: <defaults>
</compile_context>

<pallas_src>
import functools

import jax
import jax.numpy as jnp
from jax.experimental import pallas as pl
from jax.experimental.pallas import tpu as pltpu


def _zero_halo(pr):
    """Zero the 1-pixel halo ring of a (H+2, W+2, C) VMEM activation buffer."""
    Hp, Wp, c = pr.shape
    dt = pr.dtype
    pr[0:1, :, :] = jnp.zeros((1, Wp, c), dt)
    pr[Hp - 1:Hp, :, :] = jnp.zeros((1, Wp, c), dt)
    pr[:, 0:1, :] = jnp.zeros((Hp, 1, c), dt)
    pr[:, Wp - 1:Wp, :] = jnp.zeros((Hp, 1, c), dt)


def _unary_stack_kernel(*refs, H, W, channels):
    """Fused Unary stack for ONE image per grid step.

    refs layout:
      x_ref                        : (1, H, W, Cin)      f32 input image
      w_0, b_0, ..., w_{L-1}, b_{L-1}
          w_l : (9*c_l, c_{l+1})   bf16 im2col weights (broadcast over grid)
          b_l : (1, c_{l+1})       f32 bias
      o_ref                        : (1, H*W, Cout)      f32 output
      pad_0 ... pad_{L-1}          : (H+2, W+2, c_l)     f32 VMEM activations
      patch                        : (H*W, 9*Cmax)       bf16 VMEM im2col buffer
    """
    L = len(channels) - 1
    x_ref = refs[0]
    w_refs = refs[1:1 + 2 * L:2]
    b_refs = refs[2:2 + 2 * L:2]
    o_ref = refs[1 + 2 * L]
    pad_refs = refs[2 + 2 * L:2 + 3 * L]
    patch_ref = refs[2 + 3 * L]

    # Layer-0 input: write the image into the interior of the padded buffer.
    # Halo re-zeroed every step (cheap) so the kernel is megacore-safe
    # (each core has its own scratch).
    _zero_halo(pad_refs[0])
    pad_refs[0][1:H + 1, 1:W + 1, :] = x_ref[0]

    for l in range(L):
        cin = channels[l]
        cout = channels[l + 1]
        pr = pad_refs[l]

        # im2col: build the (H*W, 9*cin) patch matrix in VMEM (bf16), so the
        # whole 3x3 conv is a single big-K MXU matmul instead of 9 thin ones.
        for kh in range(3):
            for kw in range(3):
                t = kh * 3 + kw
                patch_ref[:, t * cin:(t + 1) * cin] = (
                    pr[kh:kh + H, kw:kw + W, :]
                    .reshape(H * W, cin)
                    .astype(patch_ref.dtype))

        acc = jnp.dot(patch_ref[:, :9 * cin], w_refs[l][...],
                      preferred_element_type=jnp.float32)   # (H*W, cout) f32
        acc = acc + b_refs[l][...]                           # broadcast (1, cout)

        if l < L - 1:
            acc = jnp.maximum(acc, 0.0)                      # ReLU (not on last layer)
            nxt = pad_refs[l + 1]
            _zero_halo(nxt)
            # Keep the activation in VMEM for the next layer — no HBM round-trip.
            nxt[1:H + 1, 1:W + 1, :] = acc.reshape(H, W, cout)
        else:
            o_ref[0] = acc.astype(o_ref.dtype)


def _unary_stack(x_nhwc, w_list, b_list, channels):
    """Single pallas_call running the whole Unary stack over all images."""
    Ntot, H, W, Cin = x_nhwc.shape
    L = len(w_list)
    Cout = channels[-1]
    Cmax = max(channels[:-1])

    kernel = functools.partial(
        _unary_stack_kernel, H=H, W=W, channels=tuple(channels))

    flops = 2 * Ntot * H * W * sum(
        9 * channels[l] * channels[l + 1] for l in range(L))
    bytes_accessed = (
        x_nhwc.size * x_nhwc.dtype.itemsize
        + Ntot * H * W * Cout * 4
        + sum(w.size * 2 for w in w_list)
        + sum(b.size * 4 for b in b_list))

    in_specs = [pl.BlockSpec((1, H, W, Cin), lambda n: (n, 0, 0, 0))]
    operands = [x_nhwc]
    for w, b in zip(w_list, b_list):
        in_specs.append(pl.BlockSpec(w.shape, lambda n: (0, 0)))  # weights: same block
        in_specs.append(pl.BlockSpec(b.shape, lambda n: (0, 0)))  # every step (no re-DMA)
        operands.extend([w, b])

    scratch_shapes = [pltpu.VMEM((H + 2, W + 2, channels[l]), jnp.float32)
                      for l in range(L)]
    scratch_shapes.append(pltpu.VMEM((H * W, 9 * Cmax), jnp.bfloat16))

    return pl.pallas_call(
        kernel,
        out_shape=jax.ShapeDtypeStruct((Ntot, H * W, Cout), jnp.float32),
        grid_spec=pltpu.PrefetchScalarGridSpec(
            num_scalar_prefetch=0,
            grid=(Ntot,),
            in_specs=in_specs,
            out_specs=pl.BlockSpec((1, H * W, Cout), lambda n: (n, 0, 0)),
            scratch_shapes=scratch_shapes,
        ),
        compiler_params=pltpu.CompilerParams(
            dimension_semantics=("parallel",)),
        cost_estimate=pl.CostEstimate(
            flops=flops, transcendentals=0, bytes_accessed=bytes_accessed),
    )(*operands)


def init_unary_params(key, num_layers, in_channels, hidden):
    """Deterministic (PyTorch-like kaiming-uniform) init for the Unary stack."""
    params = []
    cin = in_channels
    for _ in range(num_layers):
        key, kw, kb = jax.random.split(key, 3)
        fan_in = 3 * 3 * cin
        bound = 1.0 / jnp.sqrt(fan_in)
        w = jax.random.uniform(kw, (3, 3, cin, hidden), jnp.float32,
                               -bound, bound)
        b = jax.random.uniform(kb, (hidden,), jnp.float32, -bound, bound)
        params.append((w, b))
        cin = hidden
    return params


def unary_forward(params, x_nchw):
    """Unary(i) feature extractor on an NCHW image batch (fused Pallas kernel)."""
    N, C, H, W = x_nchw.shape
    channels = (C,) + tuple(w.shape[-1] for w, _ in params)
    x_nhwc = jnp.transpose(x_nchw, (0, 2, 3, 1))               # NCHW -> NHWC
    # im2col weight layout (9*cin, cout), stored bf16 for the MXU.
    w_list = [w.reshape(9 * w.shape[2], w.shape[3]).astype(jnp.bfloat16)
              for w, _ in params]
    b_list = [b.reshape(1, -1).astype(jnp.float32) for _, b in params]
    out = _unary_stack(x_nhwc, w_list, b_list, channels)       # (N, H*W, Cout)
    out = out.reshape(N, H, W, channels[-1])
    return jnp.transpose(out, (0, 3, 1, 2))                    # NHWC -> NCHW


@jax.jit
def _stereo_forward(params, l, r):
    n = l.shape[0]
    # Shared Unary weights -> run left & right through ONE pallas_call (grid=2N).
    lr = jnp.concatenate([l, r], axis=0)
    phi = unary_forward(params, lr)
    return phi[:n], phi[n:]


class StereoCNN:
    """Stereo vision module (JAX/Pallas port of stereocnn1.StereoCNN)."""

    def __init__(self, i, k, params):
        self.k = k                 # disparity label count (unused in forward)
        self.params = params       # shared Unary(i) weights

    def forward(self, l, r):
        return _stereo_forward(self.params, l, r)


def _reference_unary(params, x_nchw):
    """Pure-JAX reference matching the kernel's precision (bf16 MXU, f32 acc)."""
    x = x_nchw
    n_layers = len(params)
    for idx, (w, b) in enumerate(params):
        y = jax.lax.conv_general_dilated(
            x.astype(jnp.bfloat16), w.astype(jnp.bfloat16),
            window_strides=(1, 1), padding="SAME",
            dimension_numbers=("NCHW", "HWIO", "NCHW"),
            preferred_element_type=jnp.float32)
        y = y + b[None, :, None, None].astype(jnp.float32)
        if idx < n_layers - 1:
            y = jnp.maximum(y, 0.0)
        x = y
    return x


if __name__ == "__main__":
    # Small shapes consistent with the module: NCHW inputs.
    N, C, H, W = 2, 4, 16, 16
    i_layers, k_disp, hidden = 2, 8, 32

    key = jax.random.PRNGKey(0)
    kl, kr = jax.random.split(key)
    left = jax.random.normal(kl, (N, C, H, W), jnp.float32)
    right = jax.random.normal(kr, (N, C, H, W), jnp.float32)

    params = init_unary_params(jax.random.PRNGKey(42), i_layers, C, hidden)
    model = StereoCNN(i_layers, k_disp, params)

    phi_left, phi_right = model.forward(left, right)
    jax.block_until_ready((phi_left, phi_right))

    # Sanity check against a pure-JAX reference. Tolerance is deliberately set
    # for bf16 MXU operands with f32 accumulation.
    ref_left = _reference_unary(params, left)
    ref_right = _reference_unary(params, right)
    assert phi_left.shape == (N, hidden, H, W)
    assert phi_right.shape == (N, hidden, H, W)
    assert jnp.allclose(phi_left, ref_left, atol=2e-2, rtol=2e-2)
    assert jnp.allclose(phi_right, ref_right, atol=2e-2, rtol=2e-2)

    print("KERNEL_OK")
</pallas_src>

<mosaic_0001>
module attributes {stable_mosaic.version = 11 : i64} {
  func.func @_unary_stack_kernel(%arg0: i32, %arg1: memref<1x16x16x4xf32, #tpu.memory_space<vmem>>, %arg2: memref<36x32xbf16, #tpu.memory_space<vmem>>, %arg3: memref<1x32xf32, #tpu.memory_space<vmem>>, %arg4: memref<288x32xbf16, #tpu.memory_space<vmem>>, %arg5: memref<1x32xf32, #tpu.memory_space<vmem>>, %arg6: memref<1x256x32xf32, #tpu.memory_space<vmem>>, %arg7: memref<18x18x4xf32, #tpu.memory_space<vmem>>, %arg8: memref<18x18x32xf32, #tpu.memory_space<vmem>>, %arg9: memref<256x288xbf16, #tpu.memory_space<vmem>>) attributes {dimension_semantics = [#tpu.dimension_semantics<parallel>], iteration_bounds = array<i64: 4>, scalar_prefetch = 0 : i64, scratch_operands = 3 : i64, tpu.core_type = #tpu.core_type<tc>, window_params = [{transform_indices = @transform_0, window_bounds = array<i64: 1, 16, 16, 4>}, {pipeline_mode = #tpu.pipeline_mode<synchronous>, transform_indices = @transform_1, window_bounds = array<i64: 36, 32>}, {pipeline_mode = #tpu.pipeline_mode<synchronous>, transform_indices = @transform_2, window_bounds = array<i64: 1, 32>}, {pipeline_mode = #tpu.pipeline_mode<synchronous>, transform_indices = @transform_3, window_bounds = array<i64: 288, 32>}, {pipeline_mode = #tpu.pipeline_mode<synchronous>, transform_indices = @transform_4, window_bounds = array<i64: 1, 32>}, {transform_indices = @transform_5, window_bounds = array<i64: 1, 256, 32>}]} {
    %cst = arith.constant 0.000000e+00 : f32
    %0 = vector.broadcast %cst : f32 to vector<1x18x4xf32>
    %c0 = arith.constant 0 : index
    %c0_0 = arith.constant 0 : index
    %c0_1 = arith.constant 0 : index
    %1 = vector.load %arg7[%c0, %c0_0, %c0_1] : memref<18x18x4xf32, #tpu.memory_space<vmem>>, vector<1x18x4xf32>
    tpu.vector_store %arg7[%c0, %c0_0, %c0_1], %0 {strides = array<i32>} : memref<18x18x4xf32, #tpu.memory_space<vmem>>, vector<1x18x4xf32>,
    %cst_2 = arith.constant 0.000000e+00 : f32
    %2 = vector.broadcast %cst_2 : f32 to vector<1x18x4xf32>
    %c17 = arith.constant 17 : index
    %c0_3 = arith.constant 0 : index
    %c0_4 = arith.constant 0 : index
    %3 = vector.load %arg7[%c17, %c0_3, %c0_4] : memref<18x18x4xf32, #tpu.memory_space<vmem>>, vector<1x18x4xf32>
    tpu.vector_store %arg7[%c17, %c0_3, %c0_4], %2 {strides = array<i32>} : memref<18x18x4xf32, #tpu.memory_space<vmem>>, vector<1x18x4xf32>,
    %cst_5 = arith.constant 0.000000e+00 : f32
    %4 = vector.broadcast %cst_5 : f32 to vector<18x1x4xf32>
    %c0_6 = arith.constant 0 : index
    %c0_7 = arith.constant 0 : index
    %c0_8 = arith.constant 0 : index
    %5 = vector.load %arg7[%c0_6, %c0_7, %c0_8] : memref<18x18x4xf32, #tpu.memory_space<vmem>>, vector<18x1x4xf32>
    tpu.vector_store %arg7[%c0_6, %c0_7, %c0_8], %4 {strides = array<i32>} : memref<18x18x4xf32, #tpu.memory_space<vmem>>, vector<18x1x4xf32>,
    %cst_9 = arith.constant 0.000000e+00 : f32
    %6 = vector.broadcast %cst_9 : f32 to vector<18x1x4xf32>
    %c0_10 = arith.constant 0 : index
    %c17_11 = arith.constant 17 : index
    %c0_12 = arith.constant 0 : index
    %7 = vector.load %arg7[%c0_10, %c17_11, %c0_12] : memref<18x18x4xf32, #tpu.memory_space<vmem>>, vector<18x1x4xf32>
    tpu.vector_store %arg7[%c0_10, %c17_11, %c0_12], %6 {strides = array<i32>} : memref<18x18x4xf32, #tpu.memory_space<vmem>>, vector<18x1x4xf32>,
    %c0_13 = arith.constant 0 : index
    %c0_14 = arith.constant 0 : index
    %c0_15 = arith.constant 0 : index
    %c0_16 = arith.constant 0 : index
    %8 = vector.load %arg1[%c0_13, %c0_14, %c0_15, %c0_16] : memref<1x16x16x4xf32, #tpu.memory_space<vmem>>, vector<1x16x16x4xf32>
    %9 = vector.shape_cast %8 : vector<1x16x16x4xf32> to vector<16x16x4xf32>
    %c1 = arith.constant 1 : index
    %c1_17 = arith.constant 1 : index
    %c0_18 = arith.constant 0 : index
    %10 = vector.load %arg7[%c1, %c1_17, %c0_18] : memref<18x18x4xf32, #tpu.memory_space<vmem>>, vector<16x16x4xf32>
    tpu.vector_store %arg7[%c1, %c1_17, %c0_18], %9 {strides = array<i32>} : memref<18x18x4xf32, #tpu.memory_space<vmem>>, vector<16x16x4xf32>,
    %c0_19 = arith.constant 0 : index
    %c0_20 = arith.constant 0 : index
    %c0_21 = arith.constant 0 : index
    %11 = vector.load %arg7[%c0_19, %c0_20, %c0_21] : memref<18x18x4xf32, #tpu.memory_space<vmem>>, vector<16x16x4xf32>
    %12 = vector.shape_cast %11 : vector<16x16x4xf32> to vector<256x4xf32>
    %13 = arith.truncf %12 : vector<256x4xf32> to vector<256x4xbf16>
    %c0_22 = arith.constant 0 : index
    %c0_23 = arith.constant 0 : index
    %14 = vector.load %arg9[%c0_22, %c0_23] : memref<256x288xbf16, #tpu.memory_space<vmem>>, vector<256x4xbf16>
    tpu.vector_store %arg9[%c0_22, %c0_23], %13 {strides = array<i32>} : memref<256x288xbf16, #tpu.memory_space<vmem>>, vector<256x4xbf16>,
    %c0_24 = arith.constant 0 : index
    %c1_25 = arith.constant 1 : index
    %c0_26 = arith.constant 0 : index
    %15 = vector.load %arg7[%c0_24, %c1_25, %c0_26] : memref<18x18x4xf32, #tpu.memory_space<vmem>>, vector<16x16x4xf32>
    %16 = vector.shape_cast %15 : vector<16x16x4xf32> to vector<256x4xf32>
    %17 = arith.truncf %16 : vector<256x4xf32> to vector<256x4xbf16>
    %c0_27 = arith.constant 0 : index
    %c4 = arith.constant 4 : index
    %18 = vector.load %arg9[%c0_27, %c4] : memref<256x288xbf16, #tpu.memory_space<vmem>>, vector<256x4xbf16>
    tpu.vector_store %arg9[%c0_27, %c4], %17 {strides = array<i32>} : memref<256x288xbf16, #tpu.memory_space<vmem>>, vector<256x4xbf16>,
    %c0_28 = arith.constant 0 : index
    %c2 = arith.constant 2 : index
    %c0_29 = arith.constant 0 : index
    %19 = vector.load %arg7[%c0_28, %c2, %c0_29] : memref<18x18x4xf32, #tpu.memory_space<vmem>>, vector<16x16x4xf32>
    %20 = vector.shape_cast %19 : vector<16x16x4xf32> to vector<256x4xf32>
    %21 = arith.truncf %20 : vector<256x4xf32> to vector<256x4xbf16>
    %c0_30 = arith.constant 0 : index
    %c8 = arith.constant 8 : index
    %22 = vector.load %arg9[%c0_30, %c8] : memref<256x288xbf16, #tpu.memory_space<vmem>>, vector<256x4xbf16>
    tpu.vector_store %arg9[%c0_30, %c8], %21 {strides = array<i32>} : memref<256x288xbf16, #tpu.memory_space<vmem>>, vector<256x4xbf16>,
    %c1_31 = arith.constant 1 : index
    %c0_32 = arith.constant 0 : index
    %c0_33 = arith.constant 0 : index
    %23 = vector.load %arg7[%c1_31, %c0_32, %c0_33] : memref<18x18x4xf32, #tpu.memory_space<vmem>>, vector<16x16x4xf32>
    %24 = vector.shape_cast %23 : vector<16x16x4xf32> to vector<256x4xf32>
    %25 = arith.truncf %24 : vector<256x4xf32> to vector<256x4xbf16>
    %c0_34 = arith.constant 0 : index
    %c12 = arith.constant 12 : index
    %26 = vector.load %arg9[%c0_34, %c12] : memref<256x288xbf16, #tpu.memory_space<vmem>>, vector<256x4xbf16>
    tpu.vector_store %arg9[%c0_34, %c12], %25 {strides = array<i32>} : memref<256x288xbf16, #tpu.memory_space<vmem>>, vector<256x4xbf16>,
    %c1_35 = arith.constant 1 : index
    %c1_36 = arith.constant 1 : index
    %c0_37 = arith.constant 0 : index
    %27 = vector.load %arg7[%c1_35, %c1_36, %c0_37] : memref<18x18x4xf32, #tpu.memory_space<vmem>>, vector<16x16x4xf32>
    %28 = vector.shape_cast %27 : vector<16x16x4xf32> to vector<256x4xf32>
    %29 = arith.truncf %28 : vector<256x4xf32> to vector<256x4xbf16>
    %c0_38 = arith.constant 0 : index
    %c16 = arith.constant 16 : index
    %30 = vector.load %arg9[%c0_38, %c16] : memref<256x288xbf16, #tpu.memory_space<vmem>>, vector<256x4xbf16>
    tpu.vector_store %arg9[%c0_38, %c16], %29 {strides = array<i32>} : memref<256x288xbf16, #tpu.memory_space<vmem>>, vector<256x4xbf16>,
    %c1_39 = arith.constant 1 : index
    %c2_40 = arith.constant 2 : index
    %c0_41 = arith.constant 0 : index
    %31 = vector.load %arg7[%c1_39, %c2_40, %c0_41] : memref<18x18x4xf32, #tpu.memory_space<vmem>>, vector<16x16x4xf32>
    %32 = vector.shape_cast %31 : vector<16x16x4xf32> to vector<256x4xf32>
    %33 = arith.truncf %32 : vector<256x4xf32> to vector<256x4xbf16>
    %c0_42 = arith.constant 0 : index
    %c20 = arith.constant 20 : index
    %34 = vector.load %arg9[%c0_42, %c20] : memref<256x288xbf16, #tpu.memory_space<vmem>>, vector<256x4xbf16>
    tpu.vector_store %arg9[%c0_42, %c20], %33 {strides = array<i32>} : memref<256x288xbf16, #tpu.memory_space<vmem>>, vector<256x4xbf16>,
    %c2_43 = arith.constant 2 : index
    %c0_44 = arith.constant 0 : index
    %c0_45 = arith.constant 0 : index
    %35 = vector.load %arg7[%c2_43, %c0_44, %c0_45] : memref<18x18x4xf32, #tpu.memory_space<vmem>>, vector<16x16x4xf32>
    %36 = vector.shape_cast %35 : vector<16x16x4xf32> to vector<256x4xf32>
    %37 = arith.truncf %36 : vector<256x4xf32> to vector<256x4xbf16>
    %c0_46 = arith.constant 0 : index
    %c24 = arith.constant 24 : index
    %38 = vector.load %arg9[%c0_46, %c24] : memref<256x288xbf16, #tpu.memory_space<vmem>>, vector<256x4xbf16>
    tpu.vector_store %arg9[%c0_46, %c24], %37 {strides = array<i32>} : memref<256x288xbf16, #tpu.memory_space<vmem>>, vector<256x4xbf16>,
    %c2_47 = arith.constant 2 : index
    %c1_48 = arith.constant 1 : index
    %c0_49 = arith.constant 0 : index
    %39 = vector.load %arg7[%c2_47, %c1_48, %c0_49] : memref<18x18x4xf32, #tpu.memory_space<vmem>>, vector<16x16x4xf32>
    %40 = vector.shape_cast %39 : vector<16x16x4xf32> to vector<256x4xf32>
    %41 = arith.truncf %40 : vector<256x4xf32> to vector<256x4xbf16>
    %c0_50 = arith.constant 0 : index
    %c28 = arith.constant 28 : index
    %42 = vector.load %arg9[%c0_50, %c28] : memref<256x288xbf16, #tpu.memory_space<vmem>>, vector<256x4xbf16>
    tpu.vector_store %arg9[%c0_50, %c28], %41 {strides = array<i32>} : memref<256x288xbf16, #tpu.memory_space<vmem>>, vector<256x4xbf16>,
    %c2_51 = arith.constant 2 : index
    %c2_52 = arith.constant 2 : index
    %c0_53 = arith.constant 0 : index
    %43 = vector.load %arg7[%c2_51, %c2_52, %c0_53] : memref<18x18x4xf32, #tpu.memory_space<vmem>>, vector<16x16x4xf32>
    %44 = vector.shape_cast %43 : vector<16x16x4xf32> to vector<256x4xf32>
    %45 = arith.truncf %44 : vector<256x4xf32> to vector<256x4xbf16>
    %c0_54 = arith.constant 0 : index
    %c32 = arith.constant 32 : index
    %46 = vector.load %arg9[%c0_54, %c32] : memref<256x288xbf16, #tpu.memory_space<vmem>>, vector<256x4xbf16>
    tpu.vector_store %arg9[%c0_54, %c32], %45 {strides = array<i32>} : memref<256x288xbf16, #tpu.memory_space<vmem>>, vector<256x4xbf16>,
    %c0_55 = arith.constant 0 : index
    %c0_56 = arith.constant 0 : index
    %47 = vector.load %arg9[%c0_55, %c0_56] : memref<256x288xbf16, #tpu.memory_space<vmem>>, vector<256x36xbf16>
    %c0_57 = arith.constant 0 : index
    %c0_58 = arith.constant 0 : index
    %48 = vector.load %arg2[%c0_57, %c0_58] : memref<36x32xbf16, #tpu.memory_space<vmem>>, vector<36x32xbf16>
    %cst_59 = arith.constant dense<0.000000e+00> : vector<256x32xf32>
    %49 = tpu.matmul %47, %48, %cst_59 {dimension_numbers = #tpu.dot_dimension_numbers<[1], [0], [0], [1], [0, 0, 1, 1], [], []>} : vector<256x36xbf16>, vector<36x32xbf16>, vector<256x32xf32> -> vector<256x32xf32>
    %c0_60 = arith.constant 0 : index
    %c0_61 = arith.constant 0 : index
    %50 = vector.load %arg3[%c0_60, %c0_61] : memref<1x32xf32, #tpu.memory_space<vmem>>, vector<1x32xf32>
    %51 = vector.broadcast %50 : vector<1x32xf32> to vector<256x32xf32>
    %52 = arith.addf %49, %51 : vector<256x32xf32>
    %cst_62 = arith.constant 0.000000e+00 : f32
    %53 = vector.broadcast %cst_62 : f32 to vector<256x32xf32>
    %54 = arith.maximumf %52, %53 : vector<256x32xf32>
    %cst_63 = arith.constant 0.000000e+00 : f32
    %55 = vector.broadcast %cst_63 : f32 to vector<1x18x32xf32>
    %c0_64 = arith.constant 0 : index
    %c0_65 = arith.constant 0 : index
    %c0_66 = arith.constant 0 : index
    %56 = vector.load %arg8[%c0_64, %c0_65, %c0_66] : memref<18x18x32xf32, #tpu.memory_space<vmem>>, vector<1x18x32xf32>
    tpu.vector_store %arg8[%c0_64, %c0_65, %c0_66], %55 {strides = array<i32>} : memref<18x18x32xf32, #tpu.memory_space<vmem>>, vector<1x18x32xf32>,
    %cst_67 = arith.constant 0.000000e+00 : f32
    %57 = vector.broadcast %cst_67 : f32 to vector<1x18x32xf32>
    %c17_68 = arith.constant 17 : index
    %c0_69 = arith.constant 0 : index
    %c0_70 = arith.constant 0 : index
    %58 = vector.load %arg8[%c17_68, %c0_69, %c0_70] : memref<18x18x32xf32, #tpu.memory_space<vmem>>, vector<1x18x32xf32>
    tpu.vector_store %arg8[%c17_68, %c0_69, %c0_70], %57 {strides = array<i32>} : memref<18x18x32xf32, #tpu.memory_space<vmem>>, vector<1x18x32xf32>,
    %cst_71 = arith.constant 0.000000e+00 : f32
    %59 = vector.broadcast %cst_71 : f32 to vector<18x1x32xf32>
    %c0_72 = arith.constant 0 : index
    %c0_73 = arith.constant 0 : index
    %c0_74 = arith.constant 0 : index
    %60 = vector.load %arg8[%c0_72, %c0_73, %c0_74] : memref<18x18x32xf32, #tpu.memory_space<vmem>>, vector<18x1x32xf32>
    tpu.vector_store %arg8[%c0_72, %c0_73, %c0_74], %59 {strides = array<i32>} : memref<18x18x32xf32, #tpu.memory_space<vmem>>, vector<18x1x32xf32>,
    %cst_75 = arith.constant 0.000000e+00 : f32
    %61 = vector.broadcast %cst_75 : f32 to vector<18x1x32xf32>
    %c0_76 = arith.constant 0 : index
    %c17_77 = arith.constant 17 : index
    %c0_78 = arith.constant 0 : index
    %62 = vector.load %arg8[%c0_76, %c17_77, %c0_78] : memref<18x18x32xf32, #tpu.memory_space<vmem>>, vector<18x1x32xf32>
    tpu.vector_store %arg8[%c0_76, %c17_77, %c0_78], %61 {strides = array<i32>} : memref<18x18x32xf32, #tpu.memory_space<vmem>>, vector<18x1x32xf32>,
    %63 = vector.shape_cast %54 : vector<256x32xf32> to vector<16x16x32xf32>
    %c1_79 = arith.constant 1 : index
    %c1_80 = arith.constant 1 : index
    %c0_81 = arith.constant 0 : index
    %64 = vector.load %arg8[%c1_79, %c1_80, %c0_81] : memref<18x18x32xf32, #tpu.memory_space<vmem>>, vector<16x16x32xf32>
    tpu.vector_store %arg8[%c1_79, %c1_80, %c0_81], %63 {strides = array<i32>} : memref<18x18x32xf32, #tpu.memory_space<vmem>>, vector<16x16x32xf32>,
    %c0_82 = arith.constant 0 : index
    %c0_83 = arith.constant 0 : index
    %c0_84 = arith.constant 0 : index
    %65 = vector.load %arg8[%c0_82, %c0_83, %c0_84] : memref<18x18x32xf32, #tpu.memory_space<vmem>>, vector<16x16x32xf32>
    %66 = vector.shape_cast %65 : vector<16x16x32xf32> to vector<256x32xf32>
    %67 = arith.truncf %66 : vector<256x32xf32> to vector<256x32xbf16>
    %c0_85 = arith.constant 0 : index
    %c0_86 = arith.constant 0 : index
    %68 = vector.load %arg9[%c0_85, %c0_86] : memref<256x288xbf16, #tpu.memory_space<vmem>>, vector<256x32xbf16>
    tpu.vector_store %arg9[%c0_85, %c0_86], %67 {strides = array<i32>} : memref<256x288xbf16, #tpu.memory_space<vmem>>, vector<256x32xbf16>,
    %c0_87 = arith.constant 0 : index
    %c1_88 = arith.constant 1 : index
    %c0_89 = arith.constant 0 : index
    %69 = vector.load %arg8[%c0_87, %c1_88, %c0_89] : memref<18x18x32xf32, #tpu.memory_space<vmem>>, vector<16x16x32xf32>
    %70 = vector.shape_cast %69 : vector<16x16x32xf32> to vector<256x32xf32>
    %71 = arith.truncf %70 : vector<256x32xf32> to vector<256x32xbf16>
    %c0_90 = arith.constant 0 : index
    %c32_91 = arith.constant 32 : index
    %72 = vector.load %arg9[%c0_90, %c32_91] : memref<256x288xbf16, #tpu.memory_space<vmem>>, vector<256x32xbf16>
    tpu.vector_store %arg9[%c0_90, %c32_91], %71 {strides = array<i32>} : memref<256x288xbf16, #tpu.memory_space<vmem>>, vector<256x32xbf16>,
    %c0_92 = arith.constant 0 : index
    %c2_93 = arith.constant 2 : index
    %c0_94 = arith.constant 0 : index
    %73 = vector.load %arg8[%c0_92, %c2_93, %c0_94] : memref<18x18x32xf32, #tpu.memory_space<vmem>>, vector<16x16x32xf32>
    %74 = vector.shape_cast %73 : vector<16x16x32xf32> to vector<256x32xf32>
    %75 = arith.truncf %74 : vector<256x32xf32> to vector<256x32xbf16>
    %c0_95 = arith.constant 0 : index
    %c64 = arith.constant 64 : index
    %76 = vector.load %arg9[%c0_95, %c64] : memref<256x288xbf16, #tpu.memory_space<vmem>>, vector<256x32xbf16>
    tpu.vector_store %arg9[%c0_95, %c64], %75 {strides = array<i32>} : memref<256x288xbf16, #tpu.memory_space<vmem>>, vector<256x32xbf16>,
    %c1_96 = arith.constant 1 : index
    %c0_97 = arith.constant 0 : index
    %c0_98 = arith.constant 0 : index
    %77 = vector.load %arg8[%c1_96, %c0_97, %c0_98] : memref<18x18x32xf32, #tpu.memory_space<vmem>>, vector<16x16x32xf32>
    %78 = vector.shape_cast %77 : vector<16x16x32xf32> to vector<256x32xf32>
    %79 = arith.truncf %78 : vector<256x32xf32> to vector<256x32xbf16>
    %c0_99 = arith.constant 0 : index
    %c96 = arith.constant 96 : index
    %80 = vector.load %arg9[%c0_99, %c96] : memref<256x288xbf16, #tpu.memory_space<vmem>>, vector<256x32xbf16>
    tpu.vector_store %arg9[%c0_99, %c96], %79 {strides = array<i32>} : memref<256x288xbf16, #tpu.memory_space<vmem>>, vector<256x32xbf16>,
    %c1_100 = arith.constant 1 : index
    %c1_101 = arith.constant 1 : index
    %c0_102 = arith.constant 0 : index
    %81 = vector.load %arg8[%c1_100, %c1_101, %c0_102] : memref<18x18x32xf32, #tpu.memory_space<vmem>>, vector<16x16x32xf32>
    %82 = vector.shape_cast %81 : vector<16x16x32xf32> to vector<256x32xf32>
    %83 = arith.truncf %82 : vector<256x32xf32> to vector<256x32xbf16>
    %c0_103 = arith.constant 0 : index
    %c128 = arith.constant 128 : index
    %84 = vector.load %arg9[%c0_103, %c128] : memref<256x288xbf16, #tpu.memory_space<vmem>>, vector<256x32xbf16>
    tpu.vector_store %arg9[%c0_103, %c128], %83 {strides = array<i32>} : memref<256x288xbf16, #tpu.memory_space<vmem>>, vector<256x32xbf16>,
    %c1_104 = arith.constant 1 : index
    %c2_105 = arith.constant 2 : index
    %c0_106 = arith.constant 0 : index
    %85 = vector.load %arg8[%c1_104, %c2_105, %c0_106] : memref<18x18x32xf32, #tpu.memory_space<vmem>>, vector<16x16x32xf32>
    %86 = vector.shape_cast %85 : vector<16x16x32xf32> to vector<256x32xf32>
    %87 = arith.truncf %86 : vector<256x32xf32> to vector<256x32xbf16>
    %c0_107 = arith.constant 0 : index
    %c160 = arith.constant 160 : index
    %88 = vector.load %arg9[%c0_107, %c160] : memref<256x288xbf16, #tpu.memory_space<vmem>>, vector<256x32xbf16>
    tpu.vector_store %arg9[%c0_107, %c160], %87 {strides = array<i32>} : memref<256x288xbf16, #tpu.memory_space<vmem>>, vector<256x32xbf16>,
    %c2_108 = arith.constant 2 : index
    %c0_109 = arith.constant 0 : index
    %c0_110 = arith.constant 0 : index
    %89 = vector.load %arg8[%c2_108, %c0_109, %c0_110] : memref<18x18x32xf32, #tpu.memory_space<vmem>>, vector<16x16x32xf32>
    %90 = vector.shape_cast %89 : vector<16x16x32xf32> to vector<256x32xf32>
    %91 = arith.truncf %90 : vector<256x32xf32> to vector<256x32xbf16>
    %c0_111 = arith.constant 0 : index
    %c192 = arith.constant 192 : index
    %92 = vector.load %arg9[%c0_111, %c192] : memref<256x288xbf16, #tpu.memory_space<vmem>>, vector<256x32xbf16>
    tpu.vector_store %arg9[%c0_111, %c192], %91 {strides = array<i32>} : memref<256x288xbf16, #tpu.memory_space<vmem>>, vector<256x32xbf16>,
    %c2_112 = arith.constant 2 : index
    %c1_113 = arith.constant 1 : index
    %c0_114 = arith.constant 0 : index
    %93 = vector.load %arg8[%c2_112, %c1_113, %c0_114] : memref<18x18x32xf32, #tpu.memory_space<vmem>>, vector<16x16x32xf32>
    %94 = vector.shape_cast %93 : vector<16x16x32xf32> to vector<256x32xf32>
    %95 = arith.truncf %94 : vector<256x32xf32> to vector<256x32xbf16>
    %c0_115 = arith.constant 0 : index
    %c224 = arith.constant 224 : index
    %96 = vector.load %arg9[%c0_115, %c224] : memref<256x288xbf16, #tpu.memory_space<vmem>>, vector<256x32xbf16>
    tpu.vector_store %arg9[%c0_115, %c224], %95 {strides = array<i32>} : memref<256x288xbf16, #tpu.memory_space<vmem>>, vector<256x32xbf16>,
    %c2_116 = arith.constant 2 : index
    %c2_117 = arith.constant 2 : index
    %c0_118 = arith.constant 0 : index
    %97 = vector.load %arg8[%c2_116, %c2_117, %c0_118] : memref<18x18x32xf32, #tpu.memory_space<vmem>>, vector<16x16x32xf32>
    %98 = vector.shape_cast %97 : vector<16x16x32xf32> to vector<256x32xf32>
    %99 = arith.truncf %98 : vector<256x32xf32> to vector<256x32xbf16>
    %c0_119 = arith.constant 0 : index
    %c256 = arith.constant 256 : index
    %100 = vector.load %arg9[%c0_119, %c256] : memref<256x288xbf16, #tpu.memory_space<vmem>>, vector<256x32xbf16>
    tpu.vector_store %arg9[%c0_119, %c256], %99 {strides = array<i32>} : memref<256x288xbf16, #tpu.memory_space<vmem>>, vector<256x32xbf16>,
    %c0_120 = arith.constant 0 : index
    %c0_121 = arith.constant 0 : index
    %101 = vector.load %arg9[%c0_120, %c0_121] : memref<256x288xbf16, #tpu.memory_space<vmem>>, vector<256x288xbf16>
    %c0_122 = arith.constant 0 : index
    %c0_123 = arith.constant 0 : index
    %102 = vector.load %arg4[%c0_122, %c0_123] : memref<288x32xbf16, #tpu.memory_space<vmem>>, vector<288x32xbf16>
    %cst_124 = arith.constant dense<0.000000e+00> : vector<256x32xf32>
    %103 = tpu.matmul %101, %102, %cst_124 {dimension_numbers = #tpu.dot_dimension_numbers<[1], [0], [0], [1], [0, 0, 1, 1], [], []>} : vector<256x288xbf16>, vector<288x32xbf16>, vector<256x32xf32> -> vector<256x32xf32>
    %c0_125 = arith.constant 0 : index
    %c0_126 = arith.constant 0 : index
    %104 = vector.load %arg5[%c0_125, %c0_126] : memref<1x32xf32, #tpu.memory_space<vmem>>, vector<1x32xf32>
    %105 = vector.broadcast %104 : vector<1x32xf32> to vector<256x32xf32>
    %106 = arith.addf %103, %105 : vector<256x32xf32>
    %c0_127 = arith.constant 0 : index
    %c0_128 = arith.constant 0 : index
    %c0_129 = arith.constant 0 : index
    %107 = vector.load %arg6[%c0_127, %c0_128, %c0_129] : memref<1x256x32xf32, #tpu.memory_space<vmem>>, vector<1x256x32xf32>
    %108 = vector.shape_cast %107 : vector<1x256x32xf32> to vector<256x32xf32>
    %109 = vector.shape_cast %106 : vector<256x32xf32> to vector<1x256x32xf32>
    tpu.vector_store %arg6[%c0_127, %c0_128, %c0_129], %109 {strides = array<i32>} : memref<1x256x32xf32, #tpu.memory_space<vmem>>, vector<1x256x32xf32>,
    return
  }
  func.func @transform_0(%arg0: i32) -> (i32, i32, i32, i32) {
    %c0_i32 = arith.constant 0 : i32
    %c0_i32_0 = arith.constant 0 : i32
    %c0_i32_1 = arith.constant 0 : i32
    %c0_i32_2 = arith.constant 0 : i32
    return %arg0, %c0_i32, %c0_i32_0, %c0_i32_1 : i32, i32, i32, i32
  }
  func.func @transform_1(%arg0: i32) -> (i32, i32) {
    %c0_i32 = arith.constant 0 : i32
    %c0_i32_0 = arith.constant 0 : i32
    %c0_i32_1 = arith.constant 0 : i32
    return %c0_i32, %c0_i32_0 : i32, i32
  }
  func.func @transform_2(%arg0: i32) -> (i32, i32) {
    %c0_i32 = arith.constant 0 : i32
    %c0_i32_0 = arith.constant 0 : i32
    %c0_i32_1 = arith.constant 0 : i32
    return %c0_i32, %c0_i32_0 : i32, i32
  }
  func.func @transform_3(%arg0: i32) -> (i32, i32) {
    %c0_i32 = arith.constant 0 : i32
    %c0_i32_0 = arith.constant 0 : i32
    %c0_i32_1 = arith.constant 0 : i32
    return %c0_i32, %c0_i32_0 : i32, i32
  }
  func.func @transform_4(%arg0: i32) -> (i32, i32) {
    %c0_i32 = arith.constant 0 : i32
    %c0_i32_0 = arith.constant 0 : i32
    %c0_i32_1 = arith.constant 0 : i32
    return %c0_i32, %c0_i32_0 : i32, i32
  }
  func.func @transform_5(%arg0: i32) -> (i32, i32, i32) {
    %c0_i32 = arith.constant 0 : i32
    %c0_i32_0 = arith.constant 0 : i32
    %c0_i32_1 = arith.constant 0 : i32
    return %arg0, %c0_i32, %c0_i32_0 : i32, i32, i32
  }
}

</mosaic_0001>

<bundles_post_ra>
// kernel: _stereo_forward.1
= control target key start
LH: loop header
LB: loop body
LE: loop exit
PB: predicated region body
PF: predicated region fallthrough
CT: control target
= control target key end

     0   :  { %s7760_s18 = smov 0   ;;  %s9993_s0 = inlined_call_operand.vmem [shape: f32[4,16,16,4], index: 0, kind: input, shape index: {}]   ;;  %s9994_s1 = inlined_call_operand.vmem [shape: bf16[36,32], index: 1, kind: input, shape index: {}]   ;;  %s9995_s2 = inlined_call_operand.vmem [shape: f32[1,32], index: 2, kind: input, shape index: {}]   ;;  %s9996_s3 = inlined_call_operand.vmem [shape: bf16[288,32], index: 3, kind: input, shape index: {}]   ;;  %s9997_s4 = inlined_call_operand.vmem [shape: f32[1,32], index: 4, kind: input, shape index: {}]   ;;  %s9998_s5 = inlined_call_operand.vmem [shape: f32[4,256,32], index: 5, kind: output, shape index: {}]  }
   0x1 LB: > { %s6080_s19 = sadd.s32 4294967295, %s7717_s18   ;;  %p6084_p0 = scmp.ge.s32.totalorder %s7717_s18, 1  ;;  %s7717_s18 = sphi %s7760_s18, %s15_s18  }
   0x2   : > { %p187_p1 = scmp.lt.s32.totalorder %s7717_s18, 5 }
   0x4   : > { %p188_p2 = pnand %p6084_p0, %p187_p1 }
   0x5   : > { %p7770_p3 = scmp.lt.s32.totalorder (!%p188_p2), %s6080_s19, 3  ;;  %s7720_s25 = smov (!%p188_p2), 4  }
   0x6   : > { %191 = sbr.rel (%p188_p2) target bundleno = 1354 (0x54a), region = 40  ;;  %s7721_s26 = smov (!%p188_p2), 8  }
   0x7   : > { %s7722_s27 = smov (!%p188_p2), 12   ;;  %s7723_s28 = smov (!%p188_p2), 16  }
   0x8   : > { %s7724_s29 = smov (!%p188_p2), 20   ;;  %s7725_s30 = smov (!%p188_p2), 24  }
   0x9   : > { %s7726_s6 = smov (!%p188_p2), 28   ;;  %s7727_s11 = smov (!%p188_p2), 32  }
   0xa   : > { %s7728_s16 = smov (!%p188_p2), 64  }
   0xb   : > { %vm226_vm0 = vcmask 31744   ;;  %vm235_vm1 = vcmask 24576   ;;  %vm229_vm2 = vcmask 25600   ;;  %v7719_v0 = vmov 0.0   ;;  %s10001_s19 = smov (!%p7770_p3, %s6080_s19), 3 }
   0xc   : > { %227 = vst.msk [vmem:[#allocation2] sm:$0xff] %vm226_vm0, %v7719_v0  ;;  %228 = vst.msk [vmem:[#allocation2 + $0x8] sm:$0xff] %vm226_vm0, %v7719_v0  ;;  %s6786_s21 = sshll.u32 %s10001_s19, 8  ;;  %vm497_vm3 = vcmask 27648   ;;  %vm754_vm4 = vcmask 60448   ;;  %vm1011_vm5 = vcmask 93248  }
   0xd   : > { %232 = vst.msk [vmem:[#allocation2 + $0x198] sm:$0xff] %vm226_vm0, %v7719_v0  ;;  %233 = vst.msk [vmem:[#allocation2 + $0x1a0] sm:$0xff] %vm226_vm0, %v7719_v0  ;;  %s7870_s24 = scalar_lea.vmem %s9993_s0, %s6786_s21  ;;  %vm2972_vm6 = vcmask 261120   ;;  %vm2981_vm7 = vcmask 253952   ;;  %vm2775_vm8 = vcmask 1041408   ;;  %vm1268_vm9 = vcmask 126048   ;;  %s9875_s20 = scalar_lea.vmem %s9998_s5, %s6786_s21 }
   0xe   : > { %237 = vst.msk [vmem:[#allocation2 + $0x18] sm:$0x1] %vm235_vm1, %v7719_v0  ;;  %238 = vst.msk [vmem:[#allocation2 + $0x30] sm:$0x1] %vm235_vm1, %v7719_v0  ;;  %v272_v1 = vld [vmem:[%s7870_s24] sm:$0xff]  ;;  %v273_v2 = vld [vmem:[%s7870_s24 + $0x8] sm:$0xff] }
   0xf   : > { %239 = vst.msk [vmem:[#allocation2 + $0x48] sm:$0x1] %vm235_vm1, %v7719_v0  ;;  %240 = vst.msk [vmem:[#allocation2 + $0x60] sm:$0x1] %vm235_vm1, %v7719_v0  ;;  %v274_v3 = vld [vmem:[%s7870_s24 + $0x10] sm:$0xff]  ;;  %v275_v4 = vld [vmem:[%s7870_s24 + $0x18] sm:$0xff] }
  0x10   : > { %241 = vst.msk [vmem:[#allocation2 + $0x78] sm:$0x1] %vm235_vm1, %v7719_v0  ;;  %242 = vst.msk [vmem:[#allocation2 + $0x90] sm:$0x1] %vm235_vm1, %v7719_v0  ;;  %v276_v5 = vld [vmem:[%s7870_s24 + $0x20] sm:$0xff]  ;;  %v277_v6 = vld [vmem:[%s7870_s24 + $0x28] sm:$0xff] }
  0x11   : > { %243 = vst.msk [vmem:[#allocation2 + $0xa8] sm:$0x1] %vm235_vm1, %v7719_v0  ;;  %244 = vst.msk [vmem:[#allocation2 + $0xc0] sm:$0x1] %vm235_vm1, %v7719_v0  ;;  %v278_v9 = vld [vmem:[%s7870_s24 + $0x30] sm:$0xff]  ;;  %v279_v11 = vld [vmem:[%s7870_s24 + $0x38] sm:$0xff] }
  0x12   : > { %245 = vst.msk [vmem:[#allocation2 + $0xd8] sm:$0x1] %vm235_vm1, %v7719_v0  ;;  %246 = vst.msk [vmem:[#allocation2 + $0xf0] sm:$0x1] %vm235_vm1, %v7719_v0  ;;  %v280_v12 = vld [vmem:[%s7870_s24 + $0x40] sm:$0xff]  ;;  %v281_v13 = vld [vmem:[%s7870_s24 + $0x48] sm:$0xff] }
  0x13   : > { %247 = vst.msk [vmem:[#allocation2 + $0x108] sm:$0x1] %vm235_vm1, %v7719_v0  ;;  %248 = vst.msk [vmem:[#allocation2 + $0x120] sm:$0x1] %vm235_vm1, %v7719_v0  ;;  %v530_v7 = vld [vmem:[#allocation2 + $0x1] sm:$0xff]  ;;  %v282_v14 = vld [vmem:[%s7870_s24 + $0x50] sm:$0xff] }
  0x14   : > { %249 = vst.msk [vmem:[#allocation2 + $0x138] sm:$0x1] %vm235_vm1, %v7719_v0  ;;  %250 = vst.msk [vmem:[#allocation2 + $0x150] sm:$0x1] %vm235_vm1, %v7719_v0  ;;  %v6820_v10 = vpack.c.bf16 %v530_v7, %v530_v7  ;;  %v283_v15 = vld [vmem:[%s7870_s24 + $0x58] sm:$0xff]  ;;  %v284_v16 = vld [vmem:[%s7870_s24 + $0x60] sm:$0xff] }
  0x15   : > { %251 = vst.msk [vmem:[#allocation2 + $0x168] sm:$0x1] %vm235_vm1, %v7719_v0  ;;  %252 = vst.msk [vmem:[#allocation2 + $0x180] sm:$0x1] %vm235_vm1, %v7719_v0  ;;  %v285_v18 = vld [vmem:[%s7870_s24 + $0x68] sm:$0xff]  ;;  %v286_v19 = vld [vmem:[%s7870_s24 + $0x70] sm:$0xff] }
  0x16   : > { %255 = vst.msk [vmem:[#allocation2 + $0x29] sm:$0x1] %vm235_vm1, %v7719_v0  ;;  %256 = vst.msk [vmem:[#allocation2 + $0x41] sm:$0x1] %vm235_vm1, %v7719_v0  ;;  %658 = vrot.lane.b32.xlu0 %v6820_v10, %s7720_s25  ;;  %v287_v20 = vld [vmem:[%s7870_s24 + $0x78] sm:$0xff]  ;;  %v288_v21 = vld [vmem:[%s7870_s24 + $0x80] sm:$0xff] }
  0x17   : > { %257 = vst.msk [vmem:[#allocation2 + $0x59] sm:$0x1] %vm235_vm1, %v7719_v0  ;;  %258 = vst.msk [vmem:[#allocation2 + $0x71] sm:$0x1] %vm235_vm1, %v7719_v0  ;;  %v289_v22 = vld [vmem:[%s7870_s24 + $0x88] sm:$0xff]  ;;  %v290_v23 = vld [vmem:[%s7870_s24 + $0x90] sm:$0xff] }
  0x18   : > { %259 = vst.msk [vmem:[#allocation2 + $0x89] sm:$0x1] %vm235_vm1, %v7719_v0  ;;  %260 = vst.msk [vmem:[#allocation2 + $0xa1] sm:$0x1] %vm235_vm1, %v7719_v0  ;;  %v291_v24 = vld [vmem:[%s7870_s24 + $0x98] sm:$0xff]  ;;  %v292_v25 = vld [vmem:[%s7870_s24 + $0xa0] sm:$0xff] }
  0x19   : > { %261 = vst.msk [vmem:[#allocation2 + $0xb9] sm:$0x1] %vm235_vm1, %v7719_v0  ;;  %262 = vst.msk [vmem:[#allocation2 + $0xd1] sm:$0x1] %vm235_vm1, %v7719_v0  ;;  %v293_v26 = vld [vmem:[%s7870_s24 + $0xa8] sm:$0xff]  ;;  %v294_v33 = vld [vmem:[%s7870_s24 + $0xb0] sm:$0xff] }
  0x1a   : > { %263 = vst.msk [vmem:[#allocation2 + $0xe9] sm:$0x1] %vm235_vm1, %v7719_v0  ;;  %264 = vst.msk [vmem:[#allocation2 + $0x101] sm:$0x1] %vm235_vm1, %v7719_v0  ;;  %v295_v34 = vld [vmem:[%s7870_s24 + $0xb8] sm:$0xff]  ;;  %v296_v41 = vld [vmem:[%s7870_s24 + $0xc0] sm:$0xff] }
  0x1b   : > { %265 = vst.msk [vmem:[#allocation2 + $0x119] sm:$0x1] %vm235_vm1, %v7719_v0  ;;  %266 = vst.msk [vmem:[#allocation2 + $0x131] sm:$0x1] %vm235_vm1, %v7719_v0  ;;  %v297_v42 = vld [vmem:[%s7870_s24 + $0xc8] sm:$0xff]  ;;  %v298_v43 = vld [vmem:[%s7870_s24 + $0xd0] sm:$0xff] }
  0x1c   : > { %267 = vst.msk [vmem:[#allocation2 + $0x149] sm:$0x1] %vm235_vm1, %v7719_v0  ;;  %268 = vst.msk [vmem:[#allocation2 + $0x161] sm:$0x1] %vm235_vm1, %v7719_v0  ;;  %v299_v45 = vld [vmem:[%s7870_s24 + $0xd8] sm:$0xff]  ;;  %v300_v46 = vld [vmem:[%s7870_s24 + $0xe0] sm:$0xff] }
  0x1d   : > { %269 = vst.msk [vmem:[#allocation2 + $0x179] sm:$0x1] %vm235_vm1, %v7719_v0  ;;  %270 = vst.msk [vmem:[#allocation2 + $0x191] sm:$0x1] %vm235_vm1, %v7719_v0  ;;  %v301_v47 = vld [vmem:[%s7870_s24 + $0xe8] sm:$0xff]  ;;  %vm1525_vm10 = vcmask 158848  }
  0x1e   : > { %230 = vst.msk [vmem:[#allocation2 + $0x10] sm:$0x3] %vm229_vm2, %v7719_v0  ;;  %234 = vst.msk [vmem:[#allocation2 + $0x1a8] sm:$0x3] %vm229_vm2, %v7719_v0  ;;  %vm1782_vm11 = vcmask 191648   ;;  %vm2040_vm12 = vcmask 224448  }
  0x1f   : > { %236 = vst.msk [vmem:[#allocation2] sm:$0x1] %vm235_vm1, %v7719_v0  ;;  %253 = vst.msk [vmem:[#allocation2 + $0x198] sm:$0x1] %vm235_vm1, %v7719_v0  ;;  %vm2297_vm13 = vcmask 257248   ;;  %vm2554_vm14 = vcmask 290048  }
  0x20   : > { %254 = vst.msk [vmem:[#allocation2 + $0x11] sm:$0x1] %vm235_vm1, %v7719_v0  ;;  %271 = vst.msk [vmem:[#allocation2 + $0x1a9] sm:$0x1] %vm235_vm1, %v7719_v0  ;;  %vm3211_vm15 = vcmask 257024   ;;  %vm2975_vm1 = vcmask 254976  }
  0x21   : > { %305 = vst.msk [vmem:[#allocation2 + $0x19] sm:$0xff] %vm226_vm0, %v272_v1  ;;  %306 = vst.msk [vmem:[#allocation2 + $0x21] sm:$0xff] %vm226_vm0, %v273_v2  ;;  %v338_v2 = vld [vmem:[#allocation2 + $0x8] sm:$0xff]  ;;  %vm3468_vm2 = vcmask 519424  }
  0x22   : > { %307 = vst.msk [vmem:[#allocation2 + $0x31] sm:$0xff] %vm226_vm0, %v274_v3  ;;  %308 = vst.msk [vmem:[#allocation2 + $0x39] sm:$0xff] %vm226_vm0, %v275_v4  ;;  %v6789_v4 = vpack.c.bf16 %v338_v2, %v338_v2 }
  0x23   : > { %309 = vst.msk [vmem:[#allocation2 + $0x49] sm:$0xff] %vm226_vm0, %v276_v5  ;;  %310 = vst.msk [vmem:[#allocation2 + $0x51] sm:$0xff] %vm226_vm0, %v277_v6 }
  0x24   : > { %311 = vst.msk [vmem:[#allocation2 + $0x61] sm:$0xff] %vm226_vm0, %v278_v9  ;;  %312 = vst.msk [vmem:[#allocation2 + $0x69] sm:$0xff] %vm226_vm0, %v279_v11 }
  0x25   : > { %v531_v8 = vld [vmem:[#allocation2 + $0x9] sm:$0xff]  ;;  %313 = vst.msk [vmem:[#allocation2 + $0x79] sm:$0xff] %vm226_vm0, %v280_v12  ;;  %314 = vst.msk [vmem:[#allocation2 + $0x81] sm:$0xff] %vm226_vm0, %v281_v13 }
  0x26   : > { %v6821_v17 = vpack.c.bf16 %v531_v8, %v531_v8  ;;  %315 = vst.msk [vmem:[#allocation2 + $0x91] sm:$0xff] %vm226_vm0, %v282_v14  ;;  %316 = vst.msk [vmem:[#allocation2 + $0x99] sm:$0xff] %vm226_vm0, %v283_v15  ;;  %v337_v60 = vld [vmem:[#allocation2] sm:$0xff] }
  0x27   : > { %317 = vst.msk [vmem:[#allocation2 + $0xa9] sm:$0xff] %vm226_vm0, %v284_v16  ;;  %318 = vst.msk [vmem:[#allocation2 + $0xb1] sm:$0xff] %vm226_vm0, %v285_v18  ;;  %v6788_v63 = vpack.c.bf16 %v337_v60, %v337_v60 }
  0x28   : > { %319 = vst.msk [vmem:[#allocation2 + $0xc1] sm:$0xff] %vm226_vm0, %v286_v19  ;;  %320 = vst.msk [vmem:[#allocation2 + $0xc9] sm:$0xff] %vm226_vm0, %v287_v20  ;;  %v532_v27 = vld [vmem:[#allocation2 + $0x19] sm:$0xff]  ;;  %v533_v28 = vld [vmem:[#allocation2 + $0x21] sm:$0xff]  ;;  %660 = vrot.lane.b32.xlu0 %v6821_v17, %s7720_s25 }
  0x29   : > { %321 = vst.msk [vmem:[#allocation2 + $0xd9] sm:$0xff] %vm226_vm0, %v288_v21  ;;  %322 = vst.msk [vmem:[#allocation2 + $0xe1] sm:$0xff] %vm226_vm0, %v289_v22  ;;  %v534_v29 = vld [vmem:[#allocation2 + $0x31] sm:$0xff]  ;;  %v6822_v30 = vpack.c.bf16 %v532_v27, %v532_v27  ;;  %v6823_v35 = vpack.c.bf16 %v533_v28, %v533_v28  ;;  %v535_v36 = vld [vmem:[#allocation2 + $0x39] sm:$0xff] }
  0x2a   : > { %323 = vst.msk [vmem:[#allocation2 + $0xf1] sm:$0xff] %vm226_vm0, %v290_v23  ;;  %324 = vst.msk [vmem:[#allocation2 + $0xf9] sm:$0xff] %vm226_vm0, %v291_v24  ;;  %v6824_v31 = vpack.c.bf16 %v534_v29, %v534_v29  ;;  %v536_v32 = vld [vmem:[#allocation2 + $0x49] sm:$0xff]  ;;  %v6825_v39 = vpack.c.bf16 %v535_v36, %v535_v36  ;;  %v537_v40 = vld [vmem:[#allocation2 + $0x51] sm:$0xff] }
  0x2b   : > { %325 = vst.msk [vmem:[#allocation2 + $0x109] sm:$0xff] %vm226_vm0, %v292_v25  ;;  %326 = vst.msk [vmem:[#allocation2 + $0x111] sm:$0xff] %vm226_vm0, %v293_v26  ;;  %662 = vrot.lane.b32.xlu1 %v6822_v30, %s7720_s25  ;;  %v6826_v37 = vpack.c.bf16 %v536_v32, %v536_v32  ;;  %v538_v38 = vld [vmem:[#allocation2 + $0x61] sm:$0xff]  ;;  %v6827_v49 = vpack.c.bf16 %v537_v40, %v537_v40  ;;  %v539_v50 = vld [vmem:[#allocation2 + $0x69] sm:$0xff] }
  0x2c   : > { %327 = vst.msk [vmem:[#allocation2 + $0x121] sm:$0xff] %vm226_vm0, %v294_v33  ;;  %328 = vst.msk [vmem:[#allocation2 + $0x129] sm:$0xff] %vm226_vm0, %v295_v34  ;;  %666 = vrot.lane.b32.xlu0 %v6824_v31, %s7720_s25  ;;  %v6828_v44 = vpack.c.bf16 %v538_v38, %v538_v38  ;;  %v540_v48 = vld [vmem:[#allocation2 + $0x79] sm:$0xff]  ;;  %v6829_v53 = vpack.c.bf16 %v539_v50, %v539_v50  ;;  %v541_v54 = vld [vmem:[#allocation2 + $0x81] sm:$0xff] }
  0x2d   : > { %329 = vst.msk [vmem:[#allocation2 + $0x139] sm:$0xff] %vm226_vm0, %v296_v41  ;;  %330 = vst.msk [vmem:[#allocation2 + $0x141] sm:$0xff] %vm226_vm0, %v297_v42  ;;  %v6830_v51 = vpack.c.bf16 %v540_v48, %v540_v48  ;;  %v542_v52 = vld [vmem:[#allocation2 + $0x91] sm:$0xff]  ;;  %v6831_v57 = vpack.c.bf16 %v541_v54, %v541_v54  ;;  %v543_v58 = vld [vmem:[#allocation2 + $0x99] sm:$0xff] }
  0x2e   : > { %331 = vst.msk [vmem:[#allocation2 + $0x151] sm:$0xff] %vm226_vm0, %v298_v43  ;;  %332 = vst.msk [vmem:[#allocation2 + $0x159] sm:$0xff] %vm226_vm0, %v299_v45  ;;  %v6832_v55 = vpack.c.bf16 %v542_v52, %v542_v52  ;;  %v544_v56 = vld [vmem:[#allocation2 + $0xa9] sm:$0xff]  ;;  %v339_v61 = vld [vmem:[#allocation2 + $0x18] sm:$0xff]  ;;  %v6833_v3 = vpack.c.bf16 %v543_v58, %v543_v58 }
  0x2f   : > { %664 = vrot.lane.b32.xlu1 %v6823_v35, %s7720_s25  ;;  %333 = vst.msk [vmem:[#allocation2 + $0x169] sm:$0xff] %vm226_vm0, %v300_v46  ;;  %334 = vst.msk [vmem:[#allocation2 + $0x171] sm:$0xff] %vm226_vm0, %v301_v47  ;;  %v6834_v59 = vpack.c.bf16 %v544_v56, %v544_v56  ;;  %v546_v62 = vld [vmem:[#allocation2 + $0xc1] sm:$0xff]  ;;  %v7944_v1 = vpack.c.bf16 %v339_v61, %v339_v61  ;;  %v545_v6 = vld [vmem:[#allocation2 + $0xb1] sm:$0xff] }
  0x30   : > { %670 = vrot.lane.b32.xlu0 %v6826_v37, %s7720_s25  ;;  %v340_v5 = vld [vmem:[#allocation2 + $0x20] sm:$0xff]  ;;  %498 = vst.msk [vmem:[#allocation4] sm:$0xf] %vm497_vm3, %v6788_v63  ;;  %v341_v8 = vld [vmem:[#allocation2 + $0x30] sm:$0xff]  ;;  %v342_v9 = vld [vmem:[#allocation2 + $0x38] sm:$0xff]  ;;  %v6836_v10 = vpack.c.bf16 %v546_v62, %v546_v62  ;;  %v6835_v22 = vpack.c.bf16 %v545_v6, %v545_v6 }
  0x31   : > { %500 = vst.msk [vmem:[#allocation4 + $0x18] sm:$0xf] %vm497_vm3, %v7944_v1  ;;  %v7950_v7 = vpack.c.bf16 %v340_v5, %v340_v5  ;;  %v7953_v11 = vld [vmem:[#allocation2 + $0xd9] sm:$0xff]  ;;  %499 = vst.msk [vmem:[#allocation4 + $0xc] sm:$0xf] %vm497_vm3, %v6789_v4  ;;  %v7956_v12 = vpack.c.bf16 %v341_v8, %v341_v8  ;;  %v7958_v13 = vpack.c.bf16 %v342_v9, %v342_v9  ;;  %v343_v14 = vld [vmem:[#allocation2 + $0x48] sm:$0xff] }
  0x32   : > { %v344_v15 = vld [vmem:[#allocation2 + $0x50] sm:$0xff]  ;;  %v7964_v17 = vpack.c.bf16 %v343_v14, %v343_v14  ;;  %v345_v19 = vld [vmem:[#allocation2 + $0x60] sm:$0xff]  ;;  %v346_v20 = vld [vmem:[#allocation2 + $0x68] sm:$0xff]  ;;  %v6838_v36 = vpack.c.bf16 %v7953_v11, %v7953_v11  ;;  %2973 = vst.msk [vmem:[#allocation3] sm:$0xff] %vm2972_vm6, %v7719_v0 }
  0x33   : > { %668 = vrot.lane.b32.xlu1 %v6825_v39, %s7720_s25  ;;  %v7960_v16 = vld [vmem:[#allocation2 + $0xc9] sm:$0xff]  ;;  %501 = vst.msk [vmem:[#allocation4 + $0x24] sm:$0xf] %vm497_vm3, %v7950_v7  ;;  %v7966_v18 = vpack.c.bf16 %v344_v15, %v344_v15  ;;  %v347_v21 = vld [vmem:[#allocation2 + $0x78] sm:$0xff]  ;;  %502 = vst.msk [vmem:[#allocation4 + $0x30] sm:$0xf] %vm497_vm3, %v7956_v12  ;;  %v7973_v23 = vpack.c.bf16 %v345_v19, %v345_v19  ;;  %v7975_v24 = vpack.c.bf16 %v346_v20, %v346_v20 }
  0x34   : > { %674 = vrot.lane.b32.xlu0 %v6828_v44, %s7720_s25  ;;  %503 = vst.msk [vmem:[#allocation4 + $0x3c] sm:$0xf] %vm497_vm3, %v7958_v13  ;;  %v7977_v25 = vpack.c.bf16 %v347_v21, %v347_v21  ;;  %v348_v26 = vld [vmem:[#allocation2 + $0x80] sm:$0xff]  ;;  %v349_v27 = vld [vmem:[#allocation2 + $0x90] sm:$0xff]  ;;  %v350_v28 = vld [vmem:[#allocation2 + $0x98] sm:$0xff]  ;;  %v6837_v50 = vpack.c.bf16 %v7960_v16, %v7960_v16 }
  0x35   : > { %v550_v29 = vld [vmem:[#allocation2 + $0xf1] sm:$0xff]  ;;  %504 = vst.msk [vmem:[#allocation4 + $0x48] sm:$0xf] %vm497_vm3, %v7964_v17  ;;  %505 = vst.msk [vmem:[#allocation4 + $0x54] sm:$0xf] %vm497_vm3, %v7966_v18  ;;  %v7983_v30 = vpack.c.bf16 %v348_v26, %v348_v26  ;;  %v7985_v31 = vpack.c.bf16 %v349_v27, %v349_v27  ;;  %v7987_v32 = vpack.c.bf16 %v350_v28, %v350_v28  ;;  %v351_v33 = vld [vmem:[#allocation2 + $0xa8] sm:$0xff] }
  0x36   : > { %v352_v34 = vld [vmem:[#allocation2 + $0xb0] sm:$0xff]  ;;  %v353_v35 = vld [vmem:[#allocation2 + $0xc0] sm:$0xff]  ;;  %506 = vst.msk [vmem:[#allocation4 + $0x60] sm:$0xf] %vm497_vm3, %v7973_v23  ;;  %507 = vst.msk [vmem:[#allocation4 + $0x6c] sm:$0xf] %vm497_vm3, %v7975_v24  ;;  %v7998_v37 = vpack.c.bf16 %v351_v33, %v351_v33 }
  0x37   : > { %672 = vrot.lane.b32.xlu1 %v6827_v49, %s7720_s25  ;;  %508 = vst.msk [vmem:[#allocation4 + $0x78] sm:$0xf] %vm497_vm3, %v7977_v25  ;;  %v8000_v38 = vpack.c.bf16 %v352_v34, %v352_v34  ;;  %v8002_v39 = vpack.c.bf16 %v353_v35, %v353_v35  ;;  %v354_v40 = vld [vmem:[#allocation2 + $0xc8] sm:$0xff]  ;;  %v355_v41 = vld [vmem:[#allocation2 + $0xd8] sm:$0xff]  ;;  %v356_v42 = vld [vmem:[#allocation2 + $0xe0] sm:$0xff] }
  0x38   : > { %678 = vrot.lane.b32.xlu0 %v6830_v51, %s7720_s25  ;;  %v549_v43 = vld [vmem:[#allocation2 + $0xe1] sm:$0xff]  ;;  %509 = vst.msk [vmem:[#allocation4 + $0x84] sm:$0xf] %vm497_vm3, %v7983_v30  ;;  %510 = vst.msk [vmem:[#allocation4 + $0x90] sm:$0xf] %vm497_vm3, %v7985_v31  ;;  %v8010_v44 = vpack.c.bf16 %v354_v40, %v354_v40  ;;  %v8012_v45 = vpack.c.bf16 %v355_v41, %v355_v41  ;;  %v8014_v46 = vpack.c.bf16 %v356_v42, %v356_v42  ;;  %v357_v47 = vld [vmem:[#allocation2 + $0xf0] sm:$0xff] }
  0x39   : > { %511 = vst.msk [vmem:[#allocation4 + $0x9c] sm:$0xf] %vm497_vm3, %v7987_v32  ;;  %v358_v48 = vld [vmem:[#allocation2 + $0xf8] sm:$0xff]  ;;  %v359_v49 = vld [vmem:[#allocation2 + $0x108] sm:$0xff]  ;;  %512 = vst.msk [vmem:[#allocation4 + $0xa8] sm:$0xf] %vm497_vm3, %v7998_v37  ;;  %v8025_v51 = vpack.c.bf16 %v357_v47, %v357_v47  ;;  %v6839_v61 = vpack.c.bf16 %v549_v43, %v549_v43 }
  0x3a   : > { %513 = vst.msk [vmem:[#allocation4 + $0xb4] sm:$0xf] %vm497_vm3, %v8000_v38  ;;  %514 = vst.msk [vmem:[#allocation4 + $0xc0] sm:$0xf] %vm497_vm3, %v8002_v39  ;;  %v8027_v52 = vpack.c.bf16 %v358_v48, %v358_v48  ;;  %v360_v54 = vld [vmem:[#allocation2 + $0x110] sm:$0xff]  ;;  %v551_v58 = vld [vmem:[#allocation2 + $0xf9] sm:$0xff] }
  0x3b   : > { %676 = vrot.lane.b32.xlu1 %v6829_v53, %s7720_s25  ;;  %v8029_v53 = vpack.c.bf16 %v359_v49, %v359_v49  ;;  %515 = vst.msk [vmem:[#allocation4 + $0xcc] sm:$0xf] %vm497_vm3, %v8010_v44  ;;  %516 = vst.msk [vmem:[#allocation4 + $0xd8] sm:$0xf] %vm497_vm3, %v8012_v45  ;;  %v8037_v56 = vpack.c.bf16 %v360_v54, %v360_v54  ;;  %v362_v60 = vld [vmem:[#allocation2 + $0x128] sm:$0xff]  ;;  %v553_v4 = vld [vmem:[#allocation2 + $0x111] sm:$0xff]  ;;  %v6841_v8 = vpack.c.bf16 %v551_v58, %v551_v58 }
  0x3c   : > { %682 = vrot.lane.b32.xlu0 %v6832_v55, %s7720_s25  ;;  %v552_v55 = vld [vmem:[#allocation2 + $0x109] sm:$0xff]  ;;  %517 = vst.msk [vmem:[#allocation4 + $0xe4] sm:$0xf] %vm497_vm3, %v8014_v46  ;;  %518 = vst.msk [vmem:[#allocation4 + $0xf0] sm:$0xf] %vm497_vm3, %v8025_v51  ;;  %v8051_v63 = vpack.c.bf16 %v362_v60, %v362_v60  ;;  %v554_v2 = vld [vmem:[#allocation2 + $0x121] sm:$0xff]  ;;  %v6843_v19 = vpack.c.bf16 %v553_v4, %v553_v4 }
  0x3d   : > { %519 = vst.msk [vmem:[#allocation4 + $0xfc] sm:$0xf] %vm497_vm3, %v8027_v52  ;;  %520 = vst.msk [vmem:[#allocation4 + $0x108] sm:$0xf] %vm497_vm3, %v8029_v53  ;;  %v363_v5 = vld [vmem:[#allocation2 + $0x138] sm:$0xff]  ;;  %v364_v6 = vld [vmem:[#allocation2 + $0x140] sm:$0xff]  ;;  %v6844_v14 = vpack.c.bf16 %v554_v2, %v554_v2 }
  0x3e   : > { %521 = vst.msk [vmem:[#allocation4 + $0x114] sm:$0xf] %vm497_vm3, %v8037_v56  ;;  %523 = vst.msk [vmem:[#allocation4 + $0x12c] sm:$0xf] %vm497_vm3, %v8051_v63  ;;  %v8059_v9 = vpack.c.bf16 %v363_v5, %v363_v5  ;;  %v556_v11 = vld [vmem:[#allocation2 + $0x139] sm:$0xff]  ;;  %v365_v15 = vld [vmem:[#allocation2 + $0x150] sm:$0xff] }
  0x3f   : > { %680 = vrot.lane.b32.xlu1 %v6831_v57, %s7720_s25  ;;  %v6840_v57 = vpack.c.bf16 %v550_v29, %v550_v29  ;;  %v366_v16 = vld [vmem:[#allocation2 + $0x158] sm:$0xff]  ;;  %v8069_v20 = vpack.c.bf16 %v365_v15, %v365_v15  ;;  %v6846_v26 = vpack.c.bf16 %v556_v11, %v556_v11  ;;  %v367_v28 = vld [vmem:[#allocation2 + $0x168] sm:$0xff]  ;;  %v368_v29 = vld [vmem:[#allocation2 + $0x170] sm:$0xff]  ;;  %2974 = vst.msk [vmem:[#allocation3 + $0x8] sm:$0xff] %vm2972_vm6, %v7719_v0 }
  0x40   : > { %686 = vrot.lane.b32.xlu0 %v6834_v59, %s7720_s25  ;;  %v361_v59 = vld [vmem:[#allocation2 + $0x120] sm:$0xff]  ;;  %524 = vst.msk [vmem:[#allocation4 + $0x138] sm:$0xf] %vm497_vm3, %v8059_v9  ;;  %v8071_v21 = vpack.c.bf16 %v366_v16, %v366_v16  ;;  %v558_v27 = vld [vmem:[#allocation2 + $0x151] sm:$0xff]  ;;  %v8079_v34 = vpack.c.bf16 %v367_v28, %v367_v28  ;;  %v8081_v35 = vpack.c.bf16 %v368_v29, %v368_v29  ;;  %v560_v41 = vld [vmem:[#allocation2 + $0x169] sm:$0xff] }
  0x41   : > { %v8049_v62 = vpack.c.bf16 %v361_v59, %v361_v59  ;;  %526 = vst.msk [vmem:[#allocation4 + $0x150] sm:$0xf] %vm497_vm3, %v8069_v20  ;;  %v6848_v40 = vpack.c.bf16 %v558_v27, %v558_v27  ;;  %v559_v43 = vld [vmem:[#allocation2 + $0x159] sm:$0xff]  ;;  %v302_v47 = vld [vmem:[%s7870_s24 + $0xf0] sm:$0xff]  ;;  %v6850_v49 = vpack.c.bf16 %v560_v41, %v560_v41  ;;  %v790_v4 = vld [vmem:[#allocation2 + $0x22] sm:$0xff] }
  0x42   : > { %527 = vst.msk [vmem:[#allocation4 + $0x15c] sm:$0xf] %vm497_vm3, %v8071_v21  ;;  %528 = vst.msk [vmem:[#allocation4 + $0x168] sm:$0xf] %vm497_vm3, %v8079_v34  ;;  %v303_v48 = vld [vmem:[%s7870_s24 + $0xf8] sm:$0xff]  ;;  %v6849_v54 = vpack.c.bf16 %v559_v43, %v559_v43  ;;  %v788_v60 = vld [vmem:[#allocation2 + $0xa] sm:$0xff] }
  0x43   : > { %684 = vrot.lane.b32.xlu1 %v6833_v3, %s7720_s25  ;;  %v6842_v3 = vpack.c.bf16 %v552_v55, %v552_v55  ;;  %522 = vst.msk [vmem:[#allocation4 + $0x120] sm:$0xf] %vm497_vm3, %v8049_v62  ;;  %529 = vst.msk [vmem:[#allocation4 + $0x174] sm:$0xf] %vm497_vm3, %v8081_v35  ;;  %v561_v55 = vld [vmem:[#allocation2 + $0x171] sm:$0xff]  ;;  %v789_v58 = vld [vmem:[#allocation2 + $0x1a] sm:$0xff] }
  0x44   : > { %690 = vrot.lane.b32.xlu0 %v6836_v10, %s7720_s25  ;;  %v8061_v10 = vpack.c.bf16 %v364_v6, %v364_v6  ;;  %335 = vst.msk [vmem:[#allocation2 + $0x181] sm:$0xff] %vm226_vm0, %v302_v47  ;;  %336 = vst.msk [vmem:[#allocation2 + $0x189] sm:$0xff] %vm226_vm0, %v303_v48  ;;  %v6851_v59 = vpack.c.bf16 %v561_v55, %v561_v55  ;;  %v791_v2 = vld [vmem:[#allocation2 + $0x32] sm:$0xff]  ;;  %v793_v6 = vld [vmem:[#allocation2 + $0x4a] sm:$0xff]  ;;  %vm2726_vm0 = vcmask 293888  }
  0x45   : > { %v8103_v5 = vpack.c.bf16 %v791_v2, %v791_v2  ;;  %v792_v11 = vld [vmem:[#allocation2 + $0x3a] sm:$0xff]  ;;  %v795_v15 = vld [vmem:[#allocation2 + $0x62] sm:$0xff]  ;;  %v796_v28 = vld [vmem:[#allocation2 + $0x6a] sm:$0xff]  ;;  %2978 = vst.msk [vmem:[#allocation3 + $0x198] sm:$0xff] %vm2972_vm6, %v7719_v0 }
  0x46   : > { %525 = vst.msk [vmem:[#allocation4 + $0x144] sm:$0xf] %vm497_vm3, %v8061_v10  ;;  %v8114_v16 = vpack.c.bf16 %v792_v11, %v792_v11  ;;  %v800_v47 = vld [vmem:[#allocation2 + $0x9a] sm:$0xff]  ;;  %v807_v2 = vld [vmem:[#allocation2 + $0xf2] sm:$0xff]  ;;  %v809_v11 = vld [vmem:[#allocation2 + $0x10a] sm:$0xff]  ;;  %vm3725_vm3 = vcmask 781824  }
  0x47   : > { %688 = vrot.lane.b32.xlu1 %v6835_v22, %s7720_s25  ;;  %v555_v22 = vld [vmem:[#allocation2 + $0x129] sm:$0xff]  ;;  %2979 = vst.msk [vmem:[#allocation3 + $0x1a0] sm:$0xff] %vm2972_vm6, %v7719_v0 }
  0x48   : > { %694 = vrot.lane.b32.xlu0 %v6838_v36, %s7720_s25  ;;  %v6845_v33 = vpack.c.bf16 %v555_v22, %v555_v22  ;;  %v557_v36 = vld [vmem:[#allocation2 + $0x141] sm:$0xff]  ;;  %v8118_v22 = vpack.c.bf16 %v795_v15, %v795_v15  ;;  %2983 = vst.msk [vmem:[#allocation3 + $0x18] sm:$0x1] %vm2981_vm7, %v7719_v0  ;;  %2984 = vst.msk [vmem:[#allocation3 + $0x30] sm:$0x1] %vm2981_vm7, %v7719_v0 }
  0x49   : > { %v6847_v42 = vpack.c.bf16 %v557_v36, %v557_v36  ;;  %v8128_v36 = vpack.c.bf16 %v796_v28, %v796_v28  ;;  %v811_v28 = vld [vmem:[#allocation2 + $0x122] sm:$0xff]  ;;  %2985 = vst.msk [vmem:[#allocation3 + $0x48] sm:$0x1] %vm2981_vm7, %v7719_v0  ;;  %2986 = vst.msk [vmem:[#allocation3 + $0x60] sm:$0x1] %vm2981_vm7, %v7719_v0 }
  0x4a   : > { %2987 = vst.msk [vmem:[#allocation3 + $0x78] sm:$0x1] %vm2981_vm7, %v7719_v0  ;;  %2988 = vst.msk [vmem:[#allocation3 + $0x90] sm:$0x1] %vm2981_vm7, %v7719_v0 }
  0x4b   : > { %692 = vrot.lane.b32.xlu1 %v6837_v50, %s7720_s25  ;;  %v787_v50 = vld [vmem:[#allocation2 + $0x2] sm:$0xff]  ;;  %2989 = vst.msk [vmem:[#allocation3 + $0xa8] sm:$0x1] %vm2981_vm7, %v7719_v0  ;;  %2990 = vst.msk [vmem:[#allocation3 + $0xc0] sm:$0x1] %vm2981_vm7, %v7719_v0 }
  0x4c   : > { %698 = vrot.lane.b32.xlu0 %v6840_v57, %s7720_s25  ;;  %v6852_v57 = vpack.c.bf16 %v787_v50, %v787_v50  ;;  %v6865_v50 = vpack.c.bf16 %v800_v47, %v800_v47  ;;  %2991 = vst.msk [vmem:[#allocation3 + $0xd8] sm:$0x1] %vm2981_vm7, %v7719_v0  ;;  %2992 = vst.msk [vmem:[#allocation3 + $0xf0] sm:$0x1] %vm2981_vm7, %v7719_v0 }
  0x4d   : > { %2993 = vst.msk [vmem:[#allocation3 + $0x108] sm:$0x1] %vm2981_vm7, %v7719_v0  ;;  %2994 = vst.msk [vmem:[#allocation3 + $0x120] sm:$0x1] %vm2981_vm7, %v7719_v0 }
  0x4e   : > { %2995 = vst.msk [vmem:[#allocation3 + $0x138] sm:$0x1] %vm2981_vm7, %v7719_v0  ;;  %2996 = vst.msk [vmem:[#allocation3 + $0x150] sm:$0x1] %vm2981_vm7, %v7719_v0 }
  0x4f   : > { %696 = vrot.lane.b32.xlu1 %v6839_v61, %s7720_s25  ;;  %v8098_v61 = vpack.c.bf16 %v789_v58, %v789_v58  ;;  %2997 = vst.msk [vmem:[#allocation3 + $0x168] sm:$0x1] %vm2981_vm7, %v7719_v0  ;;  %2998 = vst.msk [vmem:[#allocation3 + $0x180] sm:$0x1] %vm2981_vm7, %v7719_v0 }
  0x50   : > { %702 = vrot.lane.b32.xlu0 %v6842_v3, %s7720_s25  ;;  %v6853_v3 = vpack.c.bf16 %v788_v60, %v788_v60  ;;  %3001 = vst.msk [vmem:[#allocation3 + $0x29] sm:$0x1] %vm2981_vm7, %v7719_v0  ;;  %3002 = vst.msk [vmem:[#allocation3 + $0x41] sm:$0x1] %vm2981_vm7, %v7719_v0 }
  0x51   : > { %3003 = vst.msk [vmem:[#allocation3 + $0x59] sm:$0x1] %vm2981_vm7, %v7719_v0  ;;  %3004 = vst.msk [vmem:[#allocation3 + $0x71] sm:$0x1] %vm2981_vm7, %v7719_v0 }
  0x52   : > { %3005 = vst.msk [vmem:[#allocation3 + $0x89] sm:$0x1] %vm2981_vm7, %v7719_v0  ;;  %3006 = vst.msk [vmem:[#allocation3 + $0xa1] sm:$0x1] %vm2981_vm7, %v7719_v0 }
  0x53   : > { %700 = vrot.lane.b32.xlu1 %v6841_v8, %s7720_s25  ;;  %v8106_v8 = vpack.c.bf16 %v790_v4, %v790_v4  ;;  %v806_v4 = vld [vmem:[#allocation2 + $0xe2] sm:$0xff]  ;;  %3007 = vst.msk [vmem:[#allocation3 + $0xb9] sm:$0x1] %vm2981_vm7, %v7719_v0  ;;  %3008 = vst.msk [vmem:[#allocation3 + $0xd1] sm:$0x1] %vm2981_vm7, %v7719_v0 }
  0x54   : > { %706 = vrot.lane.b32.xlu0 %v6844_v14, %s7720_s25  ;;  %v8110_v14 = vpack.c.bf16 %v793_v6, %v793_v6  ;;  %v6872_v6 = vpack.c.bf16 %v807_v2, %v807_v2  ;;  %v6871_v15 = vpack.c.bf16 %v806_v4, %v806_v4  ;;  %3009 = vst.msk [vmem:[#allocation3 + $0xe9] sm:$0x1] %vm2981_vm7, %v7719_v0  ;;  %3010 = vst.msk [vmem:[#allocation3 + $0x101] sm:$0x1] %vm2981_vm7, %v7719_v0 }
  0x55   : > { %3011 = vst.msk [vmem:[#allocation3 + $0x119] sm:$0x1] %vm2981_vm7, %v7719_v0  ;;  %3012 = vst.msk [vmem:[#allocation3 + $0x131] sm:$0x1] %vm2981_vm7, %v7719_v0 }
  0x56   : > { %3013 = vst.msk [vmem:[#allocation3 + $0x149] sm:$0x1] %vm2981_vm7, %v7719_v0  ;;  %3014 = vst.msk [vmem:[#allocation3 + $0x161] sm:$0x1] %vm2981_vm7, %v7719_v0 }
  0x57   : > { %704 = vrot.lane.b32.xlu1 %v6843_v19, %s7720_s25  ;;  %v794_v19 = vld [vmem:[#allocation2 + $0x52] sm:$0xff]  ;;  %3015 = vst.msk [vmem:[#allocation3 + $0x179] sm:$0x1] %vm2981_vm7, %v7719_v0  ;;  %3016 = vst.msk [vmem:[#allocation3 + $0x191] sm:$0x1] %vm2981_vm7, %v7719_v0 }
  0x58   : > { %710 = vrot.lane.b32.xlu0 %v6846_v26, %s7720_s25  ;;  %v797_v26 = vld [vmem:[#allocation2 + $0x7a] sm:$0xff]  ;;  %v8122_v27 = vpack.c.bf16 %v794_v19, %v794_v19  ;;  %2982 = vst.msk [vmem:[#allocation3] sm:$0x1] %vm2981_vm7, %v7719_v0  ;;  %2999 = vst.msk [vmem:[#allocation3 + $0x198] sm:$0x1] %vm2981_vm7, %v7719_v0 }
  0x59   : > { %v6862_v29 = vpack.c.bf16 %v797_v26, %v797_v26  ;;  %v808_v19 = vld [vmem:[#allocation2 + $0xfa] sm:$0xff]  ;;  %v6874_v26 = vpack.c.bf16 %v809_v11, %v809_v11  ;;  %v818_v11 = vld [vmem:[#allocation2 + $0x172] sm:$0xff]  ;;  %2976 = vst.msk [vmem:[#allocation3 + $0x10] sm:$0x3] %vm2975_vm1, %v7719_v0  ;;  %2980 = vst.msk [vmem:[#allocation3 + $0x1a8] sm:$0x3] %vm2975_vm1, %v7719_v0 }
  0x5a   : > { %3000 = vst.msk [vmem:[#allocation3 + $0x11] sm:$0x1] %vm2981_vm7, %v7719_v0  ;;  %3017 = vst.msk [vmem:[#allocation3 + $0x1a9] sm:$0x1] %vm2981_vm7, %v7719_v0 }
  0x5b   : > { %708 = vrot.lane.b32.xlu1 %v6845_v33, %s7720_s25  ;;  %v799_v33 = vld [vmem:[#allocation2 + $0x92] sm:$0xff] }
  0x5c   : > { %714 = vrot.lane.b32.xlu0 %v6848_v40, %s7720_s25  ;;  %v798_v40 = vld [vmem:[#allocation2 + $0x82] sm:$0xff]  ;;  %v6864_v41 = vpack.c.bf16 %v799_v33, %v799_v33  ;;  %v810_v33 = vld [vmem:[#allocation2 + $0x112] sm:$0xff] }
  0x5d   : > { %v6863_v43 = vpack.c.bf16 %v798_v40, %v798_v40  ;;  %v6876_v40 = vpack.c.bf16 %v811_v28, %v811_v28 }
  0x5f   : > { %712 = vrot.lane.b32.xlu1 %v6847_v42, %s7720_s25  ;;  %v801_v42 = vld [vmem:[#allocation2 + $0xaa] sm:$0xff] }
  0x60   : > { %718 = vrot.lane.b32.xlu0 %v6850_v49, %s7720_s25  ;;  %v6866_v48 = vpack.c.bf16 %v801_v42, %v801_v42  ;;  %v803_v49 = vld [vmem:[#allocation2 + $0xc2] sm:$0xff]  ;;  %v6875_v42 = vpack.c.bf16 %v810_v33, %v810_v33 }
  0x61   : > { %v6868_v55 = vpack.c.bf16 %v803_v49, %v803_v49 }
  0x63   : > { %716 = vrot.lane.b32.xlu1 %v6849_v54, %s7720_s25  ;;  %v802_v54 = vld [vmem:[#allocation2 + $0xb2] sm:$0xff] }
  0x64   : > { %915 = vrot.lane.b32.xlu0 %v6852_v57, %s7721_s26  ;;  %v805_v57 = vld [vmem:[#allocation2 + $0xda] sm:$0xff]  ;;  %v6867_v58 = vpack.c.bf16 %v802_v54, %v802_v54  ;;  %v814_v54 = vld [vmem:[#allocation2 + $0x142] sm:$0xff] }
  0x65   : > { %v6870_v60 = vpack.c.bf16 %v805_v57, %v805_v57  ;;  %v817_v57 = vld [vmem:[#allocation2 + $0x16a] sm:$0xff] }
  0x67   : > { %720 = vrot.lane.b32.xlu1 %v6851_v59, %s7720_s25  ;;  %v804_v59 = vld [vmem:[#allocation2 + $0xca] sm:$0xff] }
  0x68   : > { %919 = vrot.lane.b32.xlu0 %v8098_v61, %s7721_s26 }
  0x6b   : > { %917 = vrot.lane.b32.xlu1 %v6853_v3, %s7721_s26  ;;  %v6869_v3 = vpack.c.bf16 %v804_v59, %v804_v59 }
  0x6c   : > { %923 = vrot.lane.b32.xlu0 %v8103_v5, %s7721_s26 }
  0x6f   : > { %921 = vrot.lane.b32.xlu1 %v8106_v8, %s7721_s26 }
  0x70   : > { %927 = vrot.lane.b32.xlu0 %v8110_v14, %s7721_s26 }
  0x73   : > { %925 = vrot.lane.b32.xlu1 %v8114_v16, %s7721_s26 }
  0x74   : > { %931 = vrot.lane.b32.xlu0 %v8118_v22, %s7721_s26 }
  0x77   : > { %929 = vrot.lane.b32.xlu1 %v8122_v27, %s7721_s26 }
  0x78   : > { %935 = vrot.lane.b32.xlu0 %v6862_v29, %s7721_s26  ;;  %v6873_v29 = vpack.c.bf16 %v808_v19, %v808_v19  ;;  %v6883_v19 = vpack.c.bf16 %v818_v11, %v818_v11  ;;  %v1303_v11 = vld [vmem:[#allocation2 + $0x31] sm:$0xff] }
  0x7b   : > { %933 = vrot.lane.b32.xlu1 %v8128_v36, %s7721_s26 }
  0x7c   : > { %939 = vrot.lane.b32.xlu0 %v6864_v41, %s7721_s26  ;;  %v813_v41 = vld [vmem:[#allocation2 + $0x13a] sm:$0xff] }
  0x7d   : > { %v6878_v47 = vpack.c.bf16 %v813_v41, %v813_v41 }
  0x7f   : > { %937 = vrot.lane.b32.xlu1 %v6863_v43, %s7721_s26  ;;  %v812_v43 = vld [vmem:[#allocation2 + $0x12a] sm:$0xff] }
  0x80   : > { %943 = vrot.lane.b32.xlu0 %v6866_v48, %s7721_s26  ;;  %v815_v48 = vld [vmem:[#allocation2 + $0x152] sm:$0xff]  ;;  %v6877_v49 = vpack.c.bf16 %v812_v43, %v812_v43 }
  0x83   : > { %941 = vrot.lane.b32.xlu1 %v6865_v50, %s7721_s26 }
  0x84   : > { %947 = vrot.lane.b32.xlu0 %v6868_v55, %s7721_s26  ;;  %v6880_v55 = vpack.c.bf16 %v815_v48, %v815_v48 }
  0x87   : > { %945 = vrot.lane.b32.xlu1 %v6867_v58, %s7721_s26  ;;  %v6879_v58 = vpack.c.bf16 %v814_v54, %v814_v54 }
  0x88   : > { %951 = vrot.lane.b32.xlu0 %v6870_v60, %s7721_s26  ;;  %v659_v50 = vpop.permute.xlu0 %658  ;;  %v816_v60 = vld [vmem:[#allocation2 + $0x15a] sm:$0xff] }
  0x89   : > { %755 = vst.msk [vmem:[#allocation4] sm:$0xf] %vm754_vm4, %v659_v50  ;;  %v6881_v4 = vpack.c.bf16 %v816_v60, %v816_v60 }
  0x8b   : > { %949 = vrot.lane.b32.xlu1 %v6869_v3, %s7721_s26  ;;  %v6882_v3 = vpack.c.bf16 %v817_v57, %v817_v57 }
  0x8c   : > { %955 = vrot.lane.b32.xlu0 %v6872_v6, %s7721_s26 }
  0x8f   : > { %953 = vrot.lane.b32.xlu1 %v6871_v15, %s7721_s26 }
  0x90   : > { %959 = vrot.lane.b32.xlu0 %v6874_v26, %s7721_s26 }
  0x93   : > { %957 = vrot.lane.b32.xlu1 %v6873_v29, %s7721_s26 }
  0x94   : > { %963 = vrot.lane.b32.xlu0 %v6876_v40, %s7721_s26 }
  0x97   : > { %961 = vrot.lane.b32.xlu1 %v6875_v42, %s7721_s26 }
  0x98   : > { %967 = vrot.lane.b32.xlu0 %v6878_v47, %s7721_s26 }
  0x9a   : > { %v661_v59 = vpop.permute.xlu0 %660 }
  0x9b   : > { %965 = vrot.lane.b32.xlu1 %v6877_v49, %s7721_s26  ;;  %756 = vst.msk [vmem:[#allocation4 + $0xc] sm:$0xf] %vm754_vm4, %v661_v59 }
  0x9c   : > { %971 = vrot.lane.b32.xlu0 %v6880_v55, %s7721_s26 }
  0x9d   : > { %v663_v2 = vpop.permute.xlu1 %662 }
  0x9e   : > { %757 = vst.msk [vmem:[#allocation4 + $0x18] sm:$0xf] %vm754_vm4, %v663_v2  ;;  %v667_v6 = vpop.permute.xlu0 %666 }
  0x9f   : > { %969 = vrot.lane.b32.xlu1 %v6879_v58, %s7721_s26  ;;  %759 = vst.msk [vmem:[#allocation4 + $0x30] sm:$0xf] %vm754_vm4, %v667_v6 }
  0xa0   : > { %975 = vrot.lane.b32.xlu0 %v6882_v3, %s7721_s26  ;;  %v1301_v3 = vld [vmem:[#allocation2 + $0x19] sm:$0xff] }
  0xa1   : > { %v665_v15 = vpop.permute.xlu1 %664 }
  0xa2   : > { %758 = vst.msk [vmem:[#allocation4 + $0x24] sm:$0xf] %vm754_vm4, %v665_v15  ;;  %v671_v26 = vpop.permute.xlu0 %670 }
  0xa3   : > { %973 = vrot.lane.b32.xlu1 %v6881_v4, %s7721_s26  ;;  %761 = vst.msk [vmem:[#allocation4 + $0x48] sm:$0xf] %vm754_vm4, %v671_v26  ;;  %v1075_v4 = vld [vmem:[#allocation2 + $0x188] sm:$0xff]  ;;  %v8254_v26 = vpack.c.bf16 %v1303_v11, %v1303_v11 }
  0xa4   : > { %1172 = vrot.lane.b32.xlu0 %v7944_v1, %s7722_s27 }
  0xa5   : > { %v669_v28 = vpop.permute.xlu1 %668 }
  0xa6   : > { %760 = vst.msk [vmem:[#allocation4 + $0x3c] sm:$0xf] %vm754_vm4, %v669_v28  ;;  %v675_v29 = vpop.permute.xlu0 %674  ;;  %v1305_v28 = vld [vmem:[#allocation2 + $0x49] sm:$0xff] }
  0xa7   : > { %977 = vrot.lane.b32.xlu1 %v6883_v19, %s7721_s26  ;;  %763 = vst.msk [vmem:[#allocation4 + $0x60] sm:$0xf] %vm754_vm4, %v675_v29  ;;  %v1302_v19 = vld [vmem:[#allocation2 + $0x21] sm:$0xff] }
  0xa8   : > { %1176 = vrot.lane.b32.xlu0 %v7956_v12, %s7722_s27  ;;  %v6917_v29 = vpack.c.bf16 %v1302_v19, %v1302_v19  ;;  %v7625_v19 = vld [vmem:[%s9994_s1] sm:$0xff]  }
  0xa9   : > { %v673_v33 = vpop.permute.xlu1 %672 }
  0xaa   : > { %762 = vst.msk [vmem:[#allocation4 + $0x54] sm:$0xf] %vm754_vm4, %v673_v33  ;;  %v679_v40 = vpop.permute.xlu0 %678 }
  0xab   : > { %1174 = vrot.lane.b32.xlu1 %v7950_v7, %s7722_s27  ;;  %765 = vst.msk [vmem:[#allocation4 + $0x78] sm:$0xf] %vm754_vm4, %v679_v40 }
  0xac   : > { %1180 = vrot.lane.b32.xlu0 %v7964_v17, %s7722_s27 }
  0xad   : > { %v677_v1 = vpop.permute.xlu1 %676 }
  0xae   : > { %764 = vst.msk [vmem:[#allocation4 + $0x6c] sm:$0xf] %vm754_vm4, %v677_v1  ;;  %v683_v41 = vpop.permute.xlu0 %682  ;;  %v8261_v1 = vpack.c.bf16 %v1305_v28, %v1305_v28 }
  0xaf   : > { %1178 = vrot.lane.b32.xlu1 %v7958_v13, %s7722_s27  ;;  %767 = vst.msk [vmem:[#allocation4 + $0x90] sm:$0xf] %vm754_vm4, %v683_v41  ;;  %v1307_v41 = vld [vmem:[#allocation2 + $0x61] sm:$0xff] }
  0xb0   : > { %1184 = vrot.lane.b32.xlu0 %v7973_v23, %s7722_s27 }
  0xb1   : > { %v681_v42 = vpop.permute.xlu1 %680 }
  0xb2   : > { %766 = vst.msk [vmem:[#allocation4 + $0x84] sm:$0xf] %vm754_vm4, %v681_v42  ;;  %v687_v7 = vpop.permute.xlu0 %686 }
  0xb3   : > { %1182 = vrot.lane.b32.xlu1 %v7966_v18, %s7722_s27  ;;  %769 = vst.msk [vmem:[#allocation4 + $0xa8] sm:$0xf] %vm754_vm4, %v687_v7 }
  0xb4   : > { %1188 = vrot.lane.b32.xlu0 %v7977_v25, %s7722_s27 }
  0xb5   : > { %v685_v43 = vpop.permute.xlu1 %684 }
  0xb6   : > { %768 = vst.msk [vmem:[#allocation4 + $0x9c] sm:$0xf] %vm754_vm4, %v685_v43  ;;  %v691_v47 = vpop.permute.xlu0 %690  ;;  %v1306_v43 = vld [vmem:[#allocation2 + $0x51] sm:$0xff] }
  0xb7   : > { %1186 = vrot.lane.b32.xlu1 %v7975_v24, %s7722_s27  ;;  %771 = vst.msk [vmem:[#allocation4 + $0xc0] sm:$0xf] %vm754_vm4, %v691_v47 }
  0xb8   : > { %1192 = vrot.lane.b32.xlu0 %v7985_v31, %s7722_s27 }
  0xb9   : > { %v689_v48 = vpop.permute.xlu1 %688 }
  0xba   : > { %770 = vst.msk [vmem:[#allocation4 + $0xb4] sm:$0xf] %vm754_vm4, %v689_v48  ;;  %v695_v49 = vpop.permute.xlu0 %694  ;;  %v8270_v48 = vpack.c.bf16 %v1307_v41, %v1307_v41 }
  0xbb   : > { %1190 = vrot.lane.b32.xlu1 %v7983_v30, %s7722_s27  ;;  %773 = vst.msk [vmem:[#allocation4 + $0xd8] sm:$0xf] %vm754_vm4, %v695_v49  ;;  %v1309_v49 = vld [vmem:[#allocation2 + $0x79] sm:$0xff] }
  0xbc   : > { %1196 = vrot.lane.b32.xlu0 %v7998_v37, %s7722_s27 }
  0xbd   : > { %v693_v50 = vpop.permute.xlu1 %692 }
  0xbe   : > { %772 = vst.msk [vmem:[#allocation4 + $0xcc] sm:$0xf] %vm754_vm4, %v693_v50  ;;  %v699_v54 = vpop.permute.xlu0 %698  ;;  %v8275_v50 = vpack.c.bf16 %v1306_v43, %v1306_v43 }
  0xbf   : > { %1194 = vrot.lane.b32.xlu1 %v7987_v32, %s7722_s27  ;;  %775 = vst.msk [vmem:[#allocation4 + $0xf0] sm:$0xf] %vm754_vm4, %v699_v54 }
  0xc0   : > { %1200 = vrot.lane.b32.xlu0 %v8002_v39, %s7722_s27 }
  0xc1   : > { %v697_v55 = vpop.permute.xlu1 %696 }
  0xc2   : > { %774 = vst.msk [vmem:[#allocation4 + $0xe4] sm:$0xf] %vm754_vm4, %v697_v55  ;;  %v703_v57 = vpop.permute.xlu0 %702  ;;  %v1308_v55 = vld [vmem:[#allocation2 + $0x69] sm:$0xff] }
  0xc3   : > { %1198 = vrot.lane.b32.xlu1 %v8000_v38, %s7722_s27  ;;  %777 = vst.msk [vmem:[#allocation4 + $0x108] sm:$0xf] %vm754_vm4, %v703_v57 }
  0xc4   : > { %1204 = vrot.lane.b32.xlu0 %v8012_v45, %s7722_s27 }
  0xc5   : > { %v701_v58 = vpop.permute.xlu1 %700 }
  0xc6   : > { %776 = vst.msk [vmem:[#allocation4 + $0xfc] sm:$0xf] %vm754_vm4, %v701_v58  ;;  %v707_v59 = vpop.permute.xlu0 %706  ;;  %v8280_v58 = vpack.c.bf16 %v1309_v49, %v1309_v49 }
  0xc7   : > { %1202 = vrot.lane.b32.xlu1 %v8010_v44, %s7722_s27  ;;  %779 = vst.msk [vmem:[#allocation4 + $0x120] sm:$0xf] %vm754_vm4, %v707_v59  ;;  %v1311_v59 = vld [vmem:[#allocation2 + $0x91] sm:$0xff] }
  0xc8   : > { %1208 = vrot.lane.b32.xlu0 %v8025_v51, %s7722_s27 }
  0xc9   : > { %v705_v39 = vpop.permute.xlu1 %704 }
  0xca   : > { %778 = vst.msk [vmem:[#allocation4 + $0x114] sm:$0xf] %vm754_vm4, %v705_v39  ;;  %v711_v60 = vpop.permute.xlu0 %710  ;;  %v8285_v39 = vpack.c.bf16 %v1308_v55, %v1308_v55 }
  0xcb   : > { %1206 = vrot.lane.b32.xlu1 %v8014_v46, %s7722_s27  ;;  %781 = vst.msk [vmem:[#allocation4 + $0x138] sm:$0xf] %vm754_vm4, %v711_v60 }
  0xcc   : > { %1212 = vrot.lane.b32.xlu0 %v8029_v53, %s7722_s27 }
  0xcd   : > { %v709_v45 = vpop.permute.xlu1 %708 }
  0xce   : > { %780 = vst.msk [vmem:[#allocation4 + $0x12c] sm:$0xf] %vm754_vm4, %v709_v45  ;;  %v715_v44 = vpop.permute.xlu0 %714  ;;  %v1310_v45 = vld [vmem:[#allocation2 + $0x81] sm:$0xff] }
  0xcf   : > { %1210 = vrot.lane.b32.xlu1 %v8027_v52, %s7722_s27  ;;  %783 = vst.msk [vmem:[#allocation4 + $0x150] sm:$0xf] %vm754_vm4, %v715_v44 }
  0xd0   : > { %1216 = vrot.lane.b32.xlu0 %v8049_v62, %s7722_s27 }
  0xd1   : > { %v713_v51 = vpop.permute.xlu1 %712 }
  0xd2   : > { %782 = vst.msk [vmem:[#allocation4 + $0x144] sm:$0xf] %vm754_vm4, %v713_v51  ;;  %v719_v46 = vpop.permute.xlu0 %718  ;;  %v8290_v51 = vpack.c.bf16 %v1311_v59, %v1311_v59 }
  0xd3   : > { %1214 = vrot.lane.b32.xlu1 %v8037_v56, %s7722_s27  ;;  %785 = vst.msk [vmem:[#allocation4 + $0x168] sm:$0xf] %vm754_vm4, %v719_v46  ;;  %v1074_v56 = vld [vmem:[#allocation2 + $0x180] sm:$0xff]  ;;  %v8295_v46 = vpack.c.bf16 %v1310_v45, %v1310_v45 }
  0xd4   : > { %1220 = vrot.lane.b32.xlu0 %v8059_v9, %s7722_s27 }
  0xd5   : > { %v717_v53 = vpop.permute.xlu1 %716 }
  0xd6   : > { %784 = vst.msk [vmem:[#allocation4 + $0x15c] sm:$0xf] %vm754_vm4, %v717_v53  ;;  %v916_v52 = vpop.permute.xlu0 %915 }
  0xd7   : > { %1218 = vrot.lane.b32.xlu1 %v8051_v63, %s7722_s27  ;;  %1012 = vst.msk [vmem:[#allocation4] sm:$0xf] %vm1011_vm5, %v916_v52  ;;  %v6914_v63 = vpack.c.bf16 %v1074_v56, %v1074_v56  ;;  %v1312_v52 = vld [vmem:[#allocation2 + $0x99] sm:$0xff] }
  0xd8   : > { %1224 = vrot.lane.b32.xlu0 %v8069_v20, %s7722_s27  ;;  %v8303_v56 = vpack.c.bf16 %v1312_v52, %v1312_v52 }
  0xd9   : > { %v721_v62 = vpop.permute.xlu1 %720 }
  0xda   : > { %786 = vst.msk [vmem:[#allocation4 + $0x174] sm:$0xf] %vm754_vm4, %v721_v62  ;;  %v920_v9 = vpop.permute.xlu0 %919  ;;  %vm3982_vm4 = vcmask 1044224  }
  0xdb   : > { %1222 = vrot.lane.b32.xlu1 %v8061_v10, %s7722_s27  ;;  %1014 = vst.msk [vmem:[#allocation4 + $0x18] sm:$0xf] %vm1011_vm5, %v920_v9  ;;  %v6916_v10 = vpack.c.bf16 %v1301_v3, %v1301_v3 }
  0xdc   : > { %1228 = vrot.lane.b32.xlu0 %v8079_v34, %s7722_s27  ;;  %v6915_v34 = vpack.c.bf16 %v1075_v4, %v1075_v4 }
  0xdd   : > { %v918_v2 = vpop.permute.xlu1 %917 }
  0xde   : > { %1013 = vst.msk [vmem:[#allocation4 + $0xc] sm:$0xf] %vm1011_vm5, %v918_v2  ;;  %v924_v20 = vpop.permute.xlu0 %923 }
  0xdf   : > { %1226 = vrot.lane.b32.xlu1 %v8071_v21, %s7722_s27  ;;  %1016 = vst.msk [vmem:[#allocation4 + $0x30] sm:$0xf] %vm1011_vm5, %v924_v20 }
  0xe0   : > { %1232 = vrot.lane.b32.xlu0 %v6914_v63, %s7722_s27 }
  0xe1   : > { %v922_v6 = vpop.permute.xlu1 %921 }
  0xe2   : > { %1015 = vst.msk [vmem:[#allocation4 + $0x24] sm:$0xf] %vm1011_vm5, %v922_v6  ;;  %v928_v15 = vpop.permute.xlu0 %927 }
  0xe3   : > { %1230 = vrot.lane.b32.xlu1 %v8081_v35, %s7722_s27  ;;  %1018 = vst.msk [vmem:[#allocation4 + $0x48] sm:$0xf] %vm1011_vm5, %v928_v15  ;;  %v1304_v35 = vld [vmem:[#allocation2 + $0x39] sm:$0xff] }
  0xe4   : > { %1429 = vrot.lane.b32.xlu0 %v6916_v10, %s7723_s28  ;;  %v8265_v42 = vpack.c.bf16 %v1304_v35, %v1304_v35 }
  0xe5   : > { %v926_v21 = vpop.permute.xlu1 %925 }
  0xe6   : > { %1017 = vst.msk [vmem:[#allocation4 + $0x3c] sm:$0xf] %vm1011_vm5, %v926_v21  ;;  %v932_v33 = vpop.permute.xlu0 %931 }
  0xe7   : > { %1234 = vrot.lane.b32.xlu1 %v6915_v34, %s7722_s27  ;;  %1020 = vst.msk [vmem:[#allocation4 + $0x60] sm:$0xf] %vm1011_vm5, %v932_v33  ;;  %v7624_v34 = vld [vmem:[%s9994_s1 + $0x8] sm:$0xff]  }
  0xe8   : > { %1433 = vrot.lane.b32.xlu0 %v8254_v26, %s7723_s28 }
  0xe9   : > { %v930_v40 = vpop.permute.xlu1 %929 }
  0xea   : > { %1019 = vst.msk [vmem:[#allocation4 + $0x54] sm:$0xf] %vm1011_vm5, %v930_v40  ;;  %v936_v7 = vpop.permute.xlu0 %935 }
  0xeb   : > { %1431 = vrot.lane.b32.xlu1 %v6917_v29, %s7723_s28  ;;  %1022 = vst.msk [vmem:[#allocation4 + $0x78] sm:$0xf] %vm1011_vm5, %v936_v7 }
  0xec   : > { %1437 = vrot.lane.b32.xlu0 %v8261_v1, %s7723_s28 }
  0xed   : > { %v934_v47 = vpop.permute.xlu1 %933 }
  0xee   : > { %1021 = vst.msk [vmem:[#allocation4 + $0x6c] sm:$0xf] %vm1011_vm5, %v934_v47  ;;  %v940_v54 = vpop.permute.xlu0 %939 }
  0xef   : > { %1435 = vrot.lane.b32.xlu1 %v8265_v42, %s7723_s28  ;;  %1024 = vst.msk [vmem:[#allocation4 + $0x90] sm:$0xf] %vm1011_vm5, %v940_v54 }
  0xf0   : > { %1441 = vrot.lane.b32.xlu0 %v8270_v48, %s7723_s28 }
  0xf1   : > { %v938_v57 = vpop.permute.xlu1 %937 }
  0xf2   : > { %1023 = vst.msk [vmem:[#allocation4 + $0x84] sm:$0xf] %vm1011_vm5, %v938_v57  ;;  %v944_v60 = vpop.permute.xlu0 %943 }
  0xf3   : > { %1439 = vrot.lane.b32.xlu1 %v8275_v50, %s7723_s28  ;;  %1026 = vst.msk [vmem:[#allocation4 + $0xa8] sm:$0xf] %vm1011_vm5, %v944_v60 }
  0xf4   : > { %1445 = vrot.lane.b32.xlu0 %v8280_v58, %s7723_s28 }
  0xf5   : > { %v942_v44 = vpop.permute.xlu1 %941 }
  0xf6   : > { %1025 = vst.msk [vmem:[#allocation4 + $0x9c] sm:$0xf] %vm1011_vm5, %v942_v44  ;;  %v948_v53 = vpop.permute.xlu0 %947 }
  0xf7   : > { %1443 = vrot.lane.b32.xlu1 %v8285_v39, %s7723_s28  ;;  %1028 = vst.msk [vmem:[#allocation4 + $0xc0] sm:$0xf] %vm1011_vm5, %v948_v53 }
  0xf8   : > { %1449 = vrot.lane.b32.xlu0 %v8290_v51, %s7723_s28 }
  0xf9   : > { %v946_v62 = vpop.permute.xlu1 %945 }
  0xfa   : > { %1027 = vst.msk [vmem:[#allocation4 + $0xb4] sm:$0xf] %vm1011_vm5, %v946_v62  ;;  %v952_v9 = vpop.permute.xlu0 %951  ;;  %v2083_v62 = vld [vmem:[#allocation2 + $0xa9] sm:$0xff] }
  0xfb   : > { %1447 = vrot.lane.b32.xlu1 %v8295_v46, %s7723_s28  ;;  %1030 = vst.msk [vmem:[#allocation4 + $0xd8] sm:$0xf] %vm1011_vm5, %v952_v9 }
  0xfc   : > { %1686 = vrot.lane.b32.xlu0 %v8098_v61, %s7724_s29 }
  0xfd   : > { %v950_v2 = vpop.permute.xlu1 %949 }
  0xfe   : > { %1029 = vst.msk [vmem:[#allocation4 + $0xcc] sm:$0xf] %vm1011_vm5, %v950_v2  ;;  %v956_v63 = vpop.permute.xlu0 %955  ;;  %v7022_v2 = vpack.c.bf16 %v2083_v62, %v2083_v62 }
  0xff   : > { %1451 = vrot.lane.b32.xlu1 %v8303_v56, %s7723_s28  ;;  %1032 = vst.msk [vmem:[#allocation4 + $0xf0] sm:$0xf] %vm1011_vm5, %v956_v63 }
 0x100   : > { %1690 = vrot.lane.b32.xlu0 %v8103_v5, %s7724_s29 }
 0x101   : > { %v954_v3 = vpop.permute.xlu1 %953 }
 0x102   : > { %1031 = vst.msk [vmem:[#allocation4 + $0xe4] sm:$0xf] %vm1011_vm5, %v954_v3  ;;  %v960_v20 = vpop.permute.xlu0 %959 }
 0x103   : > { %1688 = vrot.lane.b32.xlu1 %v8106_v8, %s7724_s29  ;;  %1034 = vst.msk [vmem:[#allocation4 + $0x108] sm:$0xf] %vm1011_vm5, %v960_v20 }
 0x104   : > { %1944 = vrot.lane.b32.xlu0 %v7956_v12, %s7725_s30 }
 0x105   : > { %v958_v61 = vpop.permute.xlu1 %957 }
 0x106   : > { %1033 = vst.msk [vmem:[#allocation4 + $0xfc] sm:$0xf] %vm1011_vm5, %v958_v61  ;;  %v964_v4 = vpop.permute.xlu0 %963 }
 0x107   : > { %1692 = vrot.lane.b32.xlu1 %v8114_v16, %s7724_s29  ;;  %1036 = vst.msk [vmem:[#allocation4 + $0x120] sm:$0xf] %vm1011_vm5, %v964_v4 }
 0x108   : > { %1948 = vrot.lane.b32.xlu0 %v7964_v17, %s7725_s30  ;;  %v7623_v17 = vld [vmem:[%s9994_s1 + $0x10] ss:$0 sps:$4 sm:$0x33]  }
 0x109   : > { %v962_v6 = vpop.permute.xlu1 %961  ;;  %7603 = vmatprep.subr.msk.bf16.mxu0 %vm2775_vm8, %v7623_v17  ;;  %v2777_v10 = vsel %vm2775_vm8, %v7623_v17, 0 }
 0x10a   : > { %1035 = vst.msk [vmem:[#allocation4 + $0x114] sm:$0xf] %vm1011_vm5, %v962_v6  ;;  %v968_v12 = vpop.permute.xlu0 %967  ;;  %7514 = vmatpush3.bf16.msra.mxu0 %v2777_v10  ;;  %v2341_v6 = vld [vmem:[#allocation2 + $0xb2] sm:$0xff] }
 0x10b   : > { %1946 = vrot.lane.b32.xlu1 %v7958_v13, %s7725_s30  ;;  %1038 = vst.msk [vmem:[#allocation4 + $0x138] sm:$0xf] %vm1011_vm5, %v968_v12  ;;  %7515 = vmatprep.subr.bf16.mxu0 %v7624_v34  ;;  %v7055_v17 = vpack.c.bf16 %v2341_v6, %v2341_v6  ;;  %v3052_v6 = vld [vmem:[#allocation3 + $0x8] sm:$0xff] }
 0x10c   : > { %2201 = vrot.lane.b32.xlu0 %v8254_v26, %s7726_s6 }
 0x10d   : > { %v966_v13 = vpop.permute.xlu1 %965 }
 0x10e   : > { %1037 = vst.msk [vmem:[#allocation4 + $0x12c] sm:$0xf] %vm1011_vm5, %v966_v13  ;;  %v972_v8 = vpop.permute.xlu0 %971  ;;  %7516 = vmatpush3.bf16.msra.mxu0 %v7624_v34  ;;  %v1316_v34 = vld [vmem:[#allocation2 + $0xc9] sm:$0xff] }
 0x10f   : > { %1950 = vrot.lane.b32.xlu1 %v7966_v18, %s7725_s30  ;;  %1040 = vst.msk [vmem:[#allocation4 + $0x150] sm:$0xf] %vm1011_vm5, %v972_v8  ;;  %7517 = vmatprep.subr.bf16.mxu0 %v7625_v19 }
 0x110   : > { %2205 = vrot.lane.b32.xlu0 %v8261_v1, %s7726_s6  ;;  %v2336_v1 = vld [vmem:[#allocation2 + $0x7a] sm:$0xff] }
 0x111   : > { %v970_v11 = vpop.permute.xlu1 %969 }
 0x112   : > { %1039 = vst.msk [vmem:[#allocation4 + $0x144] sm:$0xf] %vm1011_vm5, %v970_v11  ;;  %v976_v18 = vpop.permute.xlu0 %975  ;;  %7518 = vmatpush3.bf16.msra.mxu0 %v7625_v19 }
 0x113   : > { %2203 = vrot.lane.b32.xlu1 %v8265_v42, %s7726_s6  ;;  %1042 = vst.msk [vmem:[#allocation4 + $0x168] sm:$0xf] %vm1011_vm5, %v976_v18  ;;  %v2335_v42 = vld [vmem:[#allocation2 + $0x6a] sm:$0xff] }
 0x114   : > { %2458 = vrot.lane.b32.xlu0 %v8103_v5, %s7727_s11  ;;  %v7049_v43 = vpack.c.bf16 %v2335_v42, %v2335_v42  ;;  %v2087_v42 = vld [vmem:[#allocation2 + $0xd9] sm:$0xff] }
 0x115   : > { %v974_v15 = vpop.permute.xlu1 %973 }
 0x116   : > { %1041 = vst.msk [vmem:[#allocation4 + $0x15c] sm:$0xf] %vm1011_vm5, %v974_v15  ;;  %v1173_v21 = vpop.permute.xlu0 %1172  ;;  %v1572_v15 = vld [vmem:[#allocation2 + $0xc2] sm:$0xff] }
 0x117   : > { %2207 = vrot.lane.b32.xlu1 %v8275_v50, %s7726_s6  ;;  %1269 = vst.msk [vmem:[#allocation4] sm:$0xf] %vm1268_vm9, %v1173_v21  ;;  %v1568_v50 = vld [vmem:[#allocation2 + $0x92] sm:$0xff]  ;;  %v6931_v21 = vpack.c.bf16 %v1316_v34, %v1316_v34 }
 0x118   : > { %2462 = vrot.lane.b32.xlu0 %v8110_v14, %s7727_s11 }
 0x119   : > { %v978_v26 = vpop.permute.xlu1 %977 }
 0x11a   : > { %1043 = vst.msk [vmem:[#allocation4 + $0x174] sm:$0xf] %vm1011_vm5, %v978_v26  ;;  %v1177_v5 = vpop.permute.xlu0 %1176 }
 0x11b   : > { %2460 = vrot.lane.b32.xlu1 %v8114_v16, %s7727_s11  ;;  %1271 = vst.msk [vmem:[#allocation4 + $0x18] sm:$0xf] %vm1268_vm9, %v1177_v5  ;;  %v6962_v5 = vpack.c.bf16 %v1572_v15, %v1572_v15 }
 0x11c   : > { %1694 = vrot.lane.b32.xlu0 %v8110_v14, %s7724_s29 }
 0x11d   : > { %v1175_v28 = vpop.permute.xlu1 %1174 }
 0x11e   : > { %1270 = vst.msk [vmem:[#allocation4 + $0xc] sm:$0xf] %vm1268_vm9, %v1175_v28  ;;  %v1181_v29 = vpop.permute.xlu0 %1180  ;;  %v1828_v28 = vld [vmem:[#allocation2 + $0xc0] sm:$0xff] }
 0x11f   : > { %2464 = vrot.lane.b32.xlu1 %v8122_v27, %s7727_s11  ;;  %1273 = vst.msk [vmem:[#allocation4 + $0x30] sm:$0xf] %vm1268_vm9, %v1181_v29 }
 0x120   : > { %1698 = vrot.lane.b32.xlu0 %v8118_v22, %s7724_s29 }
 0x121   : > { %v1179_v33 = vpop.permute.xlu1 %1178 }
 0x122   : > { %1272 = vst.msk [vmem:[#allocation4 + $0x24] sm:$0xf] %vm1268_vm9, %v1179_v33  ;;  %v1185_v16 = vpop.permute.xlu0 %1184  ;;  %v1573_v33 = vld [vmem:[#allocation2 + $0xca] sm:$0xff] }
 0x123   : > { %1696 = vrot.lane.b32.xlu1 %v8122_v27, %s7724_s29  ;;  %1275 = vst.msk [vmem:[#allocation4 + $0x48] sm:$0xf] %vm1268_vm9, %v1185_v16 }
 0x124   : > { %1952 = vrot.lane.b32.xlu0 %v7973_v23, %s7725_s30 }
 0x125   : > { %v1183_v14 = vpop.permute.xlu1 %1182 }
 0x126   : > { %1274 = vst.msk [vmem:[#allocation4 + $0x3c] sm:$0xf] %vm1268_vm9, %v1183_v14  ;;  %v1189_v35 = vpop.permute.xlu0 %1188  ;;  %v6992_v14 = vpack.c.bf16 %v1828_v28, %v1828_v28 }
 0x127   : > { %1700 = vrot.lane.b32.xlu1 %v8128_v36, %s7724_s29  ;;  %1277 = vst.msk [vmem:[#allocation4 + $0x60] sm:$0xf] %vm1268_vm9, %v1189_v35  ;;  %v2334_v36 = vld [vmem:[#allocation2 + $0x62] sm:$0xff]  ;;  %v1830_v35 = vld [vmem:[#allocation2 + $0xd8] sm:$0xff] }
 0x128   : > { %1956 = vrot.lane.b32.xlu0 %v7977_v25, %s7725_s30 }
 0x129   : > { %v1187_v22 = vpop.permute.xlu1 %1186 }
 0x12a   : > { %1276 = vst.msk [vmem:[#allocation4 + $0x54] sm:$0xf] %vm1268_vm9, %v1187_v22  ;;  %v1193_v27 = vpop.permute.xlu0 %1192 }
 0x12b   : > { %1954 = vrot.lane.b32.xlu1 %v7975_v24, %s7725_s30  ;;  %1279 = vst.msk [vmem:[#allocation4 + $0x78] sm:$0xf] %vm1268_vm9, %v1193_v27  ;;  %v7048_v24 = vpack.c.bf16 %v2334_v36, %v2334_v36  ;;  %v6963_v27 = vpack.c.bf16 %v1573_v33, %v1573_v33 }
 0x12c   : > { %2209 = vrot.lane.b32.xlu0 %v8270_v48, %s7726_s6  ;;  %v2337_v48 = vld [vmem:[#allocation2 + $0x82] sm:$0xff] }
 0x12d   : > { %v1191_v23 = vpop.permute.xlu1 %1190  ;;  %v7051_v54 = vpack.c.bf16 %v2337_v48, %v2337_v48 }
 0x12e   : > { %1278 = vst.msk [vmem:[#allocation4 + $0x6c] sm:$0xf] %vm1268_vm9, %v1191_v23  ;;  %v1197_v40 = vpop.permute.xlu0 %1196  ;;  %v1829_v23 = vld [vmem:[#allocation2 + $0xc8] sm:$0xff] }
 0x12f   : > { %1958 = vrot.lane.b32.xlu1 %v7983_v30, %s7725_s30  ;;  %1281 = vst.msk [vmem:[#allocation4 + $0x90] sm:$0xf] %vm1268_vm9, %v1197_v40  ;;  %v7050_v30 = vpack.c.bf16 %v2336_v1, %v2336_v1  ;;  %v6994_v40 = vpack.c.bf16 %v1830_v35, %v1830_v35  ;;  %v1831_v1 = vld [vmem:[#allocation2 + $0xe0] sm:$0xff] }
 0x130   : > { %2213 = vrot.lane.b32.xlu0 %v8280_v58, %s7726_s6  ;;  %v6958_v58 = vpack.c.bf16 %v1568_v50, %v1568_v50 }
 0x131   : > { %v1195_v25 = vpop.permute.xlu1 %1194 }
 0x132   : > { %1280 = vst.msk [vmem:[#allocation4 + $0x84] sm:$0xf] %vm1268_vm9, %v1195_v25  ;;  %v1201_v41 = vpop.permute.xlu0 %1200 }
 0x133   : > { %2211 = vrot.lane.b32.xlu1 %v8285_v39, %s7726_s6  ;;  %1283 = vst.msk [vmem:[#allocation4 + $0xa8] sm:$0xf] %vm1268_vm9, %v1201_v41  ;;  %v1569_v39 = vld [vmem:[#allocation2 + $0x9a] sm:$0xff] }
 0x134   : > { %2466 = vrot.lane.b32.xlu0 %v7048_v24, %s7727_s11  ;;  %v6959_v44 = vpack.c.bf16 %v1569_v39, %v1569_v39  ;;  %v6993_v24 = vpack.c.bf16 %v1829_v23, %v1829_v23 }
 0x135   : > { %v1199_v7 = vpop.permute.xlu1 %1198 }
 0x136   : > { %1282 = vst.msk [vmem:[#allocation4 + $0x9c] sm:$0xf] %vm1268_vm9, %v1199_v7  ;;  %v1205_v47 = vpop.permute.xlu0 %1204 }
 0x137   : > { %2215 = vrot.lane.b32.xlu1 %v8295_v46, %s7726_s6  ;;  %1285 = vst.msk [vmem:[#allocation4 + $0xc0] sm:$0xf] %vm1268_vm9, %v1205_v47  ;;  %v7026_v47 = vpack.c.bf16 %v2087_v42, %v2087_v42 }
 0x138   : > { %2470 = vrot.lane.b32.xlu0 %v7050_v30, %s7727_s11 }
 0x139   : > { %v1203_v49 = vpop.permute.xlu1 %1202 }
 0x13a   : > { %1284 = vst.msk [vmem:[#allocation4 + $0xb4] sm:$0xf] %vm1268_vm9, %v1203_v49  ;;  %v1209_v55 = vpop.permute.xlu0 %1208  ;;  %v2088_v49 = vld [vmem:[#allocation2 + $0xe1] sm:$0xff] }
 0x13b   : > { %2468 = vrot.lane.b32.xlu1 %v7049_v43, %s7727_s11  ;;  %1287 = vst.msk [vmem:[#allocation4 + $0xd8] sm:$0xf] %vm1268_vm9, %v1209_v55 }
 0x13c   : > { %1702 = vrot.lane.b32.xlu0 %v7050_v30, %s7724_s29  ;;  %v6995_v30 = vpack.c.bf16 %v1831_v1, %v1831_v1 }
 0x13d   : > { %v1207_v57 = vpop.permute.xlu1 %1206 }
 0x13e   : > { %1286 = vst.msk [vmem:[#allocation4 + $0xcc] sm:$0xf] %vm1268_vm9, %v1207_v57  ;;  %v1213_v59 = vpop.permute.xlu0 %1212  ;;  %v7027_v57 = vpack.c.bf16 %v2088_v49, %v2088_v49 }
 0x13f   : > { %2472 = vrot.lane.b32.xlu1 %v7051_v54, %s7727_s11  ;;  %1289 = vst.msk [vmem:[#allocation4 + $0xf0] sm:$0xf] %vm1268_vm9, %v1213_v59 }
 0x140   : > { %1706 = vrot.lane.b32.xlu0 %v6958_v58, %s7724_s29 }
 0x141   : > { %v1211_v60 = vpop.permute.xlu1 %1210 }
 0x142   : > { %1288 = vst.msk [vmem:[#allocation4 + $0xe4] sm:$0xf] %vm1268_vm9, %v1211_v60  ;;  %v1217_v45 = vpop.permute.xlu0 %1216  ;;  %v2345_v60 = vld [vmem:[#allocation2 + $0xe2] sm:$0xff] }
 0x143   : > { %1704 = vrot.lane.b32.xlu1 %v7051_v54, %s7724_s29  ;;  %1291 = vst.msk [vmem:[#allocation4 + $0x108] sm:$0xf] %vm1268_vm9, %v1217_v45  ;;  %v2344_v54 = vld [vmem:[#allocation2 + $0xda] sm:$0xff] }
 0x144   : > { %1960 = vrot.lane.b32.xlu0 %v7985_v31, %s7725_s30  ;;  %v7058_v59 = vpack.c.bf16 %v2344_v54, %v2344_v54 }
 0x145   : > { %v1215_v46 = vpop.permute.xlu1 %1214 }
 0x146   : > { %1290 = vst.msk [vmem:[#allocation4 + $0xfc] sm:$0xf] %vm1268_vm9, %v1215_v46  ;;  %v1221_v53 = vpop.permute.xlu0 %1220 }
 0x147   : > { %1708 = vrot.lane.b32.xlu1 %v6959_v44, %s7724_s29  ;;  %1293 = vst.msk [vmem:[#allocation4 + $0x120] sm:$0xf] %vm1268_vm9, %v1221_v53  ;;  %v7059_v53 = vpack.c.bf16 %v2345_v60, %v2345_v60 }
 0x148   : > { %1964 = vrot.lane.b32.xlu0 %v7998_v37, %s7725_s30  ;;  %v2084_v37 = vld [vmem:[#allocation2 + $0xb1] sm:$0xff] }
 0x149   : > { %v1219_v52 = vpop.permute.xlu1 %1218 }
 0x14a   : > { %1292 = vst.msk [vmem:[#allocation4 + $0x114] sm:$0xf] %vm1268_vm9, %v1219_v52  ;;  %v1225_v9 = vpop.permute.xlu0 %1224 }
 0x14b   : > { %1962 = vrot.lane.b32.xlu1 %v7987_v32, %s7725_s30  ;;  %1295 = vst.msk [vmem:[#allocation4 + $0x138] sm:$0xf] %vm1268_vm9, %v1225_v9  ;;  %v2340_v32 = vld [vmem:[#allocation2 + $0xaa] sm:$0xff] }
 0x14c   : > { %2217 = vrot.lane.b32.xlu0 %v8290_v51, %s7726_s6  ;;  %v7023_v51 = vpack.c.bf16 %v2084_v37, %v2084_v37  ;;  %v1576_v37 = vld [vmem:[#allocation2 + $0xf2] sm:$0xff] }
 0x14d   : > { %v1223_v31 = vpop.permute.xlu1 %1222 }
 0x14e   : > { %1294 = vst.msk [vmem:[#allocation4 + $0x12c] sm:$0xf] %vm1268_vm9, %v1223_v31  ;;  %v1229_v63 = vpop.permute.xlu0 %1228  ;;  %v1320_v31 = vld [vmem:[#allocation2 + $0xf9] sm:$0xff] }
 0x14f   : > { %1966 = vrot.lane.b32.xlu1 %v8000_v38, %s7725_s30  ;;  %1297 = vst.msk [vmem:[#allocation4 + $0x150] sm:$0xf] %vm1268_vm9, %v1229_v63  ;;  %v7054_v38 = vpack.c.bf16 %v2340_v32, %v2340_v32  ;;  %v3051_v63 = vld [vmem:[#allocation3] sm:$0xff]  ;;  %v8572_v32 = vpack.c.bf16 %v1320_v31, %v1320_v31 }
 0x150   : > { %2221 = vrot.lane.b32.xlu0 %v7022_v2, %s7726_s6 }
 0x151   : > { %v1227_v3 = vpop.permute.xlu1 %1226 }
 0x152   : > { %1296 = vst.msk [vmem:[#allocation4 + $0x144] sm:$0xf] %vm1268_vm9, %v1227_v3  ;;  %v1233_v20 = vpop.permute.xlu0 %1232 }
 0x153   : > { %2219 = vrot.lane.b32.xlu1 %v8303_v56, %s7726_s6  ;;  %1299 = vst.msk [vmem:[#allocation4 + $0x168] sm:$0xf] %vm1268_vm9, %v1233_v20  ;;  %v1315_v56 = vld [vmem:[#allocation2 + $0xc1] sm:$0xff]  ;;  %v7076_v20 = vpack.c.bf16 %v3051_v63, %v3051_v63 }
 0x154   : > { %2474 = vrot.lane.b32.xlu0 %v6958_v58, %s7727_s11  ;;  %v6930_v10 = vpack.c.bf16 %v1315_v56, %v1315_v56  ;;  %v1577_v56 = vld [vmem:[#allocation2 + $0xfa] sm:$0xff] }
 0x155   : > { %v1231_v61 = vpop.permute.xlu1 %1230  ;;  %v6967_v34 = vpack.c.bf16 %v1577_v56, %v1577_v56  ;;  %v2095_v56 = vld [vmem:[#allocation2 + $0x139] sm:$0xff] }
 0x156   : > { %1298 = vst.msk [vmem:[#allocation4 + $0x15c] sm:$0xf] %vm1268_vm9, %v1231_v61  ;;  %v1430_v4 = vpop.permute.xlu0 %1429  ;;  %v6966_v61 = vpack.c.bf16 %v1576_v37, %v1576_v37  ;;  %v1838_v37 = vld [vmem:[#allocation2 + $0x138] sm:$0xff] }
 0x157   : > { %2223 = vrot.lane.b32.xlu1 %v7023_v51, %s7726_s6  ;;  %1526 = vst.msk [vmem:[#allocation4] sm:$0xf] %vm1525_vm10, %v1430_v4 }
 0x158   : > { %2478 = vrot.lane.b32.xlu0 %v7054_v38, %s7727_s11 }
 0x159   : > { %v1235_v12 = vpop.permute.xlu1 %1234 }
 0x15a   : > { %1300 = vst.msk [vmem:[#allocation4 + $0x174] sm:$0xf] %vm1268_vm9, %v1235_v12  ;;  %v1434_v13 = vpop.permute.xlu0 %1433 }
 0x15b   : > { %2476 = vrot.lane.b32.xlu1 %v6959_v44, %s7727_s11  ;;  %1528 = vst.msk [vmem:[#allocation4 + $0x18] sm:$0xf] %vm1525_vm10, %v1434_v13  ;;  %v1319_v44 = vld [vmem:[#allocation2 + $0xf1] sm:$0xff] }
 0x15c   : > { %1453 = vrot.lane.b32.xlu0 %v7022_v2, %s7723_s28  ;;  %v8563_v62 = vpack.c.bf16 %v1319_v44, %v1319_v44 }
 0x15d   : > { %v1432_v8 = vpop.permute.xlu1 %1431 }
 0x15e   : > { %1527 = vst.msk [vmem:[#allocation4 + $0xc] sm:$0xf] %vm1525_vm10, %v1432_v8  ;;  %v1438_v11 = vpop.permute.xlu0 %1437  ;;  %v7077_v8 = vpack.c.bf16 %v3052_v6, %v3052_v6  ;;  %v1839_v6 = vld [vmem:[#allocation2 + $0x140] sm:$0xff] }
 0x15f   : > { %2480 = vrot.lane.b32.xlu1 %v7055_v17, %s7727_s11  ;;  %1530 = vst.msk [vmem:[#allocation4 + $0x30] sm:$0xf] %vm1525_vm10, %v1438_v11 }
 0x160   : > { %1457 = vrot.lane.b32.xlu0 %v6930_v10, %s7723_s28 }
 0x161   : > { %v1436_v18 = vpop.permute.xlu1 %1435 }
 0x162   : > { %1529 = vst.msk [vmem:[#allocation4 + $0x24] sm:$0xf] %vm1525_vm10, %v1436_v18  ;;  %v1442_v19 = vpop.permute.xlu0 %1441  ;;  %v1833_v18 = vld [vmem:[#allocation2 + $0xf8] sm:$0xff] }
 0x163   : > { %1455 = vrot.lane.b32.xlu1 %v7023_v51, %s7723_s28  ;;  %1532 = vst.msk [vmem:[#allocation4 + $0x48] sm:$0xf] %vm1525_vm10, %v1442_v19  ;;  %v6997_v28 = vpack.c.bf16 %v1833_v18, %v1833_v18 }
 0x164   : > { %1710 = vrot.lane.b32.xlu0 %v7054_v38, %s7724_s29  ;;  %v1832_v38 = vld [vmem:[#allocation2 + $0xf0] sm:$0xff] }
 0x165   : > { %v1440_v26 = vpop.permute.xlu1 %1439 }
 0x166   : > { %1531 = vst.msk [vmem:[#allocation4 + $0x3c] sm:$0xf] %vm1525_vm10, %v1440_v26  ;;  %v1446_v29 = vpop.permute.xlu0 %1445 }
 0x167   : > { %1459 = vrot.lane.b32.xlu1 %v6931_v21, %s7723_s28  ;;  %1534 = vst.msk [vmem:[#allocation4 + $0x60] sm:$0xf] %vm1525_vm10, %v1446_v29  ;;  %v1835_v29 = vld [vmem:[#allocation2 + $0x110] sm:$0xff] }
 0x168   : > { %1714 = vrot.lane.b32.xlu0 %v6962_v5, %s7724_s29 }
 0x169   : > { %v1444_v16 = vpop.permute.xlu1 %1443 }
 0x16a   : > { %1533 = vst.msk [vmem:[#allocation4 + $0x54] sm:$0xf] %vm1525_vm10, %v1444_v16  ;;  %v1450_v22 = vpop.permute.xlu0 %1449 }
 0x16b   : > { %1712 = vrot.lane.b32.xlu1 %v7055_v17, %s7724_s29  ;;  %1536 = vst.msk [vmem:[#allocation4 + $0x78] sm:$0xf] %vm1525_vm10, %v1450_v22  ;;  %v6996_v17 = vpack.c.bf16 %v1832_v38, %v1832_v38  ;;  %v6999_v22 = vpack.c.bf16 %v1835_v29, %v1835_v29  ;;  %v2353_v29 = vld [vmem:[#allocation2 + $0x142] sm:$0xff] }
 0x16c   : > { %1968 = vrot.lane.b32.xlu0 %v6992_v14, %s7725_s30  ;;  %v2091_v14 = vld [vmem:[#allocation2 + $0x109] sm:$0xff] }
 0x16d   : > { %v1448_v36 = vpop.permute.xlu1 %1447  ;;  %v7030_v23 = vpack.c.bf16 %v2091_v14, %v2091_v14 }
 0x16e   : > { %1535 = vst.msk [vmem:[#allocation4 + $0x6c] sm:$0xf] %vm1525_vm10, %v1448_v36  ;;  %v1687_v25 = vpop.permute.xlu0 %1686 }
 0x16f   : > { %1716 = vrot.lane.b32.xlu1 %v6963_v27, %s7724_s29  ;;  %1783 = vst.msk [vmem:[#allocation4] sm:$0xf] %vm1782_vm11, %v1687_v25 }
 0x170   : > { %1972 = vrot.lane.b32.xlu0 %v6994_v40, %s7725_s30  ;;  %v2092_v40 = vld [vmem:[#allocation2 + $0x111] sm:$0xff] }
 0x171   : > { %v1452_v41 = vpop.permute.xlu1 %1451 }
 0x172   : > { %1537 = vst.msk [vmem:[#allocation4 + $0x84] sm:$0xf] %vm1525_vm10, %v1452_v41  ;;  %v1691_v7 = vpop.permute.xlu0 %1690  ;;  %v7031_v41 = vpack.c.bf16 %v2092_v40, %v2092_v40  ;;  %v1328_v40 = vld [vmem:[#allocation2 + $0x159] sm:$0xff] }
 0x173   : > { %1970 = vrot.lane.b32.xlu1 %v6993_v24, %s7725_s30  ;;  %1785 = vst.msk [vmem:[#allocation4 + $0x18] sm:$0xf] %vm1782_vm11, %v1691_v7  ;;  %v2348_v24 = vld [vmem:[#allocation2 + $0x10a] sm:$0xff] }
 0x174   : > { %2225 = vrot.lane.b32.xlu0 %v6930_v10, %s7726_s6  ;;  %v1834_v10 = vld [vmem:[#allocation2 + $0x108] sm:$0xff]  ;;  %v7062_v7 = vpack.c.bf16 %v2348_v24, %v2348_v24 }
 0x175   : > { %v1689_v43 = vpop.permute.xlu1 %1688 }
 0x176   : > { %1784 = vst.msk [vmem:[#allocation4 + $0xc] sm:$0xf] %vm1782_vm11, %v1689_v43  ;;  %v1945_v48 = vpop.permute.xlu0 %1944  ;;  %v2349_v43 = vld [vmem:[#allocation2 + $0x112] sm:$0xff] }
 0x177   : > { %1974 = vrot.lane.b32.xlu1 %v6995_v30, %s7725_s30  ;;  %2041 = vst.msk [vmem:[#allocation4] sm:$0xf] %vm2040_vm12, %v1945_v48  ;;  %v1323_v48 = vld [vmem:[#allocation2 + $0x121] sm:$0xff] }
 0x178   : > { %2229 = vrot.lane.b32.xlu0 %v7026_v47, %s7726_s6 }
 0x179   : > { %v1693_v50 = vpop.permute.xlu1 %1692 }
 0x17a   : > { %1786 = vst.msk [vmem:[#allocation4 + $0x24] sm:$0xf] %vm1782_vm11, %v1693_v50  ;;  %v1949_v55 = vpop.permute.xlu0 %1948  ;;  %v7063_v50 = vpack.c.bf16 %v2349_v43, %v2349_v43  ;;  %v1840_v43 = vld [vmem:[#allocation2 + $0x150] sm:$0xff] }
 0x17b   : > { %2227 = vrot.lane.b32.xlu1 %v6931_v21, %s7726_s6  ;;  %2043 = vst.msk [vmem:[#allocation4 + $0x18] sm:$0xf] %vm2040_vm12, %v1949_v55  ;;  %v6998_v21 = vpack.c.bf16 %v1834_v10, %v1834_v10  ;;  %v6938_v55 = vpack.c.bf16 %v1323_v48, %v1323_v48  ;;  %v7034_v10 = vpack.c.bf16 %v2095_v56, %v2095_v56  ;;  %v1585_v48 = vld [vmem:[#allocation2 + $0x15a] sm:$0xff] }
 0x17c   : > { %2482 = vrot.lane.b32.xlu0 %v6962_v5, %s7727_s11 }
 0x17d   : > { %v1947_v58 = vpop.permute.xlu1 %1946 }
 0x17e   : > { %2042 = vst.msk [vmem:[#allocation4 + $0xc] sm:$0xf] %vm2040_vm12, %v1947_v58  ;;  %v2202_v39 = vpop.permute.xlu0 %2201  ;;  %v1324_v58 = vld [vmem:[#allocation2 + $0x129] sm:$0xff] }
 0x17f   : > { %2231 = vrot.lane.b32.xlu1 %v7027_v57, %s7726_s6  ;;  %2298 = vst.msk [vmem:[#allocation4] sm:$0xf] %vm2297_vm13, %v2202_v39  ;;  %v1580_v39 = vld [vmem:[#allocation2 + $0x122] sm:$0xff] }
 0x180   : > { %2486 = vrot.lane.b32.xlu0 %v7058_v59, %s7727_s11 }
 0x181   : > { %v1951_v45 = vpop.permute.xlu1 %1950 }
 0x182   : > { %2044 = vst.msk [vmem:[#allocation4 + $0x24] sm:$0xf] %vm2040_vm12, %v1951_v45  ;;  %v2206_v46 = vpop.permute.xlu0 %2205  ;;  %v6939_v45 = vpack.c.bf16 %v1324_v58, %v1324_v58  ;;  %v1841_v58 = vld [vmem:[#allocation2 + $0x158] sm:$0xff] }
 0x183   : > { %2484 = vrot.lane.b32.xlu1 %v6963_v27, %s7727_s11  ;;  %2300 = vst.msk [vmem:[#allocation4 + $0x18] sm:$0xf] %vm2297_vm13, %v2206_v46 }
 0x184   : > { %1461 = vrot.lane.b32.xlu0 %v7026_v47, %s7723_s28 }
 0x185   : > { %v2204_v52 = vpop.permute.xlu1 %2203 }
 0x186   : > { %2299 = vst.msk [vmem:[#allocation4 + $0xc] sm:$0xf] %vm2297_vm13, %v2204_v52  ;;  %v2459_v9 = vpop.permute.xlu0 %2458  ;;  %v1836_v52 = vld [vmem:[#allocation2 + $0x120] sm:$0xff] }
 0x187   : > { %2488 = vrot.lane.b32.xlu1 %v7059_v53, %s7727_s11  ;;  %2555 = vst.msk [vmem:[#allocation4] sm:$0xf] %vm2554_vm14, %v2459_v9  ;;  %v1581_v9 = vld [vmem:[#allocation2 + $0x12a] sm:$0xff]  ;;  %v7000_v63 = vpack.c.bf16 %v1836_v52, %v1836_v52 }
 0x188   : > { %1465 = vrot.lane.b32.xlu0 %v8563_v62, %s7723_s28 }
 0x189   : > { %v2208_v2 = vpop.permute.xlu1 %2207 }
 0x18a   : > { %2301 = vst.msk [vmem:[#allocation4 + $0x24] sm:$0xf] %vm2297_vm13, %v2208_v2  ;;  %v2463_v3 = vpop.permute.xlu0 %2462 }
 0x18b   : > { %1463 = vrot.lane.b32.xlu1 %v7027_v57, %s7723_s28  ;;  %2557 = vst.msk [vmem:[#allocation4 + $0x18] sm:$0xf] %vm2554_vm14, %v2463_v3 }
 0x18c   : > { %1718 = vrot.lane.b32.xlu0 %v7058_v59, %s7724_s29 }
 0x18d   : > { %v2461_v51 = vpop.permute.xlu1 %2460 }
 0x18e   : > { %2556 = vst.msk [vmem:[#allocation4 + $0xc] sm:$0xf] %vm2554_vm14, %v2461_v51  ;;  %v2587_v4 = vld [vmem:[#allocation4] sm:$0xf]  ;;  %v1695_v12 = vpop.permute.xlu0 %1694 }
 0x18f   : > { %1467 = vrot.lane.b32.xlu1 %v8572_v32, %s7723_s28  ;;  %3212 = vst.msk [vmem:[#allocation4] sm:$0xf] %vm3211_vm15, %v7076_v20  ;;  %v1837_v20 = vld [vmem:[#allocation2 + $0x128] sm:$0xff] }
 0x190   : > { %1787 = vst.msk [vmem:[#allocation4 + $0x30] sm:$0xf] %vm1782_vm11, %v1695_v12  ;;  %1722 = vrot.lane.b32.xlu0 %v6966_v61, %s7724_s29 }
 0x191   : > { %v2465_v13 = vpop.permute.xlu1 %2464 }
 0x192   : > { %2558 = vst.msk [vmem:[#allocation4 + $0x24] sm:$0xf] %vm2554_vm14, %v2465_v13  ;;  %v1699_v11 = vpop.permute.xlu0 %1698 }
 0x193   : > { %1720 = vrot.lane.b32.xlu1 %v7059_v53, %s7724_s29  ;;  %1789 = vst.msk [vmem:[#allocation4 + $0x48] sm:$0xf] %vm1782_vm11, %v1699_v11  ;;  %v6970_v53 = vpack.c.bf16 %v1580_v39, %v1580_v39 }
 0x194   : > { %1976 = vrot.lane.b32.xlu0 %v6996_v17, %s7725_s30  ;;  %v7003_v17 = vpack.c.bf16 %v1839_v6, %v1839_v6 }
 0x195   : > { %v2588_v15 = vld [vmem:[#allocation4 + $0xc] sm:$0xf]  ;;  %v1697_v19 = vpop.permute.xlu1 %1696 }
 0x196   : > { %3213 = vst.msk [vmem:[#allocation4 + $0xc] sm:$0xf] %vm3211_vm15, %v7077_v8  ;;  %v6378_v26 = vcombine.low %v2587_v4, %v2588_v15  ;;  %v1953_v5 = vpop.permute.xlu0 %1952  ;;  %v7001_v4 = vpack.c.bf16 %v1837_v20, %v1837_v20  ;;  %v2352_v15 = vld [vmem:[#allocation2 + $0x13a] sm:$0xff] }
 0x197   : > { %1788 = vst.msk [vmem:[#allocation4 + $0x3c] sm:$0xf] %vm1782_vm11, %v1697_v19  ;;  %1724 = vrot.lane.b32.xlu1 %v6967_v34, %s7724_s29 }
 0x198   : > { %7519 = vmatprep.mubr.msk.bf16.mxu0 %vm2726_vm0, %v6378_v26  ;;  %2045 = vst.msk [vmem:[#allocation4 + $0x30] sm:$0xf] %vm2040_vm12, %v1953_v5  ;;  %1980 = vrot.lane.b32.xlu0 %v6998_v21, %s7725_s30  ;;  %v7066_v5 = vpack.c.bf16 %v2352_v15, %v2352_v15 }
 0x199   : > { %v1701_v33 = vpop.permute.xlu1 %1700  ;;  %v7626_v16 = vld [vmem:[#allocation4 + $0x18] ss:$12 sps:$4 sm:$0xff]  }
 0x19a   : > { %1790 = vst.msk [vmem:[#allocation4 + $0x54] sm:$0xf] %vm1782_vm11, %v1701_v33  ;;  %7520 = vmatmul.mubr.msk.bf16.vlgmr.msra.gmra.mxu0 %vm2726_vm0, %v7626_v16  ;;  %v1957_v35 = vpop.permute.xlu0 %1956  ;;  %v1327_v16 = vld [vmem:[#allocation2 + $0x151] sm:$0xff] }
 0x19b   : > { %1978 = vrot.lane.b32.xlu1 %v6997_v28, %s7725_s30  ;;  %2047 = vst.msk [vmem:[#allocation4 + $0x48] sm:$0xf] %vm2040_vm12, %v1957_v35  ;;  %v7067_v35 = vpack.c.bf16 %v2353_v29, %v2353_v29  ;;  %v1844_v29 = vld [vmem:[#allocation2 + $0x180] sm:$0xff] }
 0x19c   : > { %2233 = vrot.lane.b32.xlu0 %v8563_v62, %s7726_s6 }
 0x19d   : > { %v1955_v27 = vpop.permute.xlu1 %1954 }
 0x19e   : > { %2046 = vst.msk [vmem:[#allocation4 + $0x3c] sm:$0xf] %vm2040_vm12, %v1955_v27  ;;  %v2210_v36 = vpop.permute.xlu0 %2209 }
 0x19f   : > { %1982 = vrot.lane.b32.xlu1 %v6999_v22, %s7725_s30  ;;  %2302 = vst.msk [vmem:[#allocation4 + $0x30] sm:$0xf] %vm2297_vm13, %v2210_v36 }
 0x1a0   : > { %2237 = vrot.lane.b32.xlu0 %v7030_v23, %s7726_s6 }
 0x1a1   : > { %v1959_v25 = vpop.permute.xlu1 %1958 }
 0x1a2   : > { %2048 = vst.msk [vmem:[#allocation4 + $0x54] sm:$0xf] %vm2040_vm12, %v1959_v25  ;;  %v2214_v1 = vpop.permute.xlu0 %2213 }
 0x1a3   : > { %2235 = vrot.lane.b32.xlu1 %v8572_v32, %s7726_s6  ;;  %2304 = vst.msk [vmem:[#allocation4 + $0x48] sm:$0xf] %vm2297_vm13, %v2214_v1  ;;  %v6971_v32 = vpack.c.bf16 %v1581_v9, %v1581_v9  ;;  %v1584_v1 = vld [vmem:[#allocation2 + $0x152] sm:$0xff] }
 0x1a4   : > { %2490 = vrot.lane.b32.xlu0 %v6966_v61, %s7727_s11  ;;  %v7002_v61 = vpack.c.bf16 %v1838_v37, %v1838_v37 }
 0x1a5   : > { %v2212_v42 = vpop.permute.xlu1 %2211 }
 0x1a6   : > { %2303 = vst.msk [vmem:[#allocation4 + $0x3c] sm:$0xf] %vm2297_vm13, %v2212_v42  ;;  %v2467_v30 = vpop.permute.xlu0 %2466  ;;  %v6943_v42 = vpack.c.bf16 %v1328_v40, %v1328_v40 }
 0x1a7   : > { %2239 = vrot.lane.b32.xlu1 %v7031_v41, %s7726_s6  ;;  %2559 = vst.msk [vmem:[#allocation4 + $0x30] sm:$0xf] %vm2554_vm14, %v2467_v30  ;;  %v6974_v30 = vpack.c.bf16 %v1584_v1, %v1584_v1 }
 0x1a8   : > { %2494 = vrot.lane.b32.xlu0 %v7062_v7, %s7727_s11 }
 0x1a9   : > { %v2216_v47 = vpop.permute.xlu1 %2215 }
 0x1aa   : > { %2305 = vst.msk [vmem:[#allocation4 + $0x54] sm:$0xf] %vm2297_vm13, %v2216_v47  ;;  %v2471_v49 = vpop.permute.xlu0 %2470 }
 0x1ab   : > { %2492 = vrot.lane.b32.xlu1 %v6967_v34, %s7727_s11  ;;  %2561 = vst.msk [vmem:[#allocation4 + $0x48] sm:$0xf] %vm2554_vm14, %v2471_v49  ;;  %v2096_v34 = vld [vmem:[#allocation2 + $0x141] sm:$0xff] }
 0x1ac   : > { %1469 = vrot.lane.b32.xlu0 %v7030_v23, %s7723_s28  ;;  %v7035_v21 = vpack.c.bf16 %v2096_v34, %v2096_v34  ;;  %v6942_v23 = vpack.c.bf16 %v1327_v16, %v1327_v16  ;;  %v1332_v34 = vld [vmem:[#allocation2 + $0x189] sm:$0xff] }
 0x1ad   : > { %v2469_v54 = vpop.permute.xlu1 %2468  ;;  %v1589_v16 = vld [vmem:[#allocation2 + $0x18a] sm:$0xff] }
 0x1ae   : > { %2560 = vst.msk [vmem:[#allocation4 + $0x3c] sm:$0xf] %vm2554_vm14, %v2469_v54  ;;  %v1703_v57 = vpop.permute.xlu0 %1702  ;;  %v1842_v54 = vld [vmem:[#allocation2 + $0x168] sm:$0xff] }
 0x1af   : > { %2496 = vrot.lane.b32.xlu1 %v7063_v50, %s7727_s11  ;;  %1791 = vst.msk [vmem:[#allocation4 + $0x60] sm:$0xf] %vm1782_vm11, %v1703_v57  ;;  %v6975_v57 = vpack.c.bf16 %v1585_v48, %v1585_v48  ;;  %v7006_v39 = vpack.c.bf16 %v1842_v54, %v1842_v54 }
 0x1b0   : > { %1473 = vrot.lane.b32.xlu0 %v6938_v55, %s7723_s28 }
 0x1b1   : > { %v2473_v59 = vpop.permute.xlu1 %2472 }
 0x1b2   : > { %2562 = vst.msk [vmem:[#allocation4 + $0x54] sm:$0xf] %vm2554_vm14, %v2473_v59  ;;  %v1707_v60 = vpop.permute.xlu0 %1706 }
 0x1b3   : > { %1471 = vrot.lane.b32.xlu1 %v7031_v41, %s7723_s28  ;;  %1793 = vst.msk [vmem:[#allocation4 + $0x78] sm:$0xf] %vm1782_vm11, %v1707_v60 }
 0x1b4   : > { %1726 = vrot.lane.b32.xlu0 %v7062_v7, %s7724_s29 }
 0x1b5   : > { %v7627_v44 = vld [vmem:[#allocation4 + $0x30] ss:$12 sps:$4 sm:$0xff]   ;;  %v1705_v46 = vpop.permute.xlu1 %1704 }
 0x1b6   : > { %1792 = vst.msk [vmem:[#allocation4 + $0x6c] sm:$0xf] %vm1782_vm11, %v1705_v46  ;;  %7523 = vmatprep.mubr.msk.bf16.mxu0 %vm2726_vm0, %v7627_v44  ;;  %v1961_v62 = vpop.permute.xlu0 %1960  ;;  %v1843_v44 = vld [vmem:[#allocation2 + $0x170] sm:$0xff] }
 0x1b7   : > { %1475 = vrot.lane.b32.xlu1 %v6939_v45, %s7723_s28  ;;  %2049 = vst.msk [vmem:[#allocation4 + $0x60] sm:$0xf] %vm2040_vm12, %v1961_v62  ;;  %v7007_v62 = vpack.c.bf16 %v1843_v44, %v1843_v44 }
 0x1b8   : > { %1730 = vrot.lane.b32.xlu0 %v6970_v53, %s7724_s29 }
 0x1b9   : > { %v7628_v31 = vld [vmem:[#allocation4 + $0x48] ss:$12 sps:$4 sm:$0xff]   ;;  %v1709_v2 = vpop.permute.xlu1 %1708 }
 0x1ba   : > { %1794 = vst.msk [vmem:[#allocation4 + $0x84] sm:$0xf] %vm1782_vm11, %v1709_v2  ;;  %7524 = vmatmul.mubr.msk.bf16.gmra.mxu0 %vm2726_vm0, %v7628_v31  ;;  %v1965_v3 = vpop.permute.xlu0 %1964 }
 0x1bb   : > { %1728 = vrot.lane.b32.xlu1 %v7063_v50, %s7724_s29  ;;  %2051 = vst.msk [vmem:[#allocation4 + $0x78] sm:$0xf] %vm2040_vm12, %v1965_v3  ;;  %v7004_v50 = vpack.c.bf16 %v1840_v43, %v1840_v43  ;;  %v2356_v3 = vld [vmem:[#allocation2 + $0x16a] sm:$0xff] }
 0x1bc   : > { %1984 = vrot.lane.b32.xlu0 %v7000_v63, %s7725_s30  ;;  %v2100_v63 = vld [vmem:[#allocation2 + $0x171] sm:$0xff] }
 0x1bd   : > { %v1963_v51 = vpop.permute.xlu1 %1962  ;;  %v7039_v20 = vpack.c.bf16 %v2100_v63, %v2100_v63 }
 0x1be   : > { %2050 = vst.msk [vmem:[#allocation4 + $0x6c] sm:$0xf] %vm2040_vm12, %v1963_v51  ;;  %v2218_v38 = vpop.permute.xlu0 %2217 }
 0x1bf   : > { %1732 = vrot.lane.b32.xlu1 %v6971_v32, %s7724_s29  ;;  %2306 = vst.msk [vmem:[#allocation4 + $0x60] sm:$0xf] %vm2297_vm13, %v2218_v38 }
 0x1c0   : > { %1988 = vrot.lane.b32.xlu0 %v7002_v61, %s7725_s30  ;;  %v7070_v61 = vpack.c.bf16 %v2356_v3, %v2356_v3 }
 0x1c1   : > { %v1967_v12 = vpop.permute.xlu1 %1966 }
 0x1c2   : > { %2052 = vst.msk [vmem:[#allocation4 + $0x84] sm:$0xf] %vm2040_vm12, %v1967_v12  ;;  %v2222_v13 = vpop.permute.xlu0 %2221  ;;  %v1331_v12 = vld [vmem:[#allocation2 + $0x181] sm:$0xff] }
 0x1c3   : > { %1986 = vrot.lane.b32.xlu1 %v7001_v4, %s7725_s30  ;;  %2308 = vst.msk [vmem:[#allocation4 + $0x78] sm:$0xf] %vm2297_vm13, %v2222_v13  ;;  %v2357_v4 = vld [vmem:[#allocation2 + $0x172] sm:$0xff] }
 0x1c4   : > { %2241 = vrot.lane.b32.xlu0 %v6938_v55, %s7726_s6  ;;  %v7071_v13 = vpack.c.bf16 %v2357_v4, %v2357_v4 }
 0x1c5   : > { %v2220_v8 = vpop.permute.xlu1 %2219 }
 0x1c6   : > { %2307 = vst.msk [vmem:[#allocation4 + $0x6c] sm:$0xf] %vm2297_vm13, %v2220_v8  ;;  %v2475_v11 = vpop.permute.xlu0 %2474 }
 0x1c7   : > { %1990 = vrot.lane.b32.xlu1 %v7003_v17, %s7725_s30  ;;  %2563 = vst.msk [vmem:[#allocation4 + $0x60] sm:$0xf] %vm2554_vm14, %v2475_v11 }
 0x1c8   : > { %2245 = vrot.lane.b32.xlu0 %v7034_v10, %s7726_s6 }
 0x1c9   : > { %v2224_v18 = vpop.permute.xlu1 %2223 }
 0x1ca   : > { %2309 = vst.msk [vmem:[#allocation4 + $0x84] sm:$0xf] %vm2297_vm13, %v2224_v18  ;;  %v2479_v19 = vpop.permute.xlu0 %2478 }
 0x1cb   : > { %2243 = vrot.lane.b32.xlu1 %v6939_v45, %s7726_s6  ;;  %2565 = vst.msk [vmem:[#allocation4 + $0x78] sm:$0xf] %vm2554_vm14, %v2479_v19  ;;  %v7005_v45 = vpack.c.bf16 %v1841_v58, %v1841_v58  ;;  %v1588_v19 = vld [vmem:[#allocation2 + $0x182] sm:$0xff] }
 0x1cc   : > { %2498 = vrot.lane.b32.xlu0 %v6970_v53, %s7727_s11  ;;  %v2099_v53 = vld [vmem:[#allocation2 + $0x169] sm:$0xff] }
 0x1cd   : > { %v2477_v26 = vpop.permute.xlu1 %2476  ;;  %v7038_v31 = vpack.c.bf16 %v2099_v53, %v2099_v53 }
 0x1ce   : > { %2564 = vst.msk [vmem:[#allocation4 + $0x6c] sm:$0xf] %vm2554_vm14, %v2477_v26  ;;  %v1454_v28 = vpop.permute.xlu0 %1453  ;;  %v6947_v26 = vpack.c.bf16 %v1332_v34, %v1332_v34 }
 0x1cf   : > { %2247 = vrot.lane.b32.xlu1 %v7035_v21, %s7726_s6  ;;  %1538 = vst.msk [vmem:[#allocation4 + $0x90] sm:$0xf] %vm1525_vm10, %v1454_v28  ;;  %v6978_v28 = vpack.c.bf16 %v1588_v19, %v1588_v19 }
 0x1d0   : > { %2502 = vrot.lane.b32.xlu0 %v7066_v5, %s7727_s11 }
 0x1d1   : > { %v2481_v33 = vpop.permute.xlu1 %2480 }
 0x1d2   : > { %2566 = vst.msk [vmem:[#allocation4 + $0x84] sm:$0xf] %vm2554_vm14, %v2481_v33  ;;  %v1458_v14 = vpop.permute.xlu0 %1457 }
 0x1d3   : > { %2500 = vrot.lane.b32.xlu1 %v6971_v32, %s7727_s11  ;;  %1540 = vst.msk [vmem:[#allocation4 + $0xa8] sm:$0xf] %vm1525_vm10, %v1458_v14 }
 0x1d4   : > { %1477 = vrot.lane.b32.xlu0 %v7034_v10, %s7723_s28  ;;  %v6946_v10 = vpack.c.bf16 %v1331_v12, %v1331_v12 }
 0x1d5   : > { %v7629_v22 = vld [vmem:[#allocation4 + $0x60] ss:$12 sps:$4 sm:$0xff]   ;;  %v1456_v27 = vpop.permute.xlu1 %1455 }
 0x1d6   : > { %1539 = vst.msk [vmem:[#allocation4 + $0x9c] sm:$0xf] %vm1525_vm10, %v1456_v27  ;;  %7527 = vmatprep.mubr.msk.bf16.mxu0 %vm2726_vm0, %v7629_v22  ;;  %v1711_v36 = vpop.permute.xlu0 %1710  ;;  %v1846_v22 = vld [vmem:[#allocation2 + $0x198] sm:$0xff] }
 0x1d7   : > { %2504 = vrot.lane.b32.xlu1 %v7067_v35, %s7727_s11  ;;  %1795 = vst.msk [vmem:[#allocation4 + $0x90] sm:$0xf] %vm1782_vm11, %v1711_v36  ;;  %v1845_v36 = vld [vmem:[#allocation2 + $0x188] sm:$0xff] }
 0x1d8   : > { %1481 = vrot.lane.b32.xlu0 %v6942_v23, %s7723_s28  ;;  %v7009_v1 = vpack.c.bf16 %v1845_v36, %v1845_v36 }
 0x1d9   : > { %v7630_v25 = vld [vmem:[#allocation4 + $0x78] ss:$12 sps:$4 sm:$0xff]   ;;  %v1460_v24 = vpop.permute.xlu1 %1459 }
 0x1da   : > { %1541 = vst.msk [vmem:[#allocation4 + $0xb4] sm:$0xf] %vm1525_vm10, %v1460_v24  ;;  %7528 = vmatmul.mubr.msk.bf16.gmra.mxu0 %vm2726_vm0, %v7630_v25  ;;  %v1715_v41 = vpop.permute.xlu0 %1714  ;;  %v7010_v25 = vpack.c.bf16 %v1846_v22, %v1846_v22 }
 0x1db   : > { %1479 = vrot.lane.b32.xlu1 %v7035_v21, %s7723_s28  ;;  %1797 = vst.msk [vmem:[#allocation4 + $0xa8] sm:$0xf] %vm1782_vm11, %v1715_v41  ;;  %v1847_v41 = vld [vmem:[#allocation2 + $0x1a0] sm:$0xff] }
 0x1dc   : > { %1734 = vrot.lane.b32.xlu0 %v7066_v5, %s7724_s29  ;;  %v7011_v43 = vpack.c.bf16 %v1847_v41, %v1847_v41 }
 0x1dd   : > { %v1713_v7 = vpop.permute.xlu1 %1712 }
 0x1de   : > { %1796 = vst.msk [vmem:[#allocation4 + $0x9c] sm:$0xf] %vm1782_vm11, %v1713_v7  ;;  %v1969_v47 = vpop.permute.xlu0 %1968  ;;  %v2103_v7 = vld [vmem:[#allocation2 + $0x199] sm:$0xff] }
 0x1df   : > { %1483 = vrot.lane.b32.xlu1 %v6943_v42, %s7723_s28  ;;  %2053 = vst.msk [vmem:[#allocation4 + $0x90] sm:$0xf] %vm2040_vm12, %v1969_v47  ;;  %v7042_v48 = vpack.c.bf16 %v2103_v7, %v2103_v7 }
 0x1e0   : > { %1738 = vrot.lane.b32.xlu0 %v6974_v30, %s7724_s29 }
 0x1e1   : > { %v1717_v49 = vpop.permute.xlu1 %1716 }
 0x1e2   : > { %1798 = vst.msk [vmem:[#allocation4 + $0xb4] sm:$0xf] %vm1782_vm11, %v1717_v49  ;;  %v1973_v55 = vpop.permute.xlu0 %1972 }
 0x1e3   : > { %1736 = vrot.lane.b32.xlu1 %v7067_v35, %s7724_s29  ;;  %2055 = vst.msk [vmem:[#allocation4 + $0xa8] sm:$0xf] %vm2040_vm12, %v1973_v55  ;;  %v7008_v35 = vpack.c.bf16 %v1844_v29, %v1844_v29  ;;  %v2360_v55 = vld [vmem:[#allocation2 + $0x19a] sm:$0xff] }
 0x1e4   : > { %1992 = vrot.lane.b32.xlu0 %v7004_v50, %s7725_s30  ;;  %v2104_v50 = vld [vmem:[#allocation2 + $0x1a1] sm:$0xff]  ;;  %v8774_v29 = vld [vmem:[%s9995_s2] ss:$0 sm:$0xff] }
 0x1e5   : > { %v1971_v59 = vpop.permute.xlu1 %1970  ;;  %v7043_v58 = vpack.c.bf16 %v2104_v50, %v2104_v50 }
 0x1e6   : > { %2054 = vst.msk [vmem:[#allocation4 + $0x9c] sm:$0xf] %vm2040_vm12, %v1971_v59  ;;  %v2226_v60 = vpop.permute.xlu0 %2225 }
 0x1e7   : > { %1740 = vrot.lane.b32.xlu1 %v6975_v57, %s7724_s29  ;;  %2310 = vst.msk [vmem:[#allocation4 + $0x90] sm:$0xf] %vm2297_vm13, %v2226_v60 }
 0x1e8   : > { %1996 = vrot.lane.b32.xlu0 %v7006_v39, %s7725_s30  ;;  %v7074_v39 = vpack.c.bf16 %v2360_v55, %v2360_v55 }
 0x1e9   : > { %v1975_v46 = vpop.permute.xlu1 %1974 }
 0x1ea   : > { %2056 = vst.msk [vmem:[#allocation4 + $0xb4] sm:$0xf] %vm2040_vm12, %v1975_v46  ;;  %v2230_v52 = vpop.permute.xlu0 %2229 }
 0x1eb   : > { %1994 = vrot.lane.b32.xlu1 %v7005_v45, %s7725_s30  ;;  %2312 = vst.msk [vmem:[#allocation4 + $0xa8] sm:$0xf] %vm2297_vm13, %v2230_v52  ;;  %v2361_v45 = vld [vmem:[#allocation2 + $0x1a2] sm:$0xff] }
 0x1ec   : > { %2249 = vrot.lane.b32.xlu0 %v6942_v23, %s7726_s6  ;;  %v6979_v23 = vpack.c.bf16 %v1589_v16, %v1589_v16  ;;  %v7075_v53 = vpack.c.bf16 %v2361_v45, %v2361_v45 }
 0x1ed   : > { %v2228_v9 = vpop.permute.xlu1 %2227 }
 0x1ee   : > { %2311 = vst.msk [vmem:[#allocation4 + $0x9c] sm:$0xf] %vm2297_vm13, %v2228_v9  ;;  %v2483_v2 = vpop.permute.xlu0 %2482 }
 0x1ef   : > { %1998 = vrot.lane.b32.xlu1 %v7007_v62, %s7725_s30  ;;  %2567 = vst.msk [vmem:[#allocation4 + $0x90] sm:$0xf] %vm2554_vm14, %v2483_v2 }
 0x1f0   : > { %2253 = vrot.lane.b32.xlu0 %v7038_v31, %s7726_s6 }
 0x1f1   : > { %v2232_v37 = vpop.permute.xlu1 %2231 }
 0x1f2   : > { %2313 = vst.msk [vmem:[#allocation4 + $0xb4] sm:$0xf] %vm2297_vm13, %v2232_v37  ;;  %v2487_v32 = vpop.permute.xlu0 %2486 }
 0x1f3   : > { %2251 = vrot.lane.b32.xlu1 %v6943_v42, %s7726_s6  ;;  %2569 = vst.msk [vmem:[#allocation4 + $0xa8] sm:$0xf] %vm2554_vm14, %v2487_v32 }
 0x1f4   : > { %2506 = vrot.lane.b32.xlu0 %v6974_v30, %s7727_s11 }
 0x1f5   : > { %v2485_v51 = vpop.permute.xlu1 %2484 }
 0x1f6   : > { %2568 = vst.msk [vmem:[#allocation4 + $0x9c] sm:$0xf] %vm2554_vm14, %v2485_v51  ;;  %v1462_v38 = vpop.permute.xlu0 %1461 }
 0x1f7   : > { %2255 = vrot.lane.b32.xlu1 %v7039_v20, %s7726_s6  ;;  %1542 = vst.msk [vmem:[#allocation4 + $0xc0] sm:$0xf] %vm1525_vm10, %v1462_v38 }
 0x1f8   : > { %2510 = vrot.lane.b32.xlu0 %v7070_v61, %s7727_s11 }
 0x1f9   : > { %v2489_v6 = vpop.permute.xlu1 %2488 }
 0x1fa   : > { %2570 = vst.msk [vmem:[#allocation4 + $0xb4] sm:$0xf] %vm2554_vm14, %v2489_v6  ;;  %v1466_v56 = vpop.permute.xlu0 %1465 }
 0x1fb   : > { %2508 = vrot.lane.b32.xlu1 %v6975_v57, %s7727_s11  ;;  %1544 = vst.msk [vmem:[#allocation4 + $0xd8] sm:$0xf] %vm1525_vm10, %v1466_v56 }
 0x1fc   : > { %1485 = vrot.lane.b32.xlu0 %v7038_v31, %s7723_s28 }
 0x1fd   : > { %v7631_v17 = vld [vmem:[#allocation4 + $0x90] ss:$12 sps:$4 sm:$0xff]   ;;  %v1464_v8 = vpop.permute.xlu1 %1463 }
 0x1fe   : > { %1543 = vst.msk [vmem:[#allocation4 + $0xcc] sm:$0xf] %vm1525_vm10, %v1464_v8  ;;  %7531 = vmatprep.mubr.msk.bf16.mxu0 %vm2726_vm0, %v7631_v17  ;;  %v1719_v11 = vpop.permute.xlu0 %1718 }
 0x1ff   : > { %2512 = vrot.lane.b32.xlu1 %v7071_v13, %s7727_s11  ;;  %1799 = vst.msk [vmem:[#allocation4 + $0xc0] sm:$0xf] %vm1782_vm11, %v1719_v11 }
 0x200   : > { %1489 = vrot.lane.b32.xlu0 %v6946_v10, %s7723_s28 }
 0x201   : > { %v7632_v18 = vld [vmem:[#allocation4 + $0xa8] ss:$12 sps:$4 sm:$0xff]   ;;  %v1468_v15 = vpop.permute.xlu1 %1467 }
 0x202   : > { %1545 = vst.msk [vmem:[#allocation4 + $0xe4] sm:$0xf] %vm1525_vm10, %v1468_v15  ;;  %7532 = vmatmul.mubr.msk.bf16.gmra.mxu0 %vm2726_vm0, %v7632_v18  ;;  %v1723_v21 = vpop.permute.xlu0 %1722 }
 0x203   : > { %1487 = vrot.lane.b32.xlu1 %v7039_v20, %s7723_s28  ;;  %1801 = vst.msk [vmem:[#allocation4 + $0xd8] sm:$0xf] %vm1782_vm11, %v1723_v21 }
 0x204   : > { %1742 = vrot.lane.b32.xlu0 %v7070_v61, %s7724_s29 }
 0x205   : > { %v1721_v5 = vpop.permute.xlu1 %1720 }
 0x206   : > { %1800 = vst.msk [vmem:[#allocation4 + $0xcc] sm:$0xf] %vm1782_vm11, %v1721_v5  ;;  %v1977_v33 = vpop.permute.xlu0 %1976 }
 0x207   : > { %1491 = vrot.lane.b32.xlu1 %v6947_v26, %s7723_s28  ;;  %2057 = vst.msk [vmem:[#allocation4 + $0xc0] sm:$0xf] %vm2040_vm12, %v1977_v33  ;;  %s7729_s28 = smov 96  }
 0x208   : > { %1746 = vrot.lane.b32.xlu0 %v6978_v28, %s7724_s29 }
 0x209   : > { %v1725_v14 = vpop.permute.xlu1 %1724 }
 0x20a   : > { %1802 = vst.msk [vmem:[#allocation4 + $0xe4] sm:$0xf] %vm1782_vm11, %v1725_v14  ;;  %v1981_v27 = vpop.permute.xlu0 %1980 }
 0x20b   : > { %1744 = vrot.lane.b32.xlu1 %v7071_v13, %s7724_s29  ;;  %2059 = vst.msk [vmem:[#allocation4 + $0xd8] sm:$0xf] %vm2040_vm12, %v1981_v27 }
 0x20c   : > { %2000 = vrot.lane.b32.xlu0 %v7008_v35, %s7725_s30 }
 0x20d   : > { %v1979_v40 = vpop.permute.xlu1 %1978 }
 0x20e   : > { %2058 = vst.msk [vmem:[#allocation4 + $0xcc] sm:$0xf] %vm2040_vm12, %v1979_v40  ;;  %v2234_v24 = vpop.permute.xlu0 %2233 }
 0x20f   : > { %1748 = vrot.lane.b32.xlu1 %v6979_v23, %s7724_s29  ;;  %2314 = vst.msk [vmem:[#allocation4 + $0xc0] sm:$0xf] %vm2297_vm13, %v2234_v24 }
 0x210   : > { %2004 = vrot.lane.b32.xlu0 %v7010_v25, %s7725_s30 }
 0x211   : > { %v1983_v42 = vpop.permute.xlu1 %1982 }
 0x212   : > { %2060 = vst.msk [vmem:[#allocation4 + $0xe4] sm:$0xf] %vm2040_vm12, %v1983_v42  ;;  %v2238_v30 = vpop.permute.xlu0 %2237 }
 0x213   : > { %2002 = vrot.lane.b32.xlu1 %v7009_v1, %s7725_s30  ;;  %2316 = vst.msk [vmem:[#allocation4 + $0xd8] sm:$0xf] %vm2297_vm13, %v2238_v30 }
 0x214   : > { %2257 = vrot.lane.b32.xlu0 %v6946_v10, %s7726_s6 }
 0x215   : > { %v2236_v47 = vpop.permute.xlu1 %2235 }
 0x216   : > { %2315 = vst.msk [vmem:[#allocation4 + $0xcc] sm:$0xf] %vm2297_vm13, %v2236_v47  ;;  %v2491_v49 = vpop.permute.xlu0 %2490 }
 0x217   : > { %2006 = vrot.lane.b32.xlu1 %v7011_v43, %s7725_s30  ;;  %2571 = vst.msk [vmem:[#allocation4 + $0xc0] sm:$0xf] %vm2554_vm14, %v2491_v49 }
 0x218   : > { %2261 = vrot.lane.b32.xlu0 %v7042_v48, %s7726_s6 }
 0x219   : > { %v2240_v54 = vpop.permute.xlu1 %2239 }
 0x21a   : > { %2317 = vst.msk [vmem:[#allocation4 + $0xe4] sm:$0xf] %vm2297_vm13, %v2240_v54  ;;  %v2495_v57 = vpop.permute.xlu0 %2494 }
 0x21b   : > { %2259 = vrot.lane.b32.xlu1 %v6947_v26, %s7726_s6  ;;  %2573 = vst.msk [vmem:[#allocation4 + $0xd8] sm:$0xf] %vm2554_vm14, %v2495_v57 }
 0x21c   : > { %2514 = vrot.lane.b32.xlu0 %v6978_v28, %s7727_s11 }
 0x21d   : > { %v2493_v59 = vpop.permute.xlu1 %2492 }
 0x21e   : > { %2572 = vst.msk [vmem:[#allocation4 + $0xcc] sm:$0xf] %vm2554_vm14, %v2493_v59  ;;  %v1470_v60 = vpop.permute.xlu0 %1469 }
 0x21f   : > { %2263 = vrot.lane.b32.xlu1 %v7043_v58, %s7726_s6  ;;  %1546 = vst.msk [vmem:[#allocation4 + $0xf0] sm:$0xf] %vm1525_vm10, %v1470_v60 }
 0x220   : > { %2518 = vrot.lane.b32.xlu0 %v7074_v39, %s7727_s11 }
 0x221   : > { %v2497_v44 = vpop.permute.xlu1 %2496 }
 0x222   : > { %2574 = vst.msk [vmem:[#allocation4 + $0xe4] sm:$0xf] %vm2554_vm14, %v2497_v44  ;;  %v1474_v46 = vpop.permute.xlu0 %1473 }
 0x223   : > { %2516 = vrot.lane.b32.xlu1 %v6979_v23, %s7727_s11  ;;  %1548 = vst.msk [vmem:[#allocation4 + $0x108] sm:$0xf] %vm1525_vm10, %v1474_v46 }
 0x225   : > { %v7633_v52 = vld [vmem:[#allocation4 + $0xc0] ss:$12 sps:$4 sm:$0xff]   ;;  %v1472_v62 = vpop.permute.xlu1 %1471 }
 0x226   : > { %1547 = vst.msk [vmem:[#allocation4 + $0xfc] sm:$0xf] %vm1525_vm10, %v1472_v62  ;;  %7535 = vmatprep.mubr.msk.bf16.mxu0 %vm2726_vm0, %v7633_v52  ;;  %v1727_v9 = vpop.permute.xlu0 %1726 }
 0x227   : > { %2520 = vrot.lane.b32.xlu1 %v7075_v53, %s7727_s11  ;;  %1803 = vst.msk [vmem:[#allocation4 + $0xf0] sm:$0xf] %vm1782_vm11, %v1727_v9 }
 0x229   : > { %v7634_v31 = vld [vmem:[#allocation4 + $0xd8] ss:$12 sps:$4 sm:$0xff]   ;;  %v1476_v2 = vpop.permute.xlu1 %1475 }
 0x22a   : > { %1549 = vst.msk [vmem:[#allocation4 + $0x114] sm:$0xf] %vm1525_vm10, %v1476_v2  ;;  %7536 = vmatmul.mubr.msk.bf16.gmra.mxu0 %vm2726_vm0, %v7634_v31  ;;  %v1731_v63 = vpop.permute.xlu0 %1730 }
 0x22b   : > { %1805 = vst.msk [vmem:[#allocation4 + $0x108] sm:$0xf] %vm1782_vm11, %v1731_v63 }
 0x22d   : > { %v1729_v37 = vpop.permute.xlu1 %1728 }
 0x22e   : > { %1804 = vst.msk [vmem:[#allocation4 + $0xfc] sm:$0xf] %vm1782_vm11, %v1729_v37  ;;  %v1985_v3 = vpop.permute.xlu0 %1984 }
 0x22f   : > { %2061 = vst.msk [vmem:[#allocation4 + $0xf0] sm:$0xf] %vm2040_vm12, %v1985_v3 }
 0x231   : > { %v1733_v32 = vpop.permute.xlu1 %1732 }
 0x232   : > { %1806 = vst.msk [vmem:[#allocation4 + $0x114] sm:$0xf] %vm1782_vm11, %v1733_v32  ;;  %v1989_v20 = vpop.permute.xlu0 %1988 }
 0x233   : > { %2063 = vst.msk [vmem:[#allocation4 + $0x108] sm:$0xf] %vm2040_vm12, %v1989_v20 }
 0x235   : > { %v1987_v51 = vpop.permute.xlu1 %1986 }
 0x236   : > { %2062 = vst.msk [vmem:[#allocation4 + $0xfc] sm:$0xf] %vm2040_vm12, %v1987_v51  ;;  %v2242_v61 = vpop.permute.xlu0 %2241 }
 0x237   : > { %2318 = vst.msk [vmem:[#allocation4 + $0xf0] sm:$0xf] %vm2297_vm13, %v2242_v61 }
 0x239   : > { %v1991_v38 = vpop.permute.xlu1 %1990 }
 0x23a   : > { %2064 = vst.msk [vmem:[#allocation4 + $0x114] sm:$0xf] %vm2040_vm12, %v1991_v38  ;;  %v2246_v4 = vpop.permute.xlu0 %2245 }
 0x23b   : > { %2320 = vst.msk [vmem:[#allocation4 + $0x108] sm:$0xf] %vm2297_vm13, %v2246_v4 }
 0x23d   : > { %v2244_v6 = vpop.permute.xlu1 %2243 }
 0x23e   : > { %2319 = vst.msk [vmem:[#allocation4 + $0xfc] sm:$0xf] %vm2297_vm13, %v2244_v6  ;;  %v2499_v12 = vpop.permute.xlu0 %2498 }
 0x23f   : > { %2575 = vst.msk [vmem:[#allocation4 + $0xf0] sm:$0xf] %vm2554_vm14, %v2499_v12 }
 0x241   : > { %v2248_v56 = vpop.permute.xlu1 %2247 }
 0x242   : > { %2321 = vst.msk [vmem:[#allocation4 + $0x114] sm:$0xf] %vm2297_vm13, %v2248_v56  ;;  %v2503_v13 = vpop.permute.xlu0 %2502 }
 0x243   : > { %2577 = vst.msk [vmem:[#allocation4 + $0x108] sm:$0xf] %vm2554_vm14, %v2503_v13 }
 0x245   : > { %v2501_v17 = vpop.permute.xlu1 %2500 }
 0x246   : > { %2576 = vst.msk [vmem:[#allocation4 + $0xfc] sm:$0xf] %vm2554_vm14, %v2501_v17  ;;  %v1478_v8 = vpop.permute.xlu0 %1477 }
 0x247   : > { %1550 = vst.msk [vmem:[#allocation4 + $0x120] sm:$0xf] %vm1525_vm10, %v1478_v8 }
 0x249   : > { %v2505_v10 = vpop.permute.xlu1 %2504 }
 0x24a   : > { %2578 = vst.msk [vmem:[#allocation4 + $0x114] sm:$0xf] %vm2554_vm14, %v2505_v10  ;;  %v1482_v11 = vpop.permute.xlu0 %1481 }
 0x24b   : > { %1552 = vst.msk [vmem:[#allocation4 + $0x138] sm:$0xf] %vm1525_vm10, %v1482_v11  ;;  %v7641_v11 = vld [vmem:[%s9996_s3 + $0x78] sm:$0xff]  }
 0x24c   : > { %7587 = vmatprep.subr.bf16.mxu1 %v7641_v11  ;;  %7383 = vmatprep.subr.bf16.mxu0 %v7641_v11  ;;  %v7653_v11 = vld [vmem:[%s9996_s3 + $0x48] sm:$0xff]  }
 0x24d   : > { %v7635_v34 = vld [vmem:[#allocation4 + $0xf0] ss:$12 sps:$4 sm:$0xff]   ;;  %v1480_v18 = vpop.permute.xlu1 %1479 }
 0x24e   : > { %1551 = vst.msk [vmem:[#allocation4 + $0x12c] sm:$0xf] %vm1525_vm10, %v1480_v18  ;;  %7539 = vmatprep.mubr.msk.bf16.mxu0 %vm2726_vm0, %v7635_v34  ;;  %v1735_v15 = vpop.permute.xlu0 %1734  ;;  %v7642_v34 = vld [vmem:[%s9996_s3 + $0x38] sm:$0xff]  }
 0x24f   : > { %1807 = vst.msk [vmem:[#allocation4 + $0x120] sm:$0xf] %vm1782_vm11, %v1735_v15  ;;  %7595 = vmatpush3.bf16.msra.mxu1 %v7642_v34  ;;  %7384 = vmatpush3.bf16.msra.mxu0 %v7642_v34 }
 0x251   : > { %v7636_v19 = vld [vmem:[#allocation4 + $0x108] ss:$12 sps:$4 sm:$0xff]   ;;  %v1484_v21 = vpop.permute.xlu1 %1483 }
 0x252   : > { %1553 = vst.msk [vmem:[#allocation4 + $0x144] sm:$0xf] %vm1525_vm10, %v1484_v21  ;;  %7540 = vmatmul.mubr.msk.bf16.gmra.mxu0 %vm2726_vm0, %v7636_v19  ;;  %v1739_v26 = vpop.permute.xlu0 %1738 }
 0x253   : > { %1809 = vst.msk [vmem:[#allocation4 + $0x138] sm:$0xf] %vm1782_vm11, %v1739_v26  ;;  %v7643_v26 = vld [vmem:[%s9996_s3 + $0x70] sm:$0xff]  }
 0x254   : > { %7588 = vmatprep.subr.bf16.mxu1 %v7643_v26  ;;  %7385 = vmatprep.subr.bf16.mxu0 %v7643_v26 }
 0x255   : > { %v1737_v5 = vpop.permute.xlu1 %1736 }
 0x256   : > { %1808 = vst.msk [vmem:[#allocation4 + $0x12c] sm:$0xf] %vm1782_vm11, %v1737_v5  ;;  %v1993_v28 = vpop.permute.xlu0 %1992  ;;  %v7644_v5 = vld [vmem:[%s9996_s3 + $0x30] sm:$0xff]  }
 0x257   : > { %2065 = vst.msk [vmem:[#allocation4 + $0x120] sm:$0xf] %vm2040_vm12, %v1993_v28  ;;  %7596 = vmatpush3.bf16.msra.mxu1 %v7644_v5  ;;  %7386 = vmatpush3.bf16.msra.mxu0 %v7644_v5 }
 0x259   : > { %v1741_v33 = vpop.permute.xlu1 %1740 }
 0x25a   : > { %1810 = vst.msk [vmem:[#allocation4 + $0x144] sm:$0xf] %vm1782_vm11, %v1741_v33  ;;  %v7521_v16 = vpop.f32.mrf.mxu0  ;;  %v1997_v14 = vpop.permute.xlu0 %1996 }
 0x25b   : > { %v2822_v35 = vadd.f32 %v7521_v16, %v8774_v29  ;;  %2067 = vst.msk [vmem:[#allocation4 + $0x138] sm:$0xf] %vm2040_vm12, %v1997_v14 }
 0x25c   : > { %v2813_v22 = vpop.f32.mrf.mxu0 }
 0x25d   : > { %v1995_v27 = vpop.permute.xlu1 %1994  ;;  %v2942_v23 = vmax.f32 %v2822_v35, 0.0  ;;  %v2814_v36 = vadd.f32 %v8774_v29, %v2813_v22  ;;  %v7645_v22 = vld [vmem:[%s9996_s3 + $0x68] sm:$0xff]  }
 0x25e   : > { %2066 = vst.msk [vmem:[#allocation4 + $0x12c] sm:$0xf] %vm2040_vm12, %v1995_v27  ;;  %v7522_v40 = vpop.f32.mrf.mxu0  ;;  %v2250_v25 = vpop.permute.xlu0 %2249  ;;  %7589 = vmatprep.subr.bf16.mxu1 %v7645_v22  ;;  %7387 = vmatprep.subr.bf16.mxu0 %v7645_v22 }
 0x25f   : > { %3021 = vst.msk [vmem:[#allocation3 + $0x31] sm:$0xff] %vm2972_vm6, %v2942_v23  ;;  %v2940_v24 = vmax.f32 %v2814_v36, 0.0  ;;  %v2825_v1 = vadd.f32 %v7522_v40, %v8774_v29  ;;  %v7646_v36 = vld [vmem:[%s9996_s3 + $0x28] sm:$0xff]  }
 0x260   : > { %2322 = vst.msk [vmem:[#allocation4 + $0x120] sm:$0xf] %vm2297_vm13, %v2250_v25  ;;  %v2816_v41 = vpop.f32.mrf.mxu0  ;;  %7597 = vmatpush3.bf16.msra.mxu1 %v7646_v36  ;;  %7388 = vmatpush3.bf16.msra.mxu0 %v7646_v36 }
 0x261   : > { %v1999_v42 = vpop.permute.xlu1 %1998  ;;  %3019 = vst.msk [vmem:[#allocation3 + $0x19] sm:$0xff] %vm2972_vm6, %v2940_v24  ;;  %v2943_v7 = vmax.f32 %v2825_v1, 0.0  ;;  %v2817_v30 = vadd.f32 %v8774_v29, %v2816_v41 }
 0x262   : > { %2068 = vst.msk [vmem:[#allocation4 + $0x144] sm:$0xf] %vm2040_vm12, %v1999_v42  ;;  %v2254_v43 = vpop.permute.xlu0 %2253 }
 0x263   : > { %3022 = vst.msk [vmem:[#allocation3 + $0x39] sm:$0xff] %vm2972_vm6, %v2943_v7  ;;  %v2941_v47 = vmax.f32 %v2817_v30, 0.0  ;;  %v7647_v7 = vld [vmem:[%s9996_s3 + $0x60] sm:$0xff]  }
 0x264   : > { %2324 = vst.msk [vmem:[#allocation4 + $0x138] sm:$0xf] %vm2297_vm13, %v2254_v43  ;;  %7590 = vmatprep.subr.bf16.mxu1 %v7647_v7  ;;  %7389 = vmatprep.subr.bf16.mxu0 %v7647_v7 }
 0x265   : > { %v2252_v48 = vpop.permute.xlu1 %2251  ;;  %3020 = vst.msk [vmem:[#allocation3 + $0x21] sm:$0xff] %vm2972_vm6, %v2941_v47  ;;  %v7648_v47 = vld [vmem:[%s9996_s3 + $0x20] sm:$0xff]  }
 0x266   : > { %2323 = vst.msk [vmem:[#allocation4 + $0x12c] sm:$0xf] %vm2297_vm13, %v2252_v48  ;;  %v3760_v49 = vld [vmem:[#allocation3 + $0x30] sm:$0xff]  ;;  %v2507_v54 = vpop.permute.xlu0 %2506  ;;  %7598 = vmatpush3.bf16.msra.mxu1 %v7648_v47  ;;  %7390 = vmatpush3.bf16.msra.mxu0 %v7648_v47 }
 0x267   : > { %v3248_v50 = vld [vmem:[#allocation3 + $0x31] sm:$0xff]  ;;  %v8791_v55 = vpack.c.bf16 %v3760_v49, %v3760_v49  ;;  %2579 = vst.msk [vmem:[#allocation4 + $0x120] sm:$0xf] %vm2554_vm14, %v2507_v54 }
 0x268   : > { %v8793_v57 = vpack.c.bf16 %v3248_v50, %v3248_v50  ;;  %v3246_v58 = vld [vmem:[#allocation3 + $0x19] sm:$0xff] }
 0x269   : > { %v2256_v59 = vpop.permute.xlu1 %2255  ;;  %v3053_v39 = vld [vmem:[#allocation3 + $0x18] sm:$0xff]  ;;  %v7110_v45 = vpack.c.bf16 %v3246_v58, %v3246_v58  ;;  %3216 = vst.msk [vmem:[#allocation4 + $0x30] sm:$0xf] %vm3211_vm15, %v8791_v55  ;;  %v7649_v58 = vld [vmem:[%s9996_s3 + $0x58] sm:$0xff]  }
 0x26a   : > { %v4015_v60 = vld [vmem:[#allocation3 + $0x19] sm:$0xff]  ;;  %2325 = vst.msk [vmem:[#allocation4 + $0x144] sm:$0xf] %vm2297_vm13, %v2256_v59  ;;  %v8797_v44 = vpack.c.bf16 %v3053_v39, %v3053_v39  ;;  %v2511_v9 = vpop.permute.xlu0 %2510  ;;  %v7650_v39 = vld [vmem:[%s9996_s3 + $0x18] sm:$0xff]   ;;  %7591 = vmatprep.subr.bf16.mxu1 %v7649_v58  ;;  %7391 = vmatprep.subr.bf16.mxu0 %v7649_v58 }
 0x26b   : > { %4177 = vst.msk [vmem:[#allocation4 + $0x1c] sm:$0xf] %vm3211_vm15, %v8793_v57  ;;  %v7204_v46 = vpack.c.bf16 %v4015_v60, %v4015_v60  ;;  %v4976_v53 = vld [vmem:[#allocation3 + $0x32] sm:$0xff]  ;;  %v4977_v52 = vld [vmem:[#allocation3 + $0x3a] sm:$0xff]  ;;  %3376 = vrot.lane.b32.xlu0 %v7110_v45, %s7727_s11  ;;  %7599 = vmatpush3.bf16.msra.mxu1 %v7650_v39 }
 0x26c   : > { %v3761_v62 = vld [vmem:[#allocation3 + $0x38] sm:$0xff]  ;;  %v8803_v31 = vpack.c.bf16 %v4976_v53, %v4976_v53  ;;  %v8805_v2 = vpack.c.bf16 %v4977_v52, %v4977_v52  ;;  %2581 = vst.msk [vmem:[#allocation4 + $0x138] sm:$0xf] %vm2554_vm14, %v2511_v9  ;;  %v3247_v3 = vld [vmem:[#allocation3 + $0x21] sm:$0xff]  ;;  %7392 = vmatpush3.bf16.msra.mxu0 %v7650_v39 }
 0x26d   : > { %v8808_v63 = vpack.c.bf16 %v3761_v62, %v3761_v62  ;;  %v3249_v37 = vld [vmem:[#allocation3 + $0x39] sm:$0xff]  ;;  %3214 = vst.msk [vmem:[#allocation4 + $0x18] sm:$0xf] %vm3211_vm15, %v8797_v44  ;;  %4175 = vst.msk [vmem:[#allocation4 + $0x4] sm:$0xf] %vm3211_vm15, %v7204_v46  ;;  %v2509_v20 = vpop.permute.xlu1 %2508  ;;  %v7111_v51 = vpack.c.bf16 %v3247_v3, %v3247_v3  ;;  %v4016_v12 = vld [vmem:[#allocation3 + $0x21] sm:$0xff] }
 0x26e   : > { %v8814_v32 = vpack.c.bf16 %v3249_v37, %v3249_v37  ;;  %5136 = vst.msk [vmem:[#allocation4 + $0x8] sm:$0xf] %vm3211_vm15, %v8803_v31  ;;  %5137 = vst.msk [vmem:[#allocation4 + $0x14] sm:$0xf] %vm3211_vm15, %v8805_v2  ;;  %v3054_v61 = vld [vmem:[#allocation3 + $0x20] sm:$0xff]  ;;  %v1486_v4 = vpop.permute.xlu0 %1485  ;;  %v7205_v56 = vpack.c.bf16 %v4016_v12, %v4016_v12 }
 0x26f   : > { %2580 = vst.msk [vmem:[#allocation4 + $0x12c] sm:$0xf] %vm2554_vm14, %v2509_v20  ;;  %v3503_v38 = vld [vmem:[#allocation3 + $0x1a] sm:$0xff]  ;;  %v8823_v6 = vpack.c.bf16 %v3054_v61, %v3054_v61  ;;  %3378 = vrot.lane.b32.xlu1 %v7111_v51, %s7727_s11  ;;  %4339 = vrot.lane.b32.xlu0 %v8803_v31, %s7727_s11  ;;  %v3504_v8 = vld [vmem:[#allocation3 + $0x22] sm:$0xff] }
 0x270   : > { %3217 = vst.msk [vmem:[#allocation4 + $0x3c] sm:$0xf] %vm3211_vm15, %v8808_v63  ;;  %4178 = vst.msk [vmem:[#allocation4 + $0x28] sm:$0xf] %vm3211_vm15, %v8814_v32  ;;  %v7142_v17 = vpack.c.bf16 %v3503_v38, %v3503_v38  ;;  %v7143_v19 = vpack.c.bf16 %v3504_v8, %v3504_v8  ;;  %v7651_v52 = vld [vmem:[%s9996_s3 + $0x50] sm:$0xff]  }
 0x271   : > { %1554 = vst.msk [vmem:[#allocation4 + $0x150] sm:$0xf] %vm1525_vm10, %v1486_v4  ;;  %v2513_v13 = vpop.permute.xlu1 %2512  ;;  %v7652_v20 = vld [vmem:[%s9996_s3 + $0x10] sm:$0xff]   ;;  %7592 = vmatprep.subr.bf16.mxu1 %v7651_v52  ;;  %7393 = vmatprep.subr.bf16.mxu0 %v7651_v52 }
 0x272   : > { %3215 = vst.msk [vmem:[#allocation4 + $0x24] sm:$0xf] %vm3211_vm15, %v8823_v6  ;;  %4176 = vst.msk [vmem:[#allocation4 + $0x10] sm:$0xf] %vm3211_vm15, %v7205_v56  ;;  %v1490_v10 = vpop.permute.xlu0 %1489  ;;  %7600 = vmatpush3.bf16.msra.mxu1 %v7652_v20  ;;  %7394 = vmatpush3.bf16.msra.mxu0 %v7652_v20 }
 0x273   : > { %2582 = vst.msk [vmem:[#allocation4 + $0x144] sm:$0xf] %vm2554_vm14, %v2513_v13  ;;  %4341 = vrot.lane.b32.xlu1 %v8805_v2, %s7727_s11  ;;  %3633 = vrot.lane.b32.xlu0 %v7142_v17, %s7728_s16 }
 0x274   : > { %1556 = vst.msk [vmem:[#allocation4 + $0x168] sm:$0xf] %vm1525_vm10, %v1490_v10  ;;  %7593 = vmatprep.subr.bf16.mxu1 %v7653_v11  ;;  %7395 = vmatprep.subr.bf16.mxu0 %v7653_v11 }
 0x275   : > { %v1488_v18 = vpop.permute.xlu1 %1487 }
 0x276   : > { %v7637_v15 = vld [vmem:[#allocation4 + $0x120] ss:$12 sps:$4 sm:$0xff]   ;;  %1555 = vst.msk [vmem:[#allocation4 + $0x15c] sm:$0xf] %vm1525_vm10, %v1488_v18  ;;  %v1743_v21 = vpop.permute.xlu0 %1742 }
 0x277   : > { %7543 = vmatprep.mubr.msk.bf16.mxu0 %vm2726_vm0, %v7637_v15  ;;  %3635 = vrot.lane.b32.xlu1 %v7143_v19, %s7728_s16  ;;  %1811 = vst.msk [vmem:[#allocation4 + $0x150] sm:$0xf] %vm1782_vm11, %v1743_v21 }
 0x279   : > { %v1492_v33 = vpop.permute.xlu1 %1491 }
 0x27a   : > { %v7638_v28 = vld [vmem:[#allocation4 + $0x138] ss:$12 sps:$4 sm:$0xff]   ;;  %1557 = vst.msk [vmem:[#allocation4 + $0x174] sm:$0xf] %vm1525_vm10, %v1492_v33  ;;  %v7525_v16 = vpop.f32.mrf.mxu0  ;;  %v1747_v14 = vpop.permute.xlu0 %1746 }
 0x27b   : > { %7544 = vmatmul.mubr.msk.bf16.gmra.mxu0 %vm2726_vm0, %v7638_v28  ;;  %v2838_v35 = vadd.f32 %v7525_v16, %v8774_v29  ;;  %1813 = vst.msk [vmem:[#allocation4 + $0x168] sm:$0xf] %vm1782_vm11, %v1747_v14 }
 0x27c   : > { %v2829_v27 = vpop.f32.mrf.mxu0 }
 0x27d   : > { %v1745_v23 = vpop.permute.xlu1 %1744  ;;  %v2946_v40 = vmax.f32 %v2838_v35, 0.0  ;;  %v2830_v25 = vadd.f32 %v8774_v29, %v2829_v27  ;;  %v7654_v35 = vld [vmem:[%s9996_s3 + $0x8] sm:$0xff]  }
 0x27e   : > { %1812 = vst.msk [vmem:[#allocation4 + $0x15c] sm:$0xf] %vm1782_vm11, %v1745_v23  ;;  %v7526_v24 = vpop.f32.mrf.mxu0  ;;  %v2001_v1 = vpop.permute.xlu0 %2000  ;;  %7601 = vmatpush3.bf16.msra.mxu1 %v7654_v35  ;;  %7396 = vmatpush3.bf16.msra.mxu0 %v7654_v35 }
 0x27f   : > { %3025 = vst.msk [vmem:[#allocation3 + $0x61] sm:$0xff] %vm2972_vm6, %v2946_v40  ;;  %v2944_v41 = vmax.f32 %v2830_v25, 0.0  ;;  %v2841_v42 = vadd.f32 %v7526_v24, %v8774_v29  ;;  %v7655_v40 = vld [vmem:[%s9996_s3 + $0x40] sm:$0xff]  }
 0x280   : > { %2069 = vst.msk [vmem:[#allocation4 + $0x150] sm:$0xf] %vm2040_vm12, %v2001_v1  ;;  %v2832_v30 = vpop.f32.mrf.mxu0  ;;  %v7656_v24 = vld [vmem:[%s9996_s3] sm:$0xff]   ;;  %7594 = vmatprep.subr.bf16.mxu1 %v7655_v40  ;;  %7397 = vmatprep.subr.bf16.mxu0 %v7655_v40 }
 0x281   : > { %v1749_v43 = vpop.permute.xlu1 %1748  ;;  %3023 = vst.msk [vmem:[#allocation3 + $0x49] sm:$0xff] %vm2972_vm6, %v2944_v41  ;;  %v2947_v48 = vmax.f32 %v2841_v42, 0.0  ;;  %v2833_v49 = vadd.f32 %v8774_v29, %v2832_v30 }
 0x282   : > { %1814 = vst.msk [vmem:[#allocation4 + $0x174] sm:$0xf] %vm1782_vm11, %v1749_v43  ;;  %v2005_v50 = vpop.permute.xlu0 %2004  ;;  %7602 = vmatpush3.bf16.msra.mxu1 %v7656_v24  ;;  %7398 = vmatpush3.bf16.msra.mxu0 %v7656_v24 }
 0x283   : > { %3026 = vst.msk [vmem:[#allocation3 + $0x69] sm:$0xff] %vm2972_vm6, %v2947_v48  ;;  %v2945_v54 = vmax.f32 %v2833_v49, 0.0 }
 0x284   : > { %2071 = vst.msk [vmem:[#allocation4 + $0x168] sm:$0xf] %vm2040_vm12, %v2005_v50 }
 0x285   : > { %v2003_v59 = vpop.permute.xlu1 %2002  ;;  %3024 = vst.msk [vmem:[#allocation3 + $0x51] sm:$0xff] %vm2972_vm6, %v2945_v54 }
 0x286   : > { %2070 = vst.msk [vmem:[#allocation4 + $0x15c] sm:$0xf] %vm2040_vm12, %v2003_v59  ;;  %v4724_v60 = vld [vmem:[#allocation3 + $0x61] sm:$0xff]  ;;  %v2258_v45 = vpop.permute.xlu0 %2257 }
 0x287   : > { %v3059_v46 = vld [vmem:[#allocation3 + $0x60] sm:$0xff]  ;;  %v8889_v53 = vpack.c.bf16 %v4724_v60, %v4724_v60  ;;  %2326 = vst.msk [vmem:[#allocation4 + $0x150] sm:$0xf] %vm2297_vm13, %v2258_v45 }
 0x288   : > { %v7084_v62 = vpack.c.bf16 %v3059_v46, %v3059_v46  ;;  %v4466_v9 = vld [vmem:[#allocation3 + $0x48] sm:$0xff]  ;;  %v4468_v48 = vld [vmem:[#allocation3 + $0x60] sm:$0xff] }
 0x289   : > { %v4722_v37 = vld [vmem:[#allocation3 + $0x49] sm:$0xff]  ;;  %v2007_v3 = vpop.permute.xlu1 %2006  ;;  %v8898_v51 = vpack.c.bf16 %v4466_v9, %v4466_v9  ;;  %4181 = vst.msk [vmem:[#allocation4 + $0x4c] sm:$0xf] %vm3211_vm15, %v8889_v53  ;;  %v8983_v58 = vpack.c.bf16 %v4468_v48, %v4468_v48 }
 0x28a   : > { %v8900_v61 = vpack.c.bf16 %v4722_v37, %v4722_v37  ;;  %2072 = vst.msk [vmem:[#allocation4 + $0x174] sm:$0xf] %vm2040_vm12, %v2007_v3  ;;  %v3057_v38 = vld [vmem:[#allocation3 + $0x48] sm:$0xff]  ;;  %v2262_v56 = vpop.permute.xlu0 %2261 }
 0x28b   : > { %3220 = vst.msk [vmem:[#allocation4 + $0x60] sm:$0xf] %vm3211_vm15, %v7084_v62  ;;  %v4980_v4 = vld [vmem:[#allocation3 + $0x62] sm:$0xff]  ;;  %v4981_v12 = vld [vmem:[#allocation3 + $0x6a] sm:$0xff]  ;;  %v7082_v13 = vpack.c.bf16 %v3057_v38, %v3057_v38  ;;  %4596 = vrot.lane.b32.xlu0 %v8898_v51, %s7728_s16 }
 0x28c   : > { %v8906_v17 = vpack.c.bf16 %v4980_v4, %v4980_v4  ;;  %v8908_v8 = vpack.c.bf16 %v4981_v12, %v4981_v12  ;;  %v4725_v10 = vld [vmem:[#allocation3 + $0x69] sm:$0xff]  ;;  %2328 = vst.msk [vmem:[#allocation4 + $0x168] sm:$0xf] %vm2297_vm13, %v2262_v56  ;;  %v4979_v15 = vld [vmem:[#allocation3 + $0x52] sm:$0xff] }
 0x28d   : > { %4179 = vst.msk [vmem:[#allocation4 + $0x34] sm:$0xf] %vm3211_vm15, %v8900_v61  ;;  %v3060_v34 = vld [vmem:[#allocation3 + $0x68] sm:$0xff]  ;;  %v4467_v19 = vld [vmem:[#allocation3 + $0x50] sm:$0xff]  ;;  %v8918_v21 = vpack.c.bf16 %v4725_v10, %v4725_v10  ;;  %v2260_v26 = vpop.permute.xlu1 %2259  ;;  %3218 = vst.msk [vmem:[#allocation4 + $0x48] sm:$0xf] %vm3211_vm15, %v7082_v13  ;;  %v8927_v33 = vpack.c.bf16 %v4979_v15, %v4979_v15 }
 0x28e   : > { %v4978_v18 = vld [vmem:[#allocation3 + $0x4a] sm:$0xff]  ;;  %v7085_v5 = vpack.c.bf16 %v3060_v34, %v3060_v34  ;;  %5140 = vst.msk [vmem:[#allocation4 + $0x38] sm:$0xf] %vm3211_vm15, %v8906_v17  ;;  %5141 = vst.msk [vmem:[#allocation4 + $0x44] sm:$0xf] %vm3211_vm15, %v8908_v8  ;;  %v8929_v16 = vpack.c.bf16 %v4467_v19, %v4467_v19  ;;  %v2515_v23 = vpop.permute.xlu0 %2514 }
 0x28f   : > { %v8925_v28 = vpack.c.bf16 %v4978_v18, %v4978_v18  ;;  %v4723_v14 = vld [vmem:[#allocation3 + $0x51] sm:$0xff]  ;;  %2327 = vst.msk [vmem:[#allocation4 + $0x15c] sm:$0xf] %vm2297_vm13, %v2260_v26  ;;  %3890 = vrot.lane.b32.xlu0 %v8791_v55, %s7729_s28  ;;  %v4469_v60 = vld [vmem:[#allocation3 + $0x68] sm:$0xff] }
 0x290   : > { %v3058_v22 = vld [vmem:[#allocation3 + $0x50] sm:$0xff]  ;;  %v8935_v27 = vpack.c.bf16 %v4723_v14, %v4723_v14  ;;  %4182 = vst.msk [vmem:[#allocation4 + $0x58] sm:$0xf] %vm3211_vm15, %v8918_v21  ;;  %3221 = vst.msk [vmem:[#allocation4 + $0x6c] sm:$0xf] %vm3211_vm15, %v7085_v5  ;;  %4598 = vrot.lane.b32.xlu1 %v8929_v16, %s7728_s16  ;;  %v7273_v45 = vpack.c.bf16 %v4469_v60, %v4469_v60 }
 0x291   : > { %v7083_v36 = vpack.c.bf16 %v3058_v22, %v3058_v22  ;;  %5138 = vst.msk [vmem:[#allocation4 + $0x20] sm:$0xf] %vm3211_vm15, %v8925_v28  ;;  %5139 = vst.msk [vmem:[#allocation4 + $0x2c] sm:$0xf] %vm3211_vm15, %v8927_v33  ;;  %v2264_v25 = vpop.permute.xlu1 %2263 }
 0x292   : > { %2583 = vst.msk [vmem:[#allocation4 + $0x150] sm:$0xf] %vm2554_vm14, %v2515_v23  ;;  %v2519_v55 = vpop.permute.xlu0 %2518 }
 0x293   : > { %4180 = vst.msk [vmem:[#allocation4 + $0x40] sm:$0xf] %vm3211_vm15, %v8935_v27  ;;  %3219 = vst.msk [vmem:[#allocation4 + $0x54] sm:$0xf] %vm3211_vm15, %v7083_v36  ;;  %4852 = vrot.lane.b32.xlu0 %v8900_v61, %s7729_s28 }
 0x294   : > { %2329 = vst.msk [vmem:[#allocation4 + $0x174] sm:$0xf] %vm2297_vm13, %v2264_v25  ;;  %3892 = vrot.lane.b32.xlu1 %v8808_v63, %s7729_s28 }
 0x295   : > { %2585 = vst.msk [vmem:[#allocation4 + $0x168] sm:$0xf] %vm2554_vm14, %v2519_v55  ;;  %v2517_v1 = vpop.permute.xlu1 %2516 }
 0x296   : > { %2584 = vst.msk [vmem:[#allocation4 + $0x15c] sm:$0xf] %vm2554_vm14, %v2517_v1 }
 0x297   : > { %3380 = vrot.lane.b32.xlu0 %v8793_v57, %s7727_s11 }
 0x298   : > { %4854 = vrot.lane.b32.xlu1 %v8935_v27, %s7729_s28 }
 0x299   : > { %v2521_v41 = vpop.permute.xlu1 %2520 }
 0x29a   : > { %2586 = vst.msk [vmem:[#allocation4 + $0x174] sm:$0xf] %vm2554_vm14, %v2521_v41  ;;  %v7529_v63 = vpop.f32.mrf.mxu0 }
 0x29b   : > { %4343 = vrot.lane.b32.xlu0 %v8925_v28, %s7727_s11  ;;  %v2854_v42 = vadd.f32 %v7529_v63, %v8774_v29 }
 0x29c   : > { %3382 = vrot.lane.b32.xlu1 %v8814_v32, %s7727_s11  ;;  %v2845_v7 = vpop.f32.mrf.mxu0 }
 0x29d   : > { %v7639_v30 = vld [vmem:[#allocation4 + $0x150] ss:$12 sps:$4 sm:$0xff]   ;;  %v2950_v43 = vmax.f32 %v2854_v42, 0.0  ;;  %v2846_v47 = vadd.f32 %v8774_v29, %v2845_v7 }
 0x29e   : > { %v7530_v49 = vpop.f32.mrf.mxu0  ;;  %7547 = vmatprep.mubr.msk.bf16.mxu0 %vm2726_vm0, %v7639_v30 }
 0x29f   : > { %3637 = vrot.lane.b32.xlu0 %v8803_v31, %s7728_s16  ;;  %3029 = vst.msk [vmem:[#allocation3 + $0x91] sm:$0xff] %vm2972_vm6, %v2950_v43  ;;  %v2948_v57 = vmax.f32 %v2846_v47, 0.0  ;;  %v2857_v32 = vadd.f32 %v7530_v49, %v8774_v29 }
 0x2a0   : > { %4345 = vrot.lane.b32.xlu1 %v8927_v33, %s7727_s11  ;;  %v2848_v50 = vpop.f32.mrf.mxu0 }
 0x2a1   : > { %v7640_v54 = vld [vmem:[#allocation4 + $0x168] ss:$12 sps:$4 sm:$0xff]   ;;  %3027 = vst.msk [vmem:[#allocation3 + $0x79] sm:$0xff] %vm2972_vm6, %v2948_v57  ;;  %v2951_v59 = vmax.f32 %v2857_v32, 0.0  ;;  %v2849_v39 = vadd.f32 %v8774_v29, %v2848_v50 }
 0x2a2   : > { %7548 = vmatmul.mubr.msk.bf16.gmra.mxu0 %vm2726_vm0, %v7640_v54 }
 0x2a3   : > { %4600 = vrot.lane.b32.xlu0 %v8983_v58, %s7728_s16  ;;  %3030 = vst.msk [vmem:[#allocation3 + $0x99] sm:$0xff] %vm2972_vm6, %v2951_v59  ;;  %v2949_v31 = vmax.f32 %v2849_v39, 0.0 }
 0x2a4   : > { %3639 = vrot.lane.b32.xlu1 %v8805_v2, %s7728_s16 }
 0x2a5   : > { %3028 = vst.msk [vmem:[#allocation3 + $0x81] sm:$0xff] %vm2972_vm6, %v2949_v31 }
 0x2a6   : > { %v4728_v46 = vld [vmem:[#allocation3 + $0x91] sm:$0xff] }
 0x2a7   : > { %v3063_v52 = vld [vmem:[#allocation3 + $0x90] sm:$0xff]  ;;  %3894 = vrot.lane.b32.xlu0 %v8898_v51, %s7729_s28  ;;  %v9003_v2 = vpack.c.bf16 %v4728_v46, %v4728_v46 }
 0x2a8   : > { %4602 = vrot.lane.b32.xlu1 %v7273_v45, %s7728_s16  ;;  %v7088_v62 = vpack.c.bf16 %v3063_v52, %v3063_v52  ;;  %v4726_v9 = vld [vmem:[#allocation3 + $0x79] sm:$0xff]  ;;  %v4472_v63 = vld [vmem:[#allocation3 + $0x90] sm:$0xff] }
 0x2a9   : > { %v3061_v37 = vld [vmem:[#allocation3 + $0x78] sm:$0xff]  ;;  %v9005_v3 = vpack.c.bf16 %v4726_v9, %v4726_v9  ;;  %4185 = vst.msk [vmem:[#allocation4 + $0x7c] sm:$0xf] %vm3211_vm15, %v9003_v2  ;;  %v9092_v48 = vpack.c.bf16 %v4472_v63, %v4472_v63 }
 0x2aa   : > { %v7086_v20 = vpack.c.bf16 %v3061_v37, %v3061_v37  ;;  %3224 = vst.msk [vmem:[#allocation4 + $0x90] sm:$0xf] %vm3211_vm15, %v7088_v62  ;;  %v4984_v0 = vld [vmem:[#allocation3 + $0x92] sm:$0xff]  ;;  %v4985_v38 = vld [vmem:[#allocation3 + $0x9a] sm:$0xff] }
 0x2ab   : > { %v9010_v4 = vpack.c.bf16 %v4984_v0, %v4984_v0  ;;  %v9012_v12 = vpack.c.bf16 %v4985_v38, %v4985_v38  ;;  %4856 = vrot.lane.b32.xlu0 %v8889_v53, %s7729_s28  ;;  %v4729_v51 = vld [vmem:[#allocation3 + $0x99] sm:$0xff]  ;;  %4183 = vst.msk [vmem:[#allocation4 + $0x64] sm:$0xf] %vm3211_vm15, %v9005_v3 }
 0x2ac   : > { %3896 = vrot.lane.b32.xlu1 %v8929_v16, %s7729_s28  ;;  %3222 = vst.msk [vmem:[#allocation4 + $0x78] sm:$0xf] %vm3211_vm15, %v7086_v20  ;;  %v3064_v56 = vld [vmem:[#allocation3 + $0x98] sm:$0xff]  ;;  %v4983_v10 = vld [vmem:[#allocation3 + $0x82] sm:$0xff]  ;;  %v9021_v11 = vpack.c.bf16 %v4729_v51, %v4729_v51 }
 0x2ad   : > { %v4982_v13 = vld [vmem:[#allocation3 + $0x7a] sm:$0xff]  ;;  %v7089_v34 = vpack.c.bf16 %v3064_v56, %v3064_v56  ;;  %5144 = vst.msk [vmem:[#allocation4 + $0x68] sm:$0xf] %vm3211_vm15, %v9010_v4  ;;  %5145 = vst.msk [vmem:[#allocation4 + $0x74] sm:$0xf] %vm3211_vm15, %v9012_v12  ;;  %v9029_v15 = vpack.c.bf16 %v4983_v10, %v4983_v10 }
 0x2ae   : > { %v9027_v18 = vpack.c.bf16 %v4982_v13, %v4982_v13  ;;  %v4727_v19 = vld [vmem:[#allocation3 + $0x81] sm:$0xff]  ;;  %4186 = vst.msk [vmem:[#allocation4 + $0x88] sm:$0xf] %vm3211_vm15, %v9021_v11  ;;  %v4470_v14 = vld [vmem:[#allocation3 + $0x78] sm:$0xff] }
 0x2af   : > { %v3062_v26 = vld [vmem:[#allocation3 + $0x80] sm:$0xff]  ;;  %v9031_v5 = vpack.c.bf16 %v4727_v19, %v4727_v19  ;;  %3225 = vst.msk [vmem:[#allocation4 + $0x9c] sm:$0xf] %vm3211_vm15, %v7089_v34  ;;  %5143 = vst.msk [vmem:[#allocation4 + $0x5c] sm:$0xf] %vm3211_vm15, %v9029_v15  ;;  %3384 = vrot.lane.b32.xlu0 %v8900_v61, %s7727_s11  ;;  %v9055_v35 = vpack.c.bf16 %v4470_v14, %v4470_v14  ;;  %v4473_v32 = vld [vmem:[#allocation3 + $0x98] sm:$0xff] }
 0x2b0   : > { %v7087_v16 = vpack.c.bf16 %v3062_v26, %v3062_v26  ;;  %5142 = vst.msk [vmem:[#allocation4 + $0x50] sm:$0xf] %vm3211_vm15, %v9027_v18  ;;  %4858 = vrot.lane.b32.xlu1 %v8918_v21, %s7729_s28  ;;  %v4471_v61 = vld [vmem:[#allocation3 + $0x80] sm:$0xff] }
 0x2b1   : > { %4184 = vst.msk [vmem:[#allocation4 + $0x70] sm:$0xf] %vm3211_vm15, %v9031_v5  ;;  %v9061_v22 = vpack.c.bf16 %v4471_v61, %v4471_v61 }
 0x2b2   : > { %3223 = vst.msk [vmem:[#allocation4 + $0x84] sm:$0xf] %vm3211_vm15, %v7087_v16 }
 0x2b3   : > { %4347 = vrot.lane.b32.xlu0 %v8906_v17, %s7727_s11 }
 0x2b4   : > { %3386 = vrot.lane.b32.xlu1 %v8935_v27, %s7727_s11 }
 0x2b7   : > { %3641 = vrot.lane.b32.xlu0 %v8925_v28, %s7728_s16 }
 0x2b8   : > { %4349 = vrot.lane.b32.xlu1 %v8908_v8, %s7727_s11 }
 0x2bb   : > { %4604 = vrot.lane.b32.xlu0 %v9055_v35, %s7728_s16 }
 0x2bc   : > { %3643 = vrot.lane.b32.xlu1 %v8927_v33, %s7728_s16 }
 0x2bf   : > { %3898 = vrot.lane.b32.xlu0 %v8983_v58, %s7729_s28 }
 0x2c0   : > { %4606 = vrot.lane.b32.xlu1 %v9061_v22, %s7728_s16 }
 0x2c2   : > { %v7533_v27 = vpop.f32.mrf.mxu0 }
 0x2c3   : > { %4860 = vrot.lane.b32.xlu0 %v9005_v3, %s7729_s28  ;;  %v2870_v28 = vadd.f32 %v7533_v27, %v8774_v29 }
 0x2c4   : > { %3900 = vrot.lane.b32.xlu1 %v7273_v45, %s7729_s28  ;;  %v2861_v33 = vpop.f32.mrf.mxu0 }
 0x2c5   : > { %v2954_v23 = vmax.f32 %v2870_v28, 0.0  ;;  %v2862_v36 = vadd.f32 %v8774_v29, %v2861_v33 }
 0x2c6   : > { %v7534_v40 = vpop.f32.mrf.mxu0 }
 0x2c7   : > { %3388 = vrot.lane.b32.xlu0 %v8889_v53, %s7727_s11  ;;  %3033 = vst.msk [vmem:[#allocation3 + $0xc1] sm:$0xff] %vm2972_vm6, %v2954_v23  ;;  %v2952_v25 = vmax.f32 %v2862_v36, 0.0  ;;  %v2873_v24 = vadd.f32 %v7534_v40, %v8774_v29 }
 0x2c8   : > { %4862 = vrot.lane.b32.xlu1 %v9031_v5, %s7729_s28  ;;  %v2864_v55 = vpop.f32.mrf.mxu0 }
 0x2c9   : > { %3031 = vst.msk [vmem:[#allocation3 + $0xa9] sm:$0xff] %vm2972_vm6, %v2952_v25  ;;  %v2955_v1 = vmax.f32 %v2873_v24, 0.0  ;;  %v2865_v41 = vadd.f32 %v8774_v29, %v2864_v55 }
 0x2cb   : > { %4351 = vrot.lane.b32.xlu0 %v9027_v18, %s7727_s11  ;;  %3034 = vst.msk [vmem:[#allocation3 + $0xc9] sm:$0xff] %vm2972_vm6, %v2955_v1  ;;  %v2953_v53 = vmax.f32 %v2865_v41, 0.0 }
 0x2cc   : > { %3390 = vrot.lane.b32.xlu1 %v8918_v21, %s7727_s11 }
 0x2cd   : > { %3032 = vst.msk [vmem:[#allocation3 + $0xb1] sm:$0xff] %vm2972_vm6, %v2953_v53 }
 0x2ce   : > { %v4732_v42 = vld [vmem:[#allocation3 + $0xc1] sm:$0xff] }
 0x2cf   : > { %v3067_v7 = vld [vmem:[#allocation3 + $0xc0] sm:$0xff]  ;;  %3645 = vrot.lane.b32.xlu0 %v8906_v17, %s7728_s16  ;;  %v9090_v30 = vpack.c.bf16 %v4732_v42, %v4732_v42 }
 0x2d0   : > { %4353 = vrot.lane.b32.xlu1 %v9029_v15, %s7727_s11  ;;  %v7092_v21 = vpack.c.bf16 %v3067_v7, %v3067_v7  ;;  %v4730_v43 = vld [vmem:[#allocation3 + $0xa9] sm:$0xff] }
 0x2d1   : > { %v3065_v47 = vld [vmem:[#allocation3 + $0xa8] sm:$0xff]  ;;  %v9094_v49 = vpack.c.bf16 %v4730_v43, %v4730_v43  ;;  %4189 = vst.msk [vmem:[#allocation4 + $0xac] sm:$0xf] %vm3211_vm15, %v9090_v30 }
 0x2d2   : > { %v7090_v57 = vpack.c.bf16 %v3065_v47, %v3065_v47  ;;  %3228 = vst.msk [vmem:[#allocation4 + $0xc0] sm:$0xf] %vm3211_vm15, %v7092_v21  ;;  %v4988_v50 = vld [vmem:[#allocation3 + $0xc2] sm:$0xff]  ;;  %v4989_v54 = vld [vmem:[#allocation3 + $0xca] sm:$0xff] }
 0x2d3   : > { %4608 = vrot.lane.b32.xlu0 %v9092_v48, %s7728_s16  ;;  %v9103_v17 = vpack.c.bf16 %v4988_v50, %v4988_v50  ;;  %v9105_v58 = vpack.c.bf16 %v4989_v54, %v4989_v54  ;;  %v4733_v59 = vld [vmem:[#allocation3 + $0xc9] sm:$0xff]  ;;  %4187 = vst.msk [vmem:[#allocation4 + $0x94] sm:$0xf] %vm3211_vm15, %v9094_v49 }
 0x2d4   : > { %3647 = vrot.lane.b32.xlu1 %v8908_v8, %s7728_s16  ;;  %3226 = vst.msk [vmem:[#allocation4 + $0xa8] sm:$0xf] %vm3211_vm15, %v7090_v57  ;;  %v3068_v39 = vld [vmem:[#allocation3 + $0xc8] sm:$0xff]  ;;  %v4987_v31 = vld [vmem:[#allocation3 + $0xb2] sm:$0xff]  ;;  %v9110_v45 = vpack.c.bf16 %v4733_v59, %v4733_v59  ;;  %v7277_v8 = vpack.c.bf16 %v4473_v32, %v4473_v32 }
 0x2d5   : > { %v4986_v60 = vld [vmem:[#allocation3 + $0xaa] sm:$0xff]  ;;  %v7093_v46 = vpack.c.bf16 %v3068_v39, %v3068_v39  ;;  %5148 = vst.msk [vmem:[#allocation4 + $0x98] sm:$0xf] %vm3211_vm15, %v9103_v17  ;;  %5149 = vst.msk [vmem:[#allocation4 + $0xa4] sm:$0xf] %vm3211_vm15, %v9105_v58  ;;  %v9118_v62 = vpack.c.bf16 %v4987_v31, %v4987_v31 }
 0x2d6   : > { %v9116_v52 = vpack.c.bf16 %v4986_v60, %v4986_v60  ;;  %v4731_v9 = vld [vmem:[#allocation3 + $0xb1] sm:$0xff]  ;;  %4190 = vst.msk [vmem:[#allocation4 + $0xb8] sm:$0xf] %vm3211_vm15, %v9110_v45  ;;  %v4476_v60 = vld [vmem:[#allocation3 + $0xc0] sm:$0xff] }
 0x2d7   : > { %v3066_v37 = vld [vmem:[#allocation3 + $0xb0] sm:$0xff]  ;;  %v9120_v20 = vpack.c.bf16 %v4731_v9, %v4731_v9  ;;  %3229 = vst.msk [vmem:[#allocation4 + $0xcc] sm:$0xf] %vm3211_vm15, %v7093_v46  ;;  %3902 = vrot.lane.b32.xlu0 %v9055_v35, %s7729_s28  ;;  %5147 = vst.msk [vmem:[#allocation4 + $0x8c] sm:$0xf] %vm3211_vm15, %v9118_v62 }
 0x2d8   : > { %v7091_v0 = vpack.c.bf16 %v3066_v37, %v3066_v37  ;;  %4610 = vrot.lane.b32.xlu1 %v7277_v8, %s7728_s16  ;;  %5146 = vst.msk [vmem:[#allocation4 + $0x80] sm:$0xf] %vm3211_vm15, %v9116_v52  ;;  %v4475_v26 = vld [vmem:[#allocation3 + $0xb0] sm:$0xff]  ;;  %v9223_v37 = vpack.c.bf16 %v4476_v60, %v4476_v60 }
 0x2d9   : > { %4188 = vst.msk [vmem:[#allocation4 + $0xa0] sm:$0xf] %vm3211_vm15, %v9120_v20  ;;  %v9164_v35 = vpack.c.bf16 %v4475_v26, %v4475_v26 }
 0x2da   : > { %3227 = vst.msk [vmem:[#allocation4 + $0xb4] sm:$0xf] %vm3211_vm15, %v7091_v0 }
 0x2db   : > { %4864 = vrot.lane.b32.xlu0 %v9003_v2, %s7729_s28 }
 0x2dc   : > { %3904 = vrot.lane.b32.xlu1 %v9061_v22, %s7729_s28 }
 0x2dd   : > { %v3377_v38 = vpop.permute.xlu0 %3376 }
 0x2de   : > { %3471 = vst.msk [vmem:[#allocation4 + $0x18] sm:$0xf] %vm3468_vm2, %v3377_v38 }
 0x2df   : > { %3392 = vrot.lane.b32.xlu0 %v9005_v3, %s7727_s11  ;;  %v4474_v3 = vld [vmem:[#allocation3 + $0xa8] sm:$0xff] }
 0x2e0   : > { %4866 = vrot.lane.b32.xlu1 %v9021_v11, %s7729_s28  ;;  %v9156_v19 = vpack.c.bf16 %v4474_v3, %v4474_v3 }
 0x2e1   : > { %v3379_v51 = vpop.permute.xlu1 %3378  ;;  %v4340_v56 = vpop.permute.xlu0 %4339 }
 0x2e2   : > { %3472 = vst.msk [vmem:[#allocation4 + $0x24] sm:$0xf] %vm3468_vm2, %v3379_v51  ;;  %4433 = vst.msk [vmem:[#allocation4 + $0x1c] sm:$0xf] %vm3468_vm2, %v4340_v56 }
 0x2e3   : > { %4355 = vrot.lane.b32.xlu0 %v9010_v4, %s7727_s11 }
 0x2e4   : > { %3394 = vrot.lane.b32.xlu1 %v9031_v5, %s7727_s11 }
 0x2e5   : > { %v4342_v13 = vpop.permute.xlu1 %4341  ;;  %v3634_v10 = vpop.permute.xlu0 %3633 }
 0x2e6   : > { %4434 = vst.msk [vmem:[#allocation4 + $0x28] sm:$0xf] %vm3468_vm2, %v4342_v13 }
 0x2e7   : > { %3728 = vst.msk [vmem:[#allocation4 + $0x18] sm:$0xf] %vm3725_vm3, %v3634_v10  ;;  %3649 = vrot.lane.b32.xlu0 %v9027_v18, %s7728_s16 }
 0x2e8   : > { %4357 = vrot.lane.b32.xlu1 %v9012_v12, %s7727_s11 }
 0x2e9   : > { %v3636_v34 = vpop.permute.xlu1 %3635 }
 0x2ea   : > { %3729 = vst.msk [vmem:[#allocation4 + $0x24] sm:$0xf] %vm3725_vm3, %v3636_v34  ;;  %v7537_v5 = vpop.f32.mrf.mxu0 }
 0x2eb   : > { %4612 = vrot.lane.b32.xlu0 %v9156_v19, %s7728_s16  ;;  %v2886_v16 = vadd.f32 %v7537_v5, %v8774_v29 }
 0x2ec   : > { %3651 = vrot.lane.b32.xlu1 %v9029_v15, %s7728_s16  ;;  %v2877_v14 = vpop.f32.mrf.mxu0 }
 0x2ed   : > { %v2958_v61 = vmax.f32 %v2886_v16, 0.0  ;;  %v2878_v18 = vadd.f32 %v8774_v29, %v2877_v14  ;;  %v9260_v16 = vld [vmem:[%s9995_s2] ss:$0 sm:$0xff] }
 0x2ee   : > { %v7538_v22 = vpop.f32.mrf.mxu0 }
 0x2ef   : > { %3906 = vrot.lane.b32.xlu0 %v9092_v48, %s7729_s28  ;;  %3037 = vst.msk [vmem:[#allocation3 + $0xf1] sm:$0xff] %vm2972_vm6, %v2958_v61  ;;  %v2956_v15 = vmax.f32 %v2878_v18, 0.0  ;;  %v2889_v27 = vadd.f32 %v7538_v22, %v8774_v29 }
 0x2f0   : > { %4614 = vrot.lane.b32.xlu1 %v9164_v35, %s7728_s16  ;;  %v2880_v28 = vpop.f32.mrf.mxu0 }
 0x2f1   : > { %3035 = vst.msk [vmem:[#allocation3 + $0xd9] sm:$0xff] %vm2972_vm6, %v2956_v15  ;;  %v2959_v33 = vmax.f32 %v2889_v27, 0.0  ;;  %v2881_v23 = vadd.f32 %v8774_v29, %v2880_v28 }
 0x2f3   : > { %4868 = vrot.lane.b32.xlu0 %v9094_v49, %s7729_s28  ;;  %3038 = vst.msk [vmem:[#allocation3 + $0xf9] sm:$0xff] %vm2972_vm6, %v2959_v33  ;;  %v2957_v36 = vmax.f32 %v2881_v23, 0.0 }
 0x2f4   : > { %3908 = vrot.lane.b32.xlu1 %v7277_v8, %s7729_s28 }
 0x2f5   : > { %3036 = vst.msk [vmem:[#allocation3 + $0xe1] sm:$0xff] %vm2972_vm6, %v2957_v36 }
 0x2f6   : > { %v4736_v40 = vld [vmem:[#allocation3 + $0xf1] sm:$0xff] }
 0x2f7   : > { %v3071_v25 = vld [vmem:[#allocation3 + $0xf0] sm:$0xff]  ;;  %3396 = vrot.lane.b32.xlu0 %v9003_v2, %s7727_s11  ;;  %v9184_v24 = vpack.c.bf16 %v4736_v40, %v4736_v40 }
 0x2f8   : > { %4870 = vrot.lane.b32.xlu1 %v9120_v20, %s7729_s28  ;;  %v7096_v29 = vpack.c.bf16 %v3071_v25, %v3071_v25  ;;  %v4031_v55 = vld [vmem:[#allocation3 + $0xd9] sm:$0xff] }
 0x2f9   : > { %v7220_v1 = vpack.c.bf16 %v4031_v55, %v4031_v55  ;;  %v3069_v41 = vld [vmem:[#allocation3 + $0xd8] sm:$0xff]  ;;  %4193 = vst.msk [vmem:[#allocation4 + $0xdc] sm:$0xf] %vm3211_vm15, %v9184_v24 }
 0x2fa   : > { %3232 = vst.msk [vmem:[#allocation4 + $0xf0] sm:$0xf] %vm3211_vm15, %v7096_v29  ;;  %v4992_v53 = vld [vmem:[#allocation3 + $0xf2] sm:$0xff]  ;;  %v4993_v63 = vld [vmem:[#allocation3 + $0xfa] sm:$0xff]  ;;  %v7094_v42 = vpack.c.bf16 %v3069_v41, %v3069_v41 }
 0x2fb   : > { %4359 = vrot.lane.b32.xlu0 %v9116_v52, %s7727_s11  ;;  %v9193_v2 = vpack.c.bf16 %v4992_v53, %v4992_v53  ;;  %v9195_v7 = vpack.c.bf16 %v4993_v63, %v4993_v63  ;;  %v4737_v21 = vld [vmem:[#allocation3 + $0xf9] sm:$0xff]  ;;  %4191 = vst.msk [vmem:[#allocation4 + $0xc4] sm:$0xf] %vm3211_vm15, %v7220_v1 }
 0x2fc   : > { %3398 = vrot.lane.b32.xlu1 %v9021_v11, %s7727_s11  ;;  %v3072_v43 = vld [vmem:[#allocation3 + $0xf8] sm:$0xff]  ;;  %v4991_v48 = vld [vmem:[#allocation3 + $0xe2] sm:$0xff]  ;;  %v9198_v57 = vpack.c.bf16 %v4737_v21, %v4737_v21  ;;  %3230 = vst.msk [vmem:[#allocation4 + $0xd8] sm:$0xf] %vm3211_vm15, %v7094_v42 }
 0x2fd   : > { %v4990_v47 = vld [vmem:[#allocation3 + $0xda] sm:$0xff]  ;;  %v7097_v32 = vpack.c.bf16 %v3072_v43, %v3072_v43  ;;  %v4597_v50 = vpop.permute.xlu0 %4596  ;;  %5152 = vst.msk [vmem:[#allocation4 + $0xc8] sm:$0xf] %vm3211_vm15, %v9193_v2  ;;  %5153 = vst.msk [vmem:[#allocation4 + $0xd4] sm:$0xf] %vm3211_vm15, %v9195_v7  ;;  %v9207_v54 = vpack.c.bf16 %v4991_v48, %v4991_v48 }
 0x2fe   : > { %v9205_v11 = vpack.c.bf16 %v4990_v47, %v4990_v47  ;;  %v4032_v59 = vld [vmem:[#allocation3 + $0xe1] sm:$0xff]  ;;  %4690 = vst.msk [vmem:[#allocation4 + $0x1c] sm:$0xf] %vm3725_vm3, %v4597_v50  ;;  %v4734_v63 = vld [vmem:[#allocation3 + $0xd9] sm:$0xff] }
 0x2ff   : > { %v3070_v39 = vld [vmem:[#allocation3 + $0xe0] sm:$0xff]  ;;  %v7221_v31 = vpack.c.bf16 %v4032_v59, %v4032_v59  ;;  %4194 = vst.msk [vmem:[#allocation4 + $0xe8] sm:$0xf] %vm3211_vm15, %v9198_v57  ;;  %3233 = vst.msk [vmem:[#allocation4 + $0xfc] sm:$0xf] %vm3211_vm15, %v7097_v32  ;;  %3653 = vrot.lane.b32.xlu0 %v9010_v4, %s7728_s16  ;;  %v4477_v4 = vld [vmem:[#allocation3 + $0xc8] sm:$0xff]  ;;  %v9292_v59 = vpack.c.bf16 %v4734_v63, %v4734_v63 }
 0x300   : > { %v7095_v46 = vpack.c.bf16 %v3070_v39, %v3070_v39  ;;  %4361 = vrot.lane.b32.xlu1 %v9118_v62, %s7727_s11  ;;  %5150 = vst.msk [vmem:[#allocation4 + $0xb0] sm:$0xf] %vm3211_vm15, %v9205_v11  ;;  %5151 = vst.msk [vmem:[#allocation4 + $0xbc] sm:$0xf] %vm3211_vm15, %v9207_v54  ;;  %v9231_v51 = vpack.c.bf16 %v4477_v4, %v4477_v4  ;;  %v3244_v43 = vld [vmem:[#allocation3 + $0x1] sm:$0xff] }
 0x301   : > { %4192 = vst.msk [vmem:[#allocation4 + $0xd0] sm:$0xf] %vm3211_vm15, %v7221_v31  ;;  %v3891_v9 = vpop.permute.xlu0 %3890  ;;  %v4735_v31 = vld [vmem:[#allocation3 + $0xe1] sm:$0xff] }
 0x302   : > { %3231 = vst.msk [vmem:[#allocation4 + $0xe4] sm:$0xf] %vm3211_vm15, %v7095_v46  ;;  %v4599_v8 = vpop.permute.xlu1 %4598 }
 0x303   : > { %4691 = vst.msk [vmem:[#allocation4 + $0x28] sm:$0xf] %vm3725_vm3, %v4599_v8  ;;  %4616 = vrot.lane.b32.xlu0 %v9223_v37, %s7728_s16 }
 0x304   : > { %3985 = vst.msk [vmem:[#allocation4 + $0x18] sm:$0xf] %vm3982_vm4, %v3891_v9  ;;  %3655 = vrot.lane.b32.xlu1 %v9012_v12, %s7728_s16 }
 0x305   : > { %v4853_v38 = vpop.permute.xlu0 %4852 }
 0x306   : > { %v3893_v0 = vpop.permute.xlu1 %3892  ;;  %4946 = vst.msk [vmem:[#allocation4 + $0x1c] sm:$0xf] %vm3982_vm4, %v4853_v38 }
 0x307   : > { %3986 = vst.msk [vmem:[#allocation4 + $0x24] sm:$0xf] %vm3982_vm4, %v3893_v0  ;;  %3910 = vrot.lane.b32.xlu0 %v9156_v19, %s7729_s28 }
 0x308   : > { %4618 = vrot.lane.b32.xlu1 %v9231_v51, %s7728_s16 }
 0x309   : > { %v3381_v13 = vpop.permute.xlu0 %3380 }
 0x30a   : > { %v4855_v56 = vpop.permute.xlu1 %4854  ;;  %3473 = vst.msk [vmem:[#allocation4 + $0x30] sm:$0xf] %vm3468_vm2, %v3381_v13  ;;  %v3245_v13 = vld [vmem:[#allocation3 + $0x9] sm:$0xff] }
 0x30b   : > { %4947 = vst.msk [vmem:[#allocation4 + $0x28] sm:$0xf] %vm3982_vm4, %v4855_v56  ;;  %4872 = vrot.lane.b32.xlu0 %v9090_v30, %s7729_s28 }
 0x30c   : > { %3912 = vrot.lane.b32.xlu1 %v9164_v35, %s7729_s28 }
 0x30d   : > { %v4344_v10 = vpop.permute.xlu0 %4343 }
 0x30e   : > { %v3383_v12 = vpop.permute.xlu1 %3382  ;;  %4435 = vst.msk [vmem:[#allocation4 + $0x34] sm:$0xf] %vm3468_vm2, %v4344_v10  ;;  %v7657_v19 = vld [vmem:[#allocation4 + $0x18] ss:$12 sps:$4 sm:$0xff]  }
 0x30f   : > { %3474 = vst.msk [vmem:[#allocation4 + $0x3c] sm:$0xf] %vm3468_vm2, %v3383_v12  ;;  %3400 = vrot.lane.b32.xlu0 %v9094_v49, %s7727_s11 }
 0x310   : > { %4874 = vrot.lane.b32.xlu1 %v9110_v45, %s7729_s28 }
 0x311   : > { %v3638_v34 = vpop.permute.xlu0 %3637 }
 0x312   : > { %v4346_v3 = vpop.permute.xlu1 %4345  ;;  %v7659_v26 = vld [vmem:[#allocation4 + $0x1c] ss:$12 sps:$4 sm:$0xff]   ;;  %3730 = vst.msk [vmem:[#allocation4 + $0x30] sm:$0xf] %vm3725_vm3, %v3638_v34  ;;  %v7541_v5 = vpop.f32.mrf.mxu0 }
 0x313   : > { %4436 = vst.msk [vmem:[#allocation4 + $0x40] sm:$0xf] %vm3468_vm2, %v4346_v3  ;;  %4363 = vrot.lane.b32.xlu0 %v9103_v17, %s7727_s11  ;;  %v2902_v49 = vadd.f32 %v9260_v16, %v7541_v5  ;;  %5711 = vmatprep.mubr.bf16.mxu1 %v7659_v26  ;;  %v9308_v26 = vpack.c.bf16 %v4735_v31, %v4735_v31  ;;  %v4720_v31 = vld [vmem:[#allocation3 + $0x31] sm:$0xff] }
 0x314   : > { %3402 = vrot.lane.b32.xlu1 %v9120_v20, %s7727_s11  ;;  %v2893_v14 = vpop.f32.mrf.mxu0  ;;  %5712 = vmatmul.mubr.bf16.vlgmr.msra.gmra.mxu1 %v7657_v19  ;;  %v4478_v20 = vld [vmem:[#allocation3 + $0xd8] sm:$0xff] }
 0x315   : > { %v4601_v61 = vpop.permute.xlu0 %4600  ;;  %v2962_v18 = vmax.f32 %v2902_v49, 0.0  ;;  %v2894_v22 = vadd.f32 %v9260_v16, %v2893_v14  ;;  %v9272_v40 = vpack.c.bf16 %v4478_v20, %v4478_v20 }
 0x316   : > { %v3640_v35 = vpop.permute.xlu1 %3639  ;;  %4692 = vst.msk [vmem:[#allocation4 + $0x34] sm:$0xf] %vm3725_vm3, %v4601_v61  ;;  %v7542_v15 = vpop.f32.mrf.mxu0 }
 0x317   : > { %3731 = vst.msk [vmem:[#allocation4 + $0x3c] sm:$0xf] %vm3725_vm3, %v3640_v35  ;;  %3657 = vrot.lane.b32.xlu0 %v9116_v52, %s7728_s16  ;;  %v2960_v27 = vmax.f32 %v2894_v22, 0.0  ;;  %v2905_v28 = vadd.f32 %v9260_v16, %v7542_v15  ;;  %v4479_v52 = vld [vmem:[#allocation3 + $0xe0] sm:$0xff]  ;;  %v7109_v22 = vpack.c.bf16 %v3245_v13, %v3245_v13 }
 0x318   : > { %4365 = vrot.lane.b32.xlu1 %v9105_v58, %s7727_s11  ;;  %3041 = vst.msk [vmem:[#allocation3 + $0x121] sm:$0xff] %vm2972_vm6, %v2962_v18  ;;  %v2896_v33 = vpop.f32.mrf.mxu0  ;;  %v9283_v53 = vpack.c.bf16 %v4479_v52, %v4479_v52  ;;  %v4207_v35 = vld [vmem:[#allocation3 + $0x1a] sm:$0xff]  ;;  %v3501_v15 = vld [vmem:[#allocation3 + $0x2] sm:$0xff] }
 0x319   : > { %v3895_v36 = vpop.permute.xlu0 %3894  ;;  %3039 = vst.msk [vmem:[#allocation3 + $0x109] sm:$0xff] %vm2972_vm6, %v2960_v27  ;;  %v2963_v25 = vmax.f32 %v2905_v28, 0.0  ;;  %v2897_v29 = vadd.f32 %v9260_v16, %v2896_v33  ;;  %v7236_v33 = vpack.c.bf16 %v4207_v35, %v4207_v35  ;;  %v4208_v52 = vld [vmem:[#allocation3 + $0x22] sm:$0xff] }
 0x31a   : > { %v4603_v23 = vpop.permute.xlu1 %4602  ;;  %3987 = vst.msk [vmem:[#allocation4 + $0x30] sm:$0xf] %vm3982_vm4, %v3895_v36 }
 0x31b   : > { %4693 = vst.msk [vmem:[#allocation4 + $0x40] sm:$0xf] %vm3725_vm3, %v4603_v23  ;;  %4620 = vrot.lane.b32.xlu0 %v9272_v40, %s7728_s16  ;;  %v2961_v55 = vmax.f32 %v2897_v29, 0.0 }
 0x31c   : > { %3659 = vrot.lane.b32.xlu1 %v9118_v62, %s7728_s16  ;;  %3042 = vst.msk [vmem:[#allocation3 + $0x129] sm:$0xff] %vm2972_vm6, %v2963_v25 }
 0x31d   : > { %v4857_v41 = vpop.permute.xlu0 %4856  ;;  %3040 = vst.msk [vmem:[#allocation3 + $0x111] sm:$0xff] %vm2972_vm6, %v2961_v55  ;;  %v7140_v55 = vpack.c.bf16 %v3501_v15, %v3501_v15 }
 0x31e   : > { %v3897_v1 = vpop.permute.xlu1 %3896  ;;  %4948 = vst.msk [vmem:[#allocation4 + $0x34] sm:$0xf] %vm3982_vm4, %v4857_v41 }
 0x31f   : > { %3988 = vst.msk [vmem:[#allocation4 + $0x3c] sm:$0xf] %vm3982_vm4, %v3897_v1  ;;  %v4037_v42 = vld [vmem:[#allocation3 + $0x121] sm:$0xff]  ;;  %3914 = vrot.lane.b32.xlu0 %v9223_v37, %s7729_s28  ;;  %v7108_v37 = vpack.c.bf16 %v3244_v43, %v3244_v43  ;;  %v3502_v1 = vld [vmem:[#allocation3 + $0xa] sm:$0xff] }
 0x320   : > { %4622 = vrot.lane.b32.xlu1 %v9283_v53, %s7728_s16  ;;  %v7226_v62 = vpack.c.bf16 %v4037_v42, %v4037_v42  ;;  %v3075_v21 = vld [vmem:[#allocation3 + $0x120] sm:$0xff]  ;;  %v4035_v47 = vld [vmem:[#allocation3 + $0x109] sm:$0xff]  ;;  %v7237_v42 = vpack.c.bf16 %v4208_v52, %v4208_v52 }
 0x321   : > { %v7100_v48 = vpack.c.bf16 %v3075_v21, %v3075_v21  ;;  %v3385_v50 = vpop.permute.xlu0 %3384  ;;  %v7224_v39 = vpack.c.bf16 %v4035_v47, %v4035_v47  ;;  %v3073_v60 = vld [vmem:[#allocation3 + $0x108] sm:$0xff]  ;;  %v7141_v21 = vpack.c.bf16 %v3502_v1, %v3502_v1 }
 0x322   : > { %v4859_v32 = vpop.permute.xlu1 %4858  ;;  %4197 = vst.msk [vmem:[#allocation4 + $0x10c] sm:$0xf] %vm3211_vm15, %v7226_v62  ;;  %v7098_v9 = vpack.c.bf16 %v3073_v60, %v3073_v60  ;;  %v4464_v62 = vld [vmem:[#allocation3 + $0x30] sm:$0xff] }
 0x323   : > { %4949 = vst.msk [vmem:[#allocation4 + $0x40] sm:$0xf] %vm3982_vm4, %v4859_v32  ;;  %v4996_v46 = vld [vmem:[#allocation3 + $0x122] sm:$0xff]  ;;  %v4997_v8 = vld [vmem:[#allocation3 + $0x12a] sm:$0xff]  ;;  %4876 = vrot.lane.b32.xlu0 %v9292_v59, %s7729_s28  ;;  %v4465_v32 = vld [vmem:[#allocation3 + $0x38] sm:$0xff] }
 0x324   : > { %3475 = vst.msk [vmem:[#allocation4 + $0x48] sm:$0xf] %vm3468_vm2, %v3385_v50  ;;  %3916 = vrot.lane.b32.xlu1 %v9231_v51, %s7729_s28  ;;  %v9302_v4 = vpack.c.bf16 %v4996_v46, %v4996_v46  ;;  %v9304_v0 = vpack.c.bf16 %v4997_v8, %v4997_v8  ;;  %v4038_v38 = vld [vmem:[#allocation3 + $0x129] sm:$0xff]  ;;  %v4995_v10 = vld [vmem:[#allocation3 + $0x112] sm:$0xff]  ;;  %v7269_v60 = vpack.c.bf16 %v4465_v32, %v4465_v32 }
 0x325   : > { %3236 = vst.msk [vmem:[#allocation4 + $0x120] sm:$0xf] %vm3211_vm15, %v7100_v48  ;;  %4195 = vst.msk [vmem:[#allocation4 + $0xf4] sm:$0xf] %vm3211_vm15, %v7224_v39  ;;  %v3076_v56 = vld [vmem:[#allocation3 + $0x128] sm:$0xff]  ;;  %v7227_v3 = vpack.c.bf16 %v4038_v38, %v4038_v38  ;;  %v4348_v19 = vpop.permute.xlu0 %4347  ;;  %v9316_v49 = vpack.c.bf16 %v4995_v10, %v4995_v10  ;;  %v4036_v14 = vld [vmem:[#allocation3 + $0x111] sm:$0xff]  ;;  %v7268_v48 = vpack.c.bf16 %v4464_v62, %v4464_v62 }
 0x326   : > { %v4994_v12 = vld [vmem:[#allocation3 + $0x10a] sm:$0xff]  ;;  %3234 = vst.msk [vmem:[#allocation4 + $0x108] sm:$0xf] %vm3211_vm15, %v7098_v9  ;;  %v7101_v34 = vpack.c.bf16 %v3076_v56, %v3076_v56  ;;  %v3387_v51 = vpop.permute.xlu1 %3386  ;;  %5156 = vst.msk [vmem:[#allocation4 + $0xf8] sm:$0xf] %vm3211_vm15, %v9302_v4  ;;  %v7225_v61 = vpack.c.bf16 %v4036_v14, %v4036_v14  ;;  %v5176_v23 = vld [vmem:[#allocation4 + $0x30] sm:$0xff]  ;;  %v7300_v9 = vpack.c.bf16 %v4720_v31, %v4720_v31 }
 0x327   : > { %5157 = vst.msk [vmem:[#allocation4 + $0x104] sm:$0xf] %vm3211_vm15, %v9304_v0  ;;  %v9314_v5 = vpack.c.bf16 %v4994_v12, %v4994_v12  ;;  %v3074_v18 = vld [vmem:[#allocation3 + $0x110] sm:$0xff]  ;;  %4198 = vst.msk [vmem:[#allocation4 + $0x118] sm:$0xf] %vm3211_vm15, %v7227_v3  ;;  %3372 = vrot.lane.b32.xlu0 %v7108_v37, %s7727_s11  ;;  %v4721_v37 = vld [vmem:[#allocation3 + $0x39] sm:$0xff] }
 0x328   : > { %3476 = vst.msk [vmem:[#allocation4 + $0x54] sm:$0xf] %vm3468_vm2, %v3387_v51  ;;  %4437 = vst.msk [vmem:[#allocation4 + $0x4c] sm:$0xf] %vm3468_vm2, %v4348_v19  ;;  %4878 = vrot.lane.b32.xlu1 %v9308_v26, %s7729_s28  ;;  %v7099_v20 = vpack.c.bf16 %v3074_v18, %v3074_v18  ;;  %v7301_v3 = vpack.c.bf16 %v4721_v37, %v4721_v37 }
 0x329   : > { %3237 = vst.msk [vmem:[#allocation4 + $0x12c] sm:$0xf] %vm3211_vm15, %v7101_v34  ;;  %5154 = vst.msk [vmem:[#allocation4 + $0xe0] sm:$0xf] %vm3211_vm15, %v9314_v5  ;;  %v3642_v28 = vpop.permute.xlu0 %3641 }
 0x32a   : > { %5155 = vst.msk [vmem:[#allocation4 + $0xec] sm:$0xf] %vm3211_vm15, %v9316_v49  ;;  %4196 = vst.msk [vmem:[#allocation4 + $0x100] sm:$0xf] %vm3211_vm15, %v7225_v61  ;;  %v4350_v27 = vpop.permute.xlu1 %4349  ;;  %v5178_v36 = vld [vmem:[#allocation4 + $0x3c] sm:$0xff] }
 0x32b   : > { %v7660_v25 = vld [vmem:[#allocation4 + $0x34] ss:$12 sps:$4 sm:$0xff]   ;;  %3235 = vst.msk [vmem:[#allocation4 + $0x114] sm:$0xf] %vm3211_vm15, %v7099_v20  ;;  %v6708_v29 = vcombine.low %v5176_v23, %v5178_v36  ;;  %4335 = vrot.lane.b32.xlu0 %v7236_v33, %s7727_s11 }
 0x32c   : > { %4438 = vst.msk [vmem:[#allocation4 + $0x58] sm:$0xf] %vm3468_vm2, %v4350_v27  ;;  %3374 = vrot.lane.b32.xlu1 %v7109_v22, %s7727_s11  ;;  %5719 = vmatprep.mubr.bf16.mxu1 %v7660_v25  ;;  %v4480_v25 = vld [vmem:[#allocation3 + $0xf0] sm:$0xff] }
 0x32d   : > { %3732 = vst.msk [vmem:[#allocation4 + $0x48] sm:$0xf] %vm3725_vm3, %v3642_v28  ;;  %v4605_v63 = vpop.permute.xlu0 %4604  ;;  %5720 = vmatmul.mubr.bf16.gmra.mxu1 %v6708_v29  ;;  %v9386_v62 = vpack.c.bf16 %v4480_v25, %v4480_v25 }
 0x32e   : > { %v3644_v41 = vpop.permute.xlu1 %3643  ;;  %4694 = vst.msk [vmem:[#allocation4 + $0x4c] sm:$0xf] %vm3725_vm3, %v4605_v63 }
 0x32f   : > { %3733 = vst.msk [vmem:[#allocation4 + $0x54] sm:$0xf] %vm3725_vm3, %v3644_v41  ;;  %3629 = vrot.lane.b32.xlu0 %v7140_v55, %s7728_s16 }
 0x330   : > { %4337 = vrot.lane.b32.xlu1 %v7237_v42, %s7727_s11 }
 0x331   : > { %v3899_v47 = vpop.permute.xlu0 %3898 }
 0x332   : > { %v4607_v43 = vpop.permute.xlu1 %4606  ;;  %3989 = vst.msk [vmem:[#allocation4 + $0x48] sm:$0xf] %vm3982_vm4, %v3899_v47 }
 0x333   : > { %4695 = vst.msk [vmem:[#allocation4 + $0x58] sm:$0xf] %vm3725_vm3, %v4607_v43  ;;  %4592 = vrot.lane.b32.xlu0 %v7268_v48, %s7728_s16 }
 0x334   : > { %3631 = vrot.lane.b32.xlu1 %v7141_v21, %s7728_s16  ;;  %v4481_v21 = vld [vmem:[#allocation3 + $0xf8] sm:$0xff] }
 0x335   : > { %v4861_v39 = vpop.permute.xlu0 %4860 }
 0x336   : > { %v3901_v50 = vpop.permute.xlu1 %3900  ;;  %4950 = vst.msk [vmem:[#allocation4 + $0x4c] sm:$0xf] %vm3982_vm4, %v4861_v39 }
 0x337   : > { %3990 = vst.msk [vmem:[#allocation4 + $0x54] sm:$0xf] %vm3982_vm4, %v3901_v50  ;;  %3886 = vrot.lane.b32.xlu0 %v8797_v44, %s7729_s28  ;;  %v9357_v44 = vld [vmem:[%s9996_s3 + $0x88] sm:$0xff]  }
 0x338   : > { %4594 = vrot.lane.b32.xlu1 %v7269_v60, %s7728_s16  ;;  %7551 = vmatprep.subr.bf16.mxu0 %v9357_v44 }
 0x339   : > { %v3389_v8 = vpop.permute.xlu0 %3388 }
 0x33a   : > { %v4863_v46 = vpop.permute.xlu1 %4862  ;;  %3477 = vst.msk [vmem:[#allocation4 + $0x60] sm:$0xf] %vm3468_vm2, %v3389_v8 }
 0x33b   : > { %4951 = vst.msk [vmem:[#allocation4 + $0x58] sm:$0xf] %vm3982_vm4, %v4863_v46  ;;  %v7545_v38 = vpop.f32.mrf.mxu0  ;;  %4848 = vrot.lane.b32.xlu0 %v7300_v9, %s7729_s28 }
 0x33c   : > { %3888 = vrot.lane.b32.xlu1 %v8823_v6, %s7729_s28  ;;  %v2918_v56 = vadd.f32 %v9260_v16, %v7545_v38  ;;  %v9410_v38 = vpack.c.bf16 %v4481_v21, %v4481_v21 }
 0x33d   : > { %v2909_v13 = vpop.f32.mrf.mxu0  ;;  %v4352_v10 = vpop.permute.xlu0 %4351  ;;  %v5180_v22 = vld [vmem:[#allocation4 + $0x48] sm:$0xff] }
 0x33e   : > { %v3391_v12 = vpop.permute.xlu1 %3390  ;;  %v2966_v34 = vmax.f32 %v2918_v56, 0.0  ;;  %v2910_v51 = vadd.f32 %v9260_v16, %v2909_v13  ;;  %4439 = vst.msk [vmem:[#allocation4 + $0x64] sm:$0xf] %vm3468_vm2, %v4352_v10 }
 0x33f   : > { %3478 = vst.msk [vmem:[#allocation4 + $0x6c] sm:$0xf] %vm3468_vm2, %v3391_v12  ;;  %v7546_v6 = vpop.f32.mrf.mxu0  ;;  %3404 = vrot.lane.b32.xlu0 %v9090_v30, %s7727_s11 }
 0x340   : > { %4850 = vrot.lane.b32.xlu1 %v7301_v3, %s7729_s28  ;;  %3045 = vst.msk [vmem:[#allocation3 + $0x151] sm:$0xff] %vm2972_vm6, %v2966_v34  ;;  %v2964_v19 = vmax.f32 %v2910_v51, 0.0  ;;  %v2921_v14 = vadd.f32 %v9260_v16, %v7546_v6 }
 0x341   : > { %v2912_v35 = vpop.f32.mrf.mxu0  ;;  %v3646_v18 = vpop.permute.xlu0 %3645 }
 0x342   : > { %v4354_v61 = vpop.permute.xlu1 %4353  ;;  %v5182_v20 = vld [vmem:[#allocation4 + $0x54] sm:$0xff]  ;;  %3043 = vst.msk [vmem:[#allocation3 + $0x139] sm:$0xff] %vm2972_vm6, %v2964_v19  ;;  %v2967_v27 = vmax.f32 %v2921_v14, 0.0  ;;  %v2913_v28 = vadd.f32 %v9260_v16, %v2912_v35 }
 0x343   : > { %v7662_v15 = vld [vmem:[#allocation4 + $0x4c] ss:$12 sps:$4 sm:$0xff]   ;;  %4440 = vst.msk [vmem:[#allocation4 + $0x70] sm:$0xf] %vm3468_vm2, %v4354_v61  ;;  %v6711_v30 = vcombine.low %v5180_v22, %v5182_v20  ;;  %4367 = vrot.lane.b32.xlu0 %v9205_v11, %s7727_s11 }
 0x344   : > { %3734 = vst.msk [vmem:[#allocation4 + $0x60] sm:$0xf] %vm3725_vm3, %v3646_v18  ;;  %3406 = vrot.lane.b32.xlu1 %v9110_v45, %s7727_s11  ;;  %v2965_v33 = vmax.f32 %v2913_v28, 0.0  ;;  %5727 = vmatprep.mubr.bf16.mxu1 %v7662_v15 }
 0x345   : > { %3046 = vst.msk [vmem:[#allocation3 + $0x159] sm:$0xff] %vm2972_vm6, %v2967_v27  ;;  %v4609_v36 = vpop.permute.xlu0 %4608  ;;  %5728 = vmatmul.mubr.bf16.gmra.mxu1 %v6711_v30  ;;  %v4483_v30 = vld [vmem:[#allocation3 + $0x110] sm:$0xff] }
 0x346   : > { %v3648_v23 = vpop.permute.xlu1 %3647  ;;  %3044 = vst.msk [vmem:[#allocation3 + $0x141] sm:$0xff] %vm2972_vm6, %v2965_v33 }
 0x347   : > { %3735 = vst.msk [vmem:[#allocation4 + $0x6c] sm:$0xf] %vm3725_vm3, %v3648_v23  ;;  %4696 = vst.msk [vmem:[#allocation4 + $0x64] sm:$0xf] %vm3725_vm3, %v4609_v36  ;;  %v4744_v29 = vld [vmem:[#allocation3 + $0x151] sm:$0xff]  ;;  %3661 = vrot.lane.b32.xlu0 %v9103_v17, %s7728_s16 }
 0x348   : > { %v3079_v52 = vld [vmem:[#allocation3 + $0x150] sm:$0xff]  ;;  %4369 = vrot.lane.b32.xlu1 %v9207_v54, %s7727_s11  ;;  %v9384_v45 = vpack.c.bf16 %v4744_v29, %v4744_v29  ;;  %v9472_v29 = vpack.c.bf16 %v4483_v30, %v4483_v30 }
 0x349   : > { %v7104_v55 = vpack.c.bf16 %v3079_v52, %v3079_v52  ;;  %v4742_v1 = vld [vmem:[#allocation3 + $0x139] sm:$0xff]  ;;  %v3903_v42 = vpop.permute.xlu0 %3902 }
 0x34a   : > { %v3077_v41 = vld [vmem:[#allocation3 + $0x138] sm:$0xff]  ;;  %v4611_v63 = vpop.permute.xlu1 %4610  ;;  %v9388_v43 = vpack.c.bf16 %v4742_v1, %v4742_v1  ;;  %4201 = vst.msk [vmem:[#allocation4 + $0x13c] sm:$0xf] %vm3211_vm15, %v9384_v45  ;;  %v4738_v1 = vld [vmem:[#allocation3 + $0x109] sm:$0xff] }
 0x34b   : > { %v7102_v47 = vpack.c.bf16 %v3077_v41, %v3077_v41  ;;  %3240 = vst.msk [vmem:[#allocation4 + $0x150] sm:$0xf] %vm3211_vm15, %v7104_v55  ;;  %4624 = vrot.lane.b32.xlu0 %v9386_v62, %s7728_s16 }
 0x34c   : > { %4697 = vst.msk [vmem:[#allocation4 + $0x70] sm:$0xf] %vm3725_vm3, %v4611_v63  ;;  %v5000_v17 = vld [vmem:[#allocation3 + $0x152] sm:$0xff]  ;;  %v5001_v48 = vld [vmem:[#allocation3 + $0x15a] sm:$0xff]  ;;  %3663 = vrot.lane.b32.xlu1 %v9105_v58, %s7728_s16 }
 0x34d   : > { %3991 = vst.msk [vmem:[#allocation4 + $0x60] sm:$0xf] %vm3982_vm4, %v3903_v42  ;;  %v4489_v32 = vld [vmem:[#allocation3 + $0x158] sm:$0xff]  ;;  %v9399_v50 = vpack.c.bf16 %v5000_v17, %v5000_v17  ;;  %v9401_v39 = vpack.c.bf16 %v5001_v48, %v5001_v48  ;;  %v4999_v8 = vld [vmem:[#allocation3 + $0x142] sm:$0xff]  ;;  %v4865_v37 = vpop.permute.xlu0 %4864  ;;  %v9483_v17 = vpack.c.bf16 %v4738_v1, %v4738_v1 }
 0x34e   : > { %v9403_v60 = vpack.c.bf16 %v4489_v32, %v4489_v32  ;;  %v4745_v31 = vld [vmem:[#allocation3 + $0x159] sm:$0xff]  ;;  %4199 = vst.msk [vmem:[#allocation4 + $0x124] sm:$0xf] %vm3211_vm15, %v9388_v43  ;;  %3238 = vst.msk [vmem:[#allocation4 + $0x138] sm:$0xf] %vm3211_vm15, %v7102_v47  ;;  %v3905_v58 = vpop.permute.xlu1 %3904  ;;  %v9418_v13 = vpack.c.bf16 %v4999_v8, %v4999_v8  ;;  %v4743_v12 = vld [vmem:[#allocation3 + $0x141] sm:$0xff] }
 0x34f   : > { %v4998_v46 = vld [vmem:[#allocation3 + $0x13a] sm:$0xff]  ;;  %v9408_v9 = vpack.c.bf16 %v4745_v31, %v4745_v31  ;;  %5160 = vst.msk [vmem:[#allocation4 + $0x128] sm:$0xf] %vm3211_vm15, %v9399_v50  ;;  %5161 = vst.msk [vmem:[#allocation4 + $0x134] sm:$0xf] %vm3211_vm15, %v9401_v39  ;;  %v9424_v3 = vpack.c.bf16 %v4743_v12, %v4743_v12  ;;  %3918 = vrot.lane.b32.xlu0 %v9272_v40, %s7729_s28 }
 0x350   : > { %v9416_v56 = vpack.c.bf16 %v4998_v46, %v4998_v46  ;;  %v3078_v10 = vld [vmem:[#allocation3 + $0x140] sm:$0xff]  ;;  %3241 = vst.msk [vmem:[#allocation4 + $0x15c] sm:$0xf] %vm3211_vm15, %v9403_v60  ;;  %4626 = vrot.lane.b32.xlu1 %v9410_v38, %s7728_s16  ;;  %5159 = vst.msk [vmem:[#allocation4 + $0x11c] sm:$0xf] %vm3211_vm15, %v9418_v13 }
 0x351   : > { %3992 = vst.msk [vmem:[#allocation4 + $0x6c] sm:$0xf] %vm3982_vm4, %v3905_v58  ;;  %4952 = vst.msk [vmem:[#allocation4 + $0x64] sm:$0xf] %vm3982_vm4, %v4865_v37  ;;  %v7103_v34 = vpack.c.bf16 %v3078_v10, %v3078_v10  ;;  %v3393_v6 = vpop.permute.xlu0 %3392 }
 0x352   : > { %4202 = vst.msk [vmem:[#allocation4 + $0x148] sm:$0xf] %vm3211_vm15, %v9408_v9  ;;  %5158 = vst.msk [vmem:[#allocation4 + $0x110] sm:$0xf] %vm3211_vm15, %v9416_v56  ;;  %v4867_v51 = vpop.permute.xlu1 %4866 }
 0x353   : > { %4200 = vst.msk [vmem:[#allocation4 + $0x130] sm:$0xf] %vm3211_vm15, %v9424_v3  ;;  %3239 = vst.msk [vmem:[#allocation4 + $0x144] sm:$0xf] %vm3211_vm15, %v7103_v34  ;;  %4880 = vrot.lane.b32.xlu0 %v9184_v24, %s7729_s28 }
 0x354   : > { %4953 = vst.msk [vmem:[#allocation4 + $0x70] sm:$0xf] %vm3982_vm4, %v4867_v51  ;;  %3920 = vrot.lane.b32.xlu1 %v9283_v53, %s7729_s28 }
 0x355   : > { %3479 = vst.msk [vmem:[#allocation4 + $0x78] sm:$0xf] %vm3468_vm2, %v3393_v6  ;;  %v4356_v19 = vpop.permute.xlu0 %4355 }
 0x356   : > { %v3395_v40 = vpop.permute.xlu1 %3394  ;;  %4441 = vst.msk [vmem:[#allocation4 + $0x7c] sm:$0xf] %vm3468_vm2, %v4356_v19 }
 0x357   : > { %3480 = vst.msk [vmem:[#allocation4 + $0x84] sm:$0xf] %vm3468_vm2, %v3395_v40  ;;  %3408 = vrot.lane.b32.xlu0 %v9292_v59, %s7727_s11  ;;  %v4482_v59 = vld [vmem:[#allocation3 + $0x108] sm:$0xff] }
 0x358   : > { %4882 = vrot.lane.b32.xlu1 %v9198_v57, %s7729_s28  ;;  %v5184_v61 = vld [vmem:[#allocation4 + $0x60] sm:$0xff]  ;;  %v9463_v28 = vpack.c.bf16 %v4482_v59, %v4482_v59 }
 0x359   : > { %v3650_v35 = vpop.permute.xlu0 %3649 }
 0x35a   : > { %v4358_v14 = vpop.permute.xlu1 %4357  ;;  %3736 = vst.msk [vmem:[#allocation4 + $0x78] sm:$0xf] %vm3725_vm3, %v3650_v35 }
 0x35b   : > { %v5186_v18 = vld [vmem:[#allocation4 + $0x6c] sm:$0xff]  ;;  %4442 = vst.msk [vmem:[#allocation4 + $0x88] sm:$0xf] %vm3468_vm2, %v4358_v14  ;;  %4371 = vrot.lane.b32.xlu0 %v9193_v2, %s7727_s11 }
 0x35c   : > { %v7664_v53 = vld [vmem:[#allocation4 + $0x64] ss:$12 sps:$4 sm:$0xff]   ;;  %v6714_v22 = vcombine.low %v5184_v61, %v5186_v18  ;;  %3410 = vrot.lane.b32.xlu1 %v9308_v26, %s7727_s11 }
 0x35d   : > { %5735 = vmatprep.mubr.bf16.mxu1 %v7664_v53  ;;  %v4613_v15 = vpop.permute.xlu0 %4612 }
 0x35e   : > { %v3652_v20 = vpop.permute.xlu1 %3651  ;;  %5736 = vmatmul.mubr.bf16.gmra.mxu1 %v6714_v22  ;;  %4698 = vst.msk [vmem:[#allocation4 + $0x7c] sm:$0xf] %vm3725_vm3, %v4613_v15 }
 0x35f   : > { %3737 = vst.msk [vmem:[#allocation4 + $0x84] sm:$0xf] %vm3725_vm3, %v3652_v20  ;;  %3665 = vrot.lane.b32.xlu0 %v9205_v11, %s7728_s16 }
 0x360   : > { %4373 = vrot.lane.b32.xlu1 %v9195_v7, %s7727_s11 }
 0x361   : > { %v3907_v26 = vpop.permute.xlu0 %3906 }
 0x362   : > { %v4615_v27 = vpop.permute.xlu1 %4614  ;;  %3993 = vst.msk [vmem:[#allocation4 + $0x78] sm:$0xf] %vm3982_vm4, %v3907_v26  ;;  %v7549_v33 = vpop.f32.mrf.mxu0 }
 0x363   : > { %4699 = vst.msk [vmem:[#allocation4 + $0x88] sm:$0xf] %vm3725_vm3, %v4615_v27  ;;  %4628 = vrot.lane.b32.xlu0 %v9463_v28, %s7728_s16  ;;  %v2934_v23 = vadd.f32 %v9260_v16, %v7549_v33 }
 0x364   : > { %3667 = vrot.lane.b32.xlu1 %v9207_v54, %s7728_s16  ;;  %v2925_v36 = vpop.f32.mrf.mxu0 }
 0x365   : > { %v4869_v25 = vpop.permute.xlu0 %4868  ;;  %v2970_v52 = vmax.f32 %v2934_v23, 0.0  ;;  %v2926_v55 = vadd.f32 %v9260_v16, %v2925_v36 }
 0x366   : > { %v3909_v11 = vpop.permute.xlu1 %3908  ;;  %4954 = vst.msk [vmem:[#allocation4 + $0x7c] sm:$0xf] %vm3982_vm4, %v4869_v25  ;;  %v7550_v41 = vpop.f32.mrf.mxu0 }
 0x367   : > { %3994 = vst.msk [vmem:[#allocation4 + $0x84] sm:$0xf] %vm3982_vm4, %v3909_v11  ;;  %3922 = vrot.lane.b32.xlu0 %v9386_v62, %s7729_s28  ;;  %v2968_v54 = vmax.f32 %v2926_v55, 0.0  ;;  %v2937_v63 = vadd.f32 %v9260_v16, %v7550_v41  ;;  %v4739_v62 = vld [vmem:[#allocation3 + $0x111] sm:$0xff]  ;;  %v4484_v11 = vld [vmem:[#allocation3 + $0x120] sm:$0xff] }
 0x368   : > { %4630 = vrot.lane.b32.xlu1 %v9472_v29, %s7728_s16  ;;  %3049 = vst.msk [vmem:[#allocation3 + $0x181] sm:$0xff] %vm2972_vm6, %v2970_v52  ;;  %v2928_v42 = vpop.f32.mrf.mxu0  ;;  %v9494_v58 = vpack.c.bf16 %v4739_v62, %v4739_v62  ;;  %v7288_v1 = vpack.c.bf16 %v4484_v11, %v4484_v11 }
 0x369   : > { %v3397_v47 = vpop.permute.xlu0 %3396  ;;  %3047 = vst.msk [vmem:[#allocation3 + $0x169] sm:$0xff] %vm2972_vm6, %v2968_v54  ;;  %v2971_v48 = vmax.f32 %v2937_v63, 0.0  ;;  %v2929_v32 = vadd.f32 %v9260_v16, %v2928_v42  ;;  %v4740_v42 = vld [vmem:[#allocation3 + $0x121] sm:$0xff] }
 0x36a   : > { %v4871_v21 = vpop.permute.xlu1 %4870  ;;  %3481 = vst.msk [vmem:[#allocation4 + $0x90] sm:$0xf] %vm3468_vm2, %v3397_v47 }
 0x36b   : > { %4955 = vst.msk [vmem:[#allocation4 + $0x88] sm:$0xf] %vm3982_vm4, %v4871_v21  ;;  %4884 = vrot.lane.b32.xlu0 %v9483_v17, %s7729_s28  ;;  %v2969_v31 = vmax.f32 %v2929_v32, 0.0 }
 0x36c   : > { %3924 = vrot.lane.b32.xlu1 %v9410_v38, %s7729_s28  ;;  %3050 = vst.msk [vmem:[#allocation3 + $0x189] sm:$0xff] %vm2972_vm6, %v2971_v48  ;;  %v7320_v48 = vpack.c.bf16 %v4740_v42, %v4740_v42 }
 0x36d   : > { %v4360_v8 = vpop.permute.xlu0 %4359  ;;  %3048 = vst.msk [vmem:[#allocation3 + $0x171] sm:$0xff] %vm2972_vm6, %v2969_v31  ;;  %v5188_v51 = vld [vmem:[#allocation4 + $0x78] sm:$0xff] }
 0x36e   : > { %v3399_v46 = vpop.permute.xlu1 %3398  ;;  %4443 = vst.msk [vmem:[#allocation4 + $0x94] sm:$0xf] %vm3468_vm2, %v4360_v8 }
 0x36f   : > { %3482 = vst.msk [vmem:[#allocation4 + $0x9c] sm:$0xf] %vm3468_vm2, %v3399_v46  ;;  %v4748_v16 = vld [vmem:[#allocation3 + $0x181] sm:$0xff]  ;;  %3412 = vrot.lane.b32.xlu0 %v9184_v24, %s7727_s11 }
 0x370   : > { %4886 = vrot.lane.b32.xlu1 %v9494_v58, %s7729_s28  ;;  %v9503_v37 = vpack.c.bf16 %v4748_v16, %v4748_v16  ;;  %v4490_v38 = vld [vmem:[#allocation3 + $0x168] sm:$0xff] }
 0x371   : > { %v4746_v12 = vld [vmem:[#allocation3 + $0x169] sm:$0xff]  ;;  %v3654_v34 = vpop.permute.xlu0 %3653  ;;  %v9505_v19 = vpack.c.bf16 %v4490_v38, %v4490_v38 }
 0x372   : > { %v4362_v10 = vpop.permute.xlu1 %4361  ;;  %v5190_v6 = vld [vmem:[#allocation4 + $0x84] sm:$0xff]  ;;  %v9507_v14 = vpack.c.bf16 %v4746_v12, %v4746_v12  ;;  %4205 = vst.msk [vmem:[#allocation4 + $0x16c] sm:$0xf] %vm3211_vm15, %v9503_v37 }
 0x373   : > { %v7666_v40 = vld [vmem:[#allocation4 + $0x7c] ss:$12 sps:$4 sm:$0xff]   ;;  %4444 = vst.msk [vmem:[#allocation4 + $0xa0] sm:$0xf] %vm3468_vm2, %v4362_v10  ;;  %v6717_v24 = vcombine.low %v5188_v51, %v5190_v6  ;;  %v5004_v35 = vld [vmem:[#allocation3 + $0x182] sm:$0xff]  ;;  %4375 = vrot.lane.b32.xlu0 %v9314_v5, %s7727_s11 }
 0x374   : > { %3738 = vst.msk [vmem:[#allocation4 + $0x90] sm:$0xf] %vm3725_vm3, %v3654_v34  ;;  %v5005_v61 = vld [vmem:[#allocation3 + $0x18a] sm:$0xff]  ;;  %3414 = vrot.lane.b32.xlu1 %v9198_v57, %s7727_s11  ;;  %v9517_v18 = vpack.c.bf16 %v5004_v35, %v5004_v35  ;;  %5743 = vmatprep.mubr.bf16.mxu1 %v7666_v40  ;;  %v5003_v15 = vld [vmem:[#allocation3 + $0x172] sm:$0xff]  ;;  %v4487_v6 = vld [vmem:[#allocation3 + $0x140] sm:$0xff] }
 0x375   : > { %v9519_v53 = vpack.c.bf16 %v5005_v61, %v5005_v61  ;;  %v4749_v22 = vld [vmem:[#allocation3 + $0x189] sm:$0xff]  ;;  %4203 = vst.msk [vmem:[#allocation4 + $0x154] sm:$0xf] %vm3211_vm15, %v9507_v14  ;;  %3242 = vst.msk [vmem:[#allocation4 + $0x168] sm:$0xf] %vm3211_vm15, %v9505_v19  ;;  %v4617_v26 = vpop.permute.xlu0 %4616  ;;  %5744 = vmatmul.mubr.bf16.gmra.mxu1 %v6717_v24  ;;  %v9533_v33 = vpack.c.bf16 %v5003_v15, %v5003_v15  ;;  %v4747_v36 = vld [vmem:[#allocation3 + $0x171] sm:$0xff]  ;;  %v7291_v35 = vpack.c.bf16 %v4487_v6, %v4487_v6 }
 0x376   : > { %v5002_v20 = vld [vmem:[#allocation3 + $0x16a] sm:$0xff]  ;;  %v9525_v27 = vpack.c.bf16 %v4749_v22, %v4749_v22  ;;  %v3656_v57 = vpop.permute.xlu1 %3655  ;;  %5164 = vst.msk [vmem:[#allocation4 + $0x158] sm:$0xf] %vm3211_vm15, %v9517_v18  ;;  %v9539_v25 = vpack.c.bf16 %v4747_v36, %v4747_v36 }
 0x377   : > { %v4491_v59 = vld [vmem:[#allocation3 + $0x170] sm:$0xff]  ;;  %5165 = vst.msk [vmem:[#allocation4 + $0x164] sm:$0xf] %vm3211_vm15, %v9519_v53  ;;  %v9531_v30 = vpack.c.bf16 %v5002_v20, %v5002_v20  ;;  %3669 = vrot.lane.b32.xlu0 %v9193_v2, %s7728_s16  ;;  %5163 = vst.msk [vmem:[#allocation4 + $0x14c] sm:$0xf] %vm3211_vm15, %v9533_v33  ;;  %v4485_v2 = vld [vmem:[#allocation3 + $0x128] sm:$0xff] }
 0x378   : > { %v9535_v23 = vpack.c.bf16 %v4491_v59, %v4491_v59  ;;  %3739 = vst.msk [vmem:[#allocation4 + $0x9c] sm:$0xf] %vm3725_vm3, %v3656_v57  ;;  %4700 = vst.msk [vmem:[#allocation4 + $0x94] sm:$0xf] %vm3725_vm3, %v4617_v26  ;;  %4377 = vrot.lane.b32.xlu1 %v9316_v49, %s7727_s11  ;;  %v7289_v63 = vpack.c.bf16 %v4485_v2, %v4485_v2 }
 0x379   : > { %4206 = vst.msk [vmem:[#allocation4 + $0x178] sm:$0xf] %vm3211_vm15, %v9525_v27  ;;  %5162 = vst.msk [vmem:[#allocation4 + $0x140] sm:$0xf] %vm3211_vm15, %v9531_v30  ;;  %v3911_v55 = vpop.permute.xlu0 %3910 }
 0x37a   : > { %3243 = vst.msk [vmem:[#allocation4 + $0x174] sm:$0xf] %vm3211_vm15, %v9535_v23  ;;  %4204 = vst.msk [vmem:[#allocation4 + $0x160] sm:$0xf] %vm3211_vm15, %v9539_v25  ;;  %v4619_v52 = vpop.permute.xlu1 %4618 }
 0x37b   : > { %4701 = vst.msk [vmem:[#allocation4 + $0xa0] sm:$0xf] %vm3725_vm3, %v4619_v52  ;;  %4632 = vrot.lane.b32.xlu0 %v7288_v1, %s7728_s16 }
 0x37c   : > { %3995 = vst.msk [vmem:[#allocation4 + $0x90] sm:$0xf] %vm3982_vm4, %v3911_v55  ;;  %3671 = vrot.lane.b32.xlu1 %v9195_v7, %s7728_s16  ;;  %v4741_v7 = vld [vmem:[#allocation3 + $0x129] sm:$0xff] }
 0x37d   : > { %v4873_v54 = vpop.permute.xlu0 %4872  ;;  %v7321_v31 = vpack.c.bf16 %v4741_v7, %v4741_v7  ;;  %v4488_v55 = vld [vmem:[#allocation3 + $0x150] sm:$0xff] }
 0x37e   : > { %v3913_v41 = vpop.permute.xlu1 %3912  ;;  %4956 = vst.msk [vmem:[#allocation4 + $0x94] sm:$0xf] %vm3982_vm4, %v4873_v54 }
 0x37f   : > { %3996 = vst.msk [vmem:[#allocation4 + $0x9c] sm:$0xf] %vm3982_vm4, %v3913_v41  ;;  %3926 = vrot.lane.b32.xlu0 %v9463_v28, %s7729_s28  ;;  %v7292_v41 = vpack.c.bf16 %v4488_v55, %v4488_v55 }
 0x380   : > { %4634 = vrot.lane.b32.xlu1 %v7289_v63, %s7728_s16 }
 0x381   : > { %v3401_v47 = vpop.permute.xlu0 %3400 }
 0x382   : > { %v4875_v21 = vpop.permute.xlu1 %4874  ;;  %3483 = vst.msk [vmem:[#allocation4 + $0xa8] sm:$0xf] %vm3468_vm2, %v3401_v47 }
 0x383   : > { %4957 = vst.msk [vmem:[#allocation4 + $0xa0] sm:$0xf] %vm3982_vm4, %v4875_v21  ;;  %4888 = vrot.lane.b32.xlu0 %v7320_v48, %s7729_s28 }
 0x384   : > { %3928 = vrot.lane.b32.xlu1 %v9472_v29, %s7729_s28 }
 0x385   : > { %v4364_v62 = vpop.permute.xlu0 %4363  ;;  %v5192_v8 = vld [vmem:[#allocation4 + $0x90] sm:$0xff] }
 0x386   : > { %v3403_v32 = vpop.permute.xlu1 %3402  ;;  %4445 = vst.msk [vmem:[#allocation4 + $0xac] sm:$0xf] %vm3468_vm2, %v4364_v62  ;;  %v7676_v62 = vld [vmem:[#allocation4 + $0x8] ss:$12 sps:$4 sm:$0xff]  }
 0x387   : > { %3484 = vst.msk [vmem:[#allocation4 + $0xb4] sm:$0xf] %vm3468_vm2, %v3403_v32  ;;  %3416 = vrot.lane.b32.xlu0 %v9483_v17, %s7727_s11  ;;  %v4486_v17 = vld [vmem:[#allocation3 + $0x138] sm:$0xff] }
 0x388   : > { %4890 = vrot.lane.b32.xlu1 %v7321_v31, %s7729_s28  ;;  %v7290_v51 = vpack.c.bf16 %v4486_v17, %v4486_v17 }
 0x389   : > { %v3658_v46 = vpop.permute.xlu0 %3657 }
 0x38a   : > { %v4366_v28 = vpop.permute.xlu1 %4365  ;;  %v5194_v16 = vld [vmem:[#allocation4 + $0x9c] sm:$0xff]  ;;  %3740 = vst.msk [vmem:[#allocation4 + $0xa8] sm:$0xf] %vm3725_vm3, %v3658_v46 }
 0x38b   : > { %v7668_v38 = vld [vmem:[#allocation4 + $0x94] ss:$12 sps:$4 sm:$0xff]   ;;  %4446 = vst.msk [vmem:[#allocation4 + $0xb8] sm:$0xf] %vm3468_vm2, %v4366_v28  ;;  %v6720_v29 = vcombine.low %v5192_v8, %v5194_v16  ;;  %4379 = vrot.lane.b32.xlu0 %v9302_v4, %s7727_s11  ;;  %v7679_v8 = vld [vmem:[#allocation4 + $0x38] ss:$12 sps:$4 sm:$0xff]  }
 0x38c   : > { %3418 = vrot.lane.b32.xlu1 %v9494_v58, %s7727_s11  ;;  %5751 = vmatprep.mubr.bf16.mxu1 %v7668_v38 }
 0x38d   : > { %v4621_v10 = vpop.permute.xlu0 %4620  ;;  %5752 = vmatmul.mubr.bf16.gmra.mxu1 %v6720_v29  ;;  %v7680_v29 = vld [vmem:[#allocation4 + $0x50] ss:$12 sps:$4 sm:$0xff]  }
 0x38e   : > { %v3660_v12 = vpop.permute.xlu1 %3659  ;;  %4702 = vst.msk [vmem:[#allocation4 + $0xac] sm:$0xf] %vm3725_vm3, %v4621_v10 }
 0x38f   : > { %3741 = vst.msk [vmem:[#allocation4 + $0xb4] sm:$0xf] %vm3725_vm3, %v3660_v12  ;;  %3673 = vrot.lane.b32.xlu0 %v9314_v5, %s7728_s16  ;;  %v7681_v12 = vld [vmem:[#allocation4 + $0x68] ss:$12 sps:$4 sm:$0xff]  }
 0x390   : > { %4381 = vrot.lane.b32.xlu1 %v9304_v0, %s7727_s11 }
 0x391   : > { %v3915_v58 = vpop.permute.xlu0 %3914 }
 0x392   : > { %v4623_v34 = vpop.permute.xlu1 %4622  ;;  %3997 = vst.msk [vmem:[#allocation4 + $0xa8] sm:$0xf] %vm3982_vm4, %v3915_v58 }
 0x393   : > { %4703 = vst.msk [vmem:[#allocation4 + $0xb8] sm:$0xf] %vm3725_vm3, %v4623_v34  ;;  %4636 = vrot.lane.b32.xlu0 %v7290_v51, %s7728_s16 }
 0x394   : > { %3675 = vrot.lane.b32.xlu1 %v9316_v49, %s7728_s16 }
 0x395   : > { %v4877_v24 = vpop.permute.xlu0 %4876 }
 0x396   : > { %v3917_v40 = vpop.permute.xlu1 %3916  ;;  %4958 = vst.msk [vmem:[#allocation4 + $0xac] sm:$0xf] %vm3982_vm4, %v4877_v24  ;;  %v7684_v24 = vld [vmem:[#allocation4 + $0x80] ss:$12 sps:$4 sm:$0xff]  }
 0x397   : > { %3998 = vst.msk [vmem:[#allocation4 + $0xb4] sm:$0xf] %vm3982_vm4, %v3917_v40  ;;  %3930 = vrot.lane.b32.xlu0 %v7288_v1, %s7729_s28 }
 0x398   : > { %4638 = vrot.lane.b32.xlu1 %v7291_v35, %s7728_s16 }
 0x399   : > { %v3373_v61 = vpop.permute.xlu0 %3372 }
 0x39a   : > { %v4879_v5 = vpop.permute.xlu1 %4878  ;;  %3469 = vst.msk [vmem:[#allocation4] sm:$0xf] %vm3468_vm2, %v3373_v61  ;;  %v4492_v61 = vld [vmem:[#allocation3 + $0x180] sm:$0xff] }
 0x39b   : > { %4959 = vst.msk [vmem:[#allocation4 + $0xb8] sm:$0xf] %vm3982_vm4, %v4879_v5  ;;  %4892 = vrot.lane.b32.xlu0 %v9388_v43, %s7729_s28 }
 0x39c   : > { %3932 = vrot.lane.b32.xlu1 %v7289_v63, %s7729_s28 }
 0x39d   : > { %v4336_v22 = vpop.permute.xlu0 %4335  ;;  %v5196_v59 = vld [vmem:[#allocation4 + $0xa8] sm:$0xff] }
 0x39e   : > { %v3375_v49 = vpop.permute.xlu1 %3374  ;;  %4431 = vst.msk [vmem:[#allocation4 + $0x4] sm:$0xf] %vm3468_vm2, %v4336_v22  ;;  %v9696_v22 = vpack.c.bf16 %v4492_v61, %v4492_v61 }
 0x39f   : > { %3470 = vst.msk [vmem:[#allocation4 + $0xc] sm:$0xf] %vm3468_vm2, %v3375_v49  ;;  %3420 = vrot.lane.b32.xlu0 %v7320_v48, %s7727_s11 }
 0x3a0   : > { %4894 = vrot.lane.b32.xlu1 %v9424_v3, %s7729_s28 }
 0x3a1   : > { %v3630_v15 = vpop.permute.xlu0 %3629 }
 0x3a2   : > { %v4338_v20 = vpop.permute.xlu1 %4337  ;;  %v5198_v57 = vld [vmem:[#allocation4 + $0xb4] sm:$0xff]  ;;  %3726 = vst.msk [vmem:[#allocation4] sm:$0xf] %vm3725_vm3, %v3630_v15  ;;  %v7686_v15 = vld [vmem:[#allocation4 + $0xb0] ss:$12 sps:$4 sm:$0xff]  }
 0x3a3   : > { %v7670_v26 = vld [vmem:[#allocation4 + $0xac] ss:$12 sps:$4 sm:$0xff]   ;;  %4432 = vst.msk [vmem:[#allocation4 + $0x10] sm:$0xf] %vm3468_vm2, %v4338_v20  ;;  %v6723_v36 = vcombine.low %v5196_v59, %v5198_v57  ;;  %4383 = vrot.lane.b32.xlu0 %v9416_v56, %s7727_s11  ;;  %v7687_v59 = vld [vmem:[#allocation4 + $0xc8] ss:$12 sps:$4 sm:$0xff]  }
 0x3a4   : > { %3422 = vrot.lane.b32.xlu1 %v7321_v31, %s7727_s11  ;;  %5759 = vmatprep.mubr.bf16.mxu1 %v7670_v26  ;;  %v4493_v20 = vld [vmem:[#allocation3 + $0x188] sm:$0xff] }
 0x3a5   : > { %v4593_v52 = vpop.permute.xlu0 %4592  ;;  %5760 = vmatmul.mubr.bf16.gmra.mxu1 %v6723_v36  ;;  %v9705_v26 = vpack.c.bf16 %v4493_v20, %v4493_v20  ;;  %v5006_v36 = vld [vmem:[#allocation3 + $0x19a] sm:$0xff] }
 0x3a6   : > { %v3632_v11 = vpop.permute.xlu1 %3631  ;;  %4688 = vst.msk [vmem:[#allocation4 + $0x4] sm:$0xf] %vm3725_vm3, %v4593_v52 }
 0x3a7   : > { %3727 = vst.msk [vmem:[#allocation4 + $0xc] sm:$0xf] %vm3725_vm3, %v3632_v11  ;;  %3677 = vrot.lane.b32.xlu0 %v9302_v4, %s7728_s16  ;;  %v5007_v11 = vld [vmem:[#allocation3 + $0x1a2] sm:$0xff] }
 0x3a8   : > { %4385 = vrot.lane.b32.xlu1 %v9418_v13, %s7727_s11  ;;  %v7363_v52 = vpack.c.bf16 %v5007_v11, %v5007_v11 }
 0x3a9   : > { %v3887_v2 = vpop.permute.xlu0 %3886 }
 0x3aa   : > { %v4595_v1 = vpop.permute.xlu1 %4594  ;;  %3983 = vst.msk [vmem:[#allocation4] sm:$0xf] %vm3982_vm4, %v3887_v2  ;;  %v7688_v2 = vld [vmem:[#allocation4 + $0xe0] ss:$12 sps:$4 sm:$0xff]  }
 0x3ab   : > { %4689 = vst.msk [vmem:[#allocation4 + $0x10] sm:$0xf] %vm3725_vm3, %v4595_v1  ;;  %4640 = vrot.lane.b32.xlu0 %v7292_v41, %s7728_s16 }
 0x3ac   : > { %3679 = vrot.lane.b32.xlu1 %v9304_v0, %s7728_s16  ;;  %5167 = vst.msk [vmem:[#allocation4 + $0x17c] sm:$0xf] %vm3211_vm15, %v7363_v52 }
 0x3ad   : > { %v4849_v63 = vpop.permute.xlu0 %4848 }
 0x3ae   : > { %v3889_v54 = vpop.permute.xlu1 %3888  ;;  %4944 = vst.msk [vmem:[#allocation4 + $0x4] sm:$0xf] %vm3982_vm4, %v4849_v63 }
 0x3af   : > { %3984 = vst.msk [vmem:[#allocation4 + $0xc] sm:$0xf] %vm3982_vm4, %v3889_v54  ;;  %3934 = vrot.lane.b32.xlu0 %v7290_v51, %s7729_s28 }
 0x3b0   : > { %4642 = vrot.lane.b32.xlu1 %v9403_v60, %s7728_s16 }
 0x3b1   : > { %v3405_v42 = vpop.permute.xlu0 %3404 }
 0x3b2   : > { %v4851_v4 = vpop.permute.xlu1 %4850  ;;  %3485 = vst.msk [vmem:[#allocation4 + $0xc0] sm:$0xf] %vm3468_vm2, %v3405_v42 }
 0x3b3   : > { %4945 = vst.msk [vmem:[#allocation4 + $0x10] sm:$0xf] %vm3982_vm4, %v4851_v4  ;;  %4896 = vrot.lane.b32.xlu0 %v9384_v45, %s7729_s28 }
 0x3b4   : > { %3936 = vrot.lane.b32.xlu1 %v7291_v35, %s7729_s28  ;;  %v7685_v35 = vld [vmem:[#allocation4 + $0x98] ss:$12 sps:$4 sm:$0xff]  }
 0x3b5   : > { %v4368_v21 = vpop.permute.xlu0 %4367 }
 0x3b6   : > { %v3407_v0 = vpop.permute.xlu1 %3406  ;;  %4447 = vst.msk [vmem:[#allocation4 + $0xc4] sm:$0xf] %vm3468_vm2, %v4368_v21  ;;  %v7672_v7 = vld [vmem:[#allocation4] ss:$12 sps:$4 sm:$0xff]   ;;  %v7693_v21 = vld [vmem:[#allocation4 + $0x128] ss:$12 sps:$4 sm:$0xff]  }
 0x3b7   : > { %3486 = vst.msk [vmem:[#allocation4 + $0xcc] sm:$0xf] %vm3468_vm2, %v3407_v0  ;;  %3424 = vrot.lane.b32.xlu0 %v9388_v43, %s7727_s11  ;;  %v7677_v43 = vld [vmem:[%s9996_s3 + $0x80] sm:$0xff]  }
 0x3b8   : > { %4898 = vrot.lane.b32.xlu1 %v9408_v9, %s7729_s28 }
 0x3b9   : > { %v3662_v48 = vpop.permute.xlu0 %3661 }
 0x3ba   : > { %v4370_v47 = vpop.permute.xlu1 %4369  ;;  %v7674_v32 = vld [vmem:[#allocation4 + $0x4] ss:$12 sps:$4 sm:$0xff]   ;;  %3742 = vst.msk [vmem:[#allocation4 + $0xc0] sm:$0xf] %vm3725_vm3, %v3662_v48 }
 0x3bb   : > { %4448 = vst.msk [vmem:[#allocation4 + $0xd0] sm:$0xf] %vm3468_vm2, %v4370_v47  ;;  %4387 = vrot.lane.b32.xlu0 %v9399_v50, %s7727_s11  ;;  %5703 = vmatprep.mubr.bf16.mxu0 %v7674_v32 }
 0x3bc   : > { %3426 = vrot.lane.b32.xlu1 %v9424_v3, %s7727_s11  ;;  %5704 = vmatmul.mubr.bf16.vlgmr.msra.gmra.mxu0 %v7672_v7 }
 0x3bd   : > { %v4625_v28 = vpop.permute.xlu0 %4624  ;;  %7552 = vmatpush3.bf16.msra.mxu0 %v9357_v44  ;;  %7555 = vmatprep.mubr.msk.bf16.mxu0 %vm2972_vm6, %v7676_v62  ;;  %v7678_v44 = vld [vmem:[#allocation4 + $0x20] ss:$12 sps:$4 sm:$0xff]  }
 0x3be   : > { %v3664_v31 = vpop.permute.xlu1 %3663  ;;  %4704 = vst.msk [vmem:[#allocation4 + $0xc4] sm:$0xf] %vm3725_vm3, %v4625_v28  ;;  %7553 = vmatprep.subr.bf16.mxu0 %v7677_v43  ;;  %v7694_v62 = vld [vmem:[#allocation4 + $0x140] ss:$12 sps:$4 sm:$0xff]  }
 0x3bf   : > { %3743 = vst.msk [vmem:[#allocation4 + $0xcc] sm:$0xf] %vm3725_vm3, %v3664_v31  ;;  %3681 = vrot.lane.b32.xlu0 %v9416_v56, %s7728_s16  ;;  %v7695_v31 = vld [vmem:[#allocation4 + $0x158] ss:$12 sps:$4 sm:$0xff]  }
 0x3c0   : > { %4389 = vrot.lane.b32.xlu1 %v9401_v39, %s7727_s11 }
 0x3c1   : > { %v3919_v46 = vpop.permute.xlu0 %3918  ;;  %7554 = vmatpush3.bf16.msra.mxu0 %v7677_v43 }
 0x3c2   : > { %v4627_v3 = vpop.permute.xlu1 %4626  ;;  %3999 = vst.msk [vmem:[#allocation4 + $0xc0] sm:$0xf] %vm3982_vm4, %v3919_v46 }
 0x3c3   : > { %4705 = vst.msk [vmem:[#allocation4 + $0xd0] sm:$0xf] %vm3725_vm3, %v4627_v3  ;;  %4644 = vrot.lane.b32.xlu0 %v9505_v19, %s7728_s16  ;;  %v4751_v3 = vld [vmem:[#allocation3 + $0x1a1] sm:$0xff] }
 0x3c4   : > { %3683 = vrot.lane.b32.xlu1 %v9418_v13, %s7728_s16  ;;  %7556 = vmatmul.mubr.msk.bf16.vlgmr.msra.gmra.mxu0 %vm2972_vm6, %v7678_v44 }
 0x3c5   : > { %v4881_v56 = vpop.permute.xlu0 %4880  ;;  %7559 = vmatprep.mubr.msk.bf16.mxu0 %vm2972_vm6, %v7679_v8 }
 0x3c6   : > { %v3921_v16 = vpop.permute.xlu1 %3920  ;;  %4960 = vst.msk [vmem:[#allocation4 + $0xc4] sm:$0xf] %vm3982_vm4, %v4881_v56 }
 0x3c7   : > { %4000 = vst.msk [vmem:[#allocation4 + $0xcc] sm:$0xf] %vm3982_vm4, %v3921_v16  ;;  %3938 = vrot.lane.b32.xlu0 %v7292_v41, %s7729_s28  ;;  %v7331_v16 = vpack.c.bf16 %v4751_v3, %v4751_v3 }
 0x3c8   : > { %4646 = vrot.lane.b32.xlu1 %v9535_v23, %s7728_s16 }
 0x3c9   : > { %v3409_v38 = vpop.permute.xlu0 %3408 }
 0x3ca   : > { %v4883_v13 = vpop.permute.xlu1 %4882  ;;  %3487 = vst.msk [vmem:[#allocation4 + $0xd8] sm:$0xf] %vm3468_vm2, %v3409_v38 }
 0x3cb   : > { %4961 = vst.msk [vmem:[#allocation4 + $0xd0] sm:$0xf] %vm3982_vm4, %v4883_v13  ;;  %4900 = vrot.lane.b32.xlu0 %v9507_v14, %s7729_s28 }
 0x3cc   : > { %3940 = vrot.lane.b32.xlu1 %v9403_v60, %s7729_s28  ;;  %7560 = vmatmul.mubr.msk.bf16.gmra.mxu0 %vm2972_vm6, %v7680_v29 }
 0x3cd   : > { %v4372_v17 = vpop.permute.xlu0 %4371  ;;  %7563 = vmatprep.mubr.msk.bf16.mxu0 %vm2972_vm6, %v7681_v12  ;;  %v5200_v58 = vld [vmem:[#allocation4 + $0xc0] sm:$0xff] }
 0x3ce   : > { %v3411_v10 = vpop.permute.xlu1 %3410  ;;  %4449 = vst.msk [vmem:[#allocation4 + $0xdc] sm:$0xf] %vm3468_vm2, %v4372_v17 }
 0x3cf   : > { %3488 = vst.msk [vmem:[#allocation4 + $0xe4] sm:$0xf] %vm3468_vm2, %v3411_v10  ;;  %3428 = vrot.lane.b32.xlu0 %v9384_v45, %s7727_s11 }
 0x3d0   : > { %4902 = vrot.lane.b32.xlu1 %v9539_v25, %s7729_s28 }
 0x3d1   : > { %v3666_v34 = vpop.permute.xlu0 %3665 }
 0x3d2   : > { %v4374_v60 = vpop.permute.xlu1 %4373  ;;  %v5202_v51 = vld [vmem:[#allocation4 + $0xcc] sm:$0xff]  ;;  %3744 = vst.msk [vmem:[#allocation4 + $0xd8] sm:$0xf] %vm3725_vm3, %v3666_v34 }
 0x3d3   : > { %v7682_v6 = vld [vmem:[#allocation4 + $0xc4] ss:$12 sps:$4 sm:$0xff]   ;;  %4450 = vst.msk [vmem:[#allocation4 + $0xe8] sm:$0xf] %vm3468_vm2, %v4374_v60  ;;  %v6726_v40 = vcombine.low %v5200_v58, %v5202_v51  ;;  %4391 = vrot.lane.b32.xlu0 %v9531_v30, %s7727_s11 }
 0x3d4   : > { %3430 = vrot.lane.b32.xlu1 %v9408_v9, %s7727_s11  ;;  %5767 = vmatprep.mubr.bf16.mxu1 %v7682_v6 }
 0x3d5   : > { %7564 = vmatmul.mubr.msk.bf16.gmra.mxu0 %vm2972_vm6, %v7684_v24  ;;  %v4629_v5 = vpop.permute.xlu0 %4628  ;;  %5768 = vmatmul.mubr.bf16.gmra.mxu1 %v6726_v40 }
 0x3d6   : > { %v3668_v45 = vpop.permute.xlu1 %3667  ;;  %4706 = vst.msk [vmem:[#allocation4 + $0xdc] sm:$0xf] %vm3725_vm3, %v4629_v5  ;;  %7567 = vmatprep.mubr.msk.bf16.mxu0 %vm2972_vm6, %v7685_v35 }
 0x3d7   : > { %3745 = vst.msk [vmem:[#allocation4 + $0xe4] sm:$0xf] %vm3725_vm3, %v3668_v45  ;;  %3685 = vrot.lane.b32.xlu0 %v9399_v50, %s7728_s16 }
 0x3d8   : > { %4393 = vrot.lane.b32.xlu1 %v9533_v33, %s7727_s11 }
 0x3d9   : > { %v3923_v49 = vpop.permute.xlu0 %3922 }
 0x3da   : > { %v4631_v9 = vpop.permute.xlu1 %4630  ;;  %4001 = vst.msk [vmem:[#allocation4 + $0xd8] sm:$0xf] %vm3982_vm4, %v3923_v49 }
 0x3db   : > { %4707 = vst.msk [vmem:[#allocation4 + $0xe8] sm:$0xf] %vm3725_vm3, %v4631_v9  ;;  %4648 = vrot.lane.b32.xlu0 %v9696_v22, %s7728_s16 }
 0x3dc   : > { %3687 = vrot.lane.b32.xlu1 %v9401_v39, %s7728_s16  ;;  %v7362_v39 = vpack.c.bf16 %v5006_v36, %v5006_v36 }
 0x3dd   : > { %7568 = vmatmul.mubr.msk.bf16.gmra.mxu0 %vm2972_vm6, %v7686_v15  ;;  %v4885_v50 = vpop.permute.xlu0 %4884 }
 0x3de   : > { %v3925_v57 = vpop.permute.xlu1 %3924  ;;  %4962 = vst.msk [vmem:[#allocation4 + $0xdc] sm:$0xf] %vm3982_vm4, %v4885_v50  ;;  %7571 = vmatprep.mubr.msk.bf16.mxu0 %vm2972_vm6, %v7687_v59 }
 0x3df   : > { %4002 = vst.msk [vmem:[#allocation4 + $0xe4] sm:$0xf] %vm3982_vm4, %v3925_v57  ;;  %3942 = vrot.lane.b32.xlu0 %v9505_v19, %s7729_s28  ;;  %v7689_v19 = vld [vmem:[#allocation4 + $0xf8] ss:$12 sps:$4 sm:$0xff]  }
 0x3e0   : > { %4650 = vrot.lane.b32.xlu1 %v9705_v26, %s7728_s16  ;;  %5166 = vst.msk [vmem:[#allocation4 + $0x170] sm:$0xf] %vm3211_vm15, %v7362_v39 }
 0x3e1   : > { %v3413_v1 = vpop.permute.xlu0 %3412 }
 0x3e2   : > { %v4887_v55 = vpop.permute.xlu1 %4886  ;;  %3489 = vst.msk [vmem:[#allocation4 + $0xf0] sm:$0xf] %vm3468_vm2, %v3413_v1 }
 0x3e3   : > { %4963 = vst.msk [vmem:[#allocation4 + $0xe8] sm:$0xf] %vm3982_vm4, %v4887_v55  ;;  %4904 = vrot.lane.b32.xlu0 %v9503_v37, %s7729_s28 }
 0x3e4   : > { %3944 = vrot.lane.b32.xlu1 %v9535_v23, %s7729_s28 }
 0x3e5   : > { %7572 = vmatmul.mubr.msk.bf16.gmra.mxu0 %vm2972_vm6, %v7688_v2  ;;  %v4376_v54 = vpop.permute.xlu0 %4375  ;;  %v5204_v63 = vld [vmem:[#allocation4 + $0xd8] sm:$0xff] }
 0x3e6   : > { %v3415_v41 = vpop.permute.xlu1 %3414  ;;  %4451 = vst.msk [vmem:[#allocation4 + $0xf4] sm:$0xf] %vm3468_vm2, %v4376_v54  ;;  %7575 = vmatprep.mubr.msk.bf16.mxu0 %vm2972_vm6, %v7689_v19 }
 0x3e7   : > { %3490 = vst.msk [vmem:[#allocation4 + $0xfc] sm:$0xf] %vm3468_vm2, %v3415_v41  ;;  %3432 = vrot.lane.b32.xlu0 %v9507_v14, %s7727_s11  ;;  %v4494_v14 = vld [vmem:[#allocation3 + $0x198] sm:$0xff]  ;;  %v7706_v8 = vld [vmem:[#allocation4 + $0x170] ss:$12 sps:$4 sm:$0xff]  }
 0x3e8   : > { %4906 = vrot.lane.b32.xlu1 %v9525_v27, %s7729_s28  ;;  %v7692_v27 = vld [vmem:[#allocation4 + $0x110] ss:$12 sps:$4 sm:$0xff]  }
 0x3e9   : > { %v3670_v37 = vpop.permute.xlu0 %3669 }
 0x3ea   : > { %v4378_v23 = vpop.permute.xlu1 %4377  ;;  %v5206_v4 = vld [vmem:[#allocation4 + $0xe4] sm:$0xff]  ;;  %3746 = vst.msk [vmem:[#allocation4 + $0xf0] sm:$0xf] %vm3725_vm3, %v3670_v37 }
 0x3eb   : > { %v7690_v42 = vld [vmem:[#allocation4 + $0xdc] ss:$12 sps:$4 sm:$0xff]   ;;  %4452 = vst.msk [vmem:[#allocation4 + $0x100] sm:$0xf] %vm3468_vm2, %v4378_v23  ;;  %v6729_v0 = vcombine.low %v5204_v63, %v5206_v4  ;;  %4395 = vrot.lane.b32.xlu0 %v9517_v18, %s7727_s11  ;;  %v7298_v18 = vpack.c.bf16 %v4494_v14, %v4494_v14  ;;  %v9791_v4 = vpop.f32.mrf.mxu1 }
 0x3ec   : > { %3434 = vrot.lane.b32.xlu1 %v9539_v25, %s7727_s11  ;;  %5775 = vmatprep.mubr.bf16.mxu1 %v7690_v42  ;;  %v4495_v25 = vld [vmem:[#allocation3 + $0x1a0] sm:$0xff] }
 0x3ed   : > { %7576 = vmatmul.mubr.msk.bf16.gmra.mxu0 %vm2972_vm6, %v7692_v27  ;;  %v4633_v48 = vpop.permute.xlu0 %4632  ;;  %5776 = vmatmul.mubr.bf16.gmra.mxu1 %v6729_v0  ;;  %v7299_v43 = vpack.c.bf16 %v4495_v25, %v4495_v25  ;;  %v9795_v27 = vpop.f32.mrf.mxu1 }
 0x3ee   : > { %v3672_v47 = vpop.permute.xlu1 %3671  ;;  %4708 = vst.msk [vmem:[#allocation4 + $0xf4] sm:$0xf] %vm3725_vm3, %v4633_v48  ;;  %7579 = vmatprep.mubr.msk.bf16.mxu0 %vm2972_vm6, %v7693_v21 }
 0x3ef   : > { %3747 = vst.msk [vmem:[#allocation4 + $0xfc] sm:$0xf] %vm3725_vm3, %v3672_v47  ;;  %3689 = vrot.lane.b32.xlu0 %v9531_v30, %s7728_s16  ;;  %v9799_v47 = vpop.f32.mrf.mxu1 }
 0x3f0   : > { %4397 = vrot.lane.b32.xlu1 %v9519_v53, %s7727_s11  ;;  %v4750_v53 = vld [vmem:[#allocation3 + $0x199] sm:$0xff] }
 0x3f1   : > { %v3927_v32 = vpop.permute.xlu0 %3926  ;;  %v9803_v25 = vpop.f32.mrf.mxu1 }
 0x3f2   : > { %v4635_v7 = vpop.permute.xlu1 %4634  ;;  %4003 = vst.msk [vmem:[#allocation4 + $0xf0] sm:$0xf] %vm3982_vm4, %v3927_v32 }
 0x3f3   : > { %4709 = vst.msk [vmem:[#allocation4 + $0x100] sm:$0xf] %vm3725_vm3, %v4635_v7  ;;  %4652 = vrot.lane.b32.xlu0 %v7298_v18, %s7728_s16 }
 0x3f4   : > { %3691 = vrot.lane.b32.xlu1 %v9533_v33, %s7728_s16  ;;  %v7330_v33 = vpack.c.bf16 %v4750_v53, %v4750_v53 }
 0x3f5   : > { %7580 = vmatmul.mubr.msk.bf16.gmra.mxu0 %vm2972_vm6, %v7694_v62  ;;  %v4889_v30 = vpop.permute.xlu0 %4888  ;;  %v9805_v62 = vpop.f32.mrf.mxu1 }
 0x3f6   : > { %v3929_v28 = vpop.permute.xlu1 %3928  ;;  %4964 = vst.msk [vmem:[#allocation4 + $0xf4] sm:$0xf] %vm3982_vm4, %v4889_v30  ;;  %7583 = vmatprep.mubr.msk.bf16.mxu0 %vm2972_vm6, %v7695_v31 }
 0x3f7   : > { %4004 = vst.msk [vmem:[#allocation4 + $0xfc] sm:$0xf] %vm3982_vm4, %v3929_v28  ;;  %3946 = vrot.lane.b32.xlu0 %v9696_v22, %s7729_s28  ;;  %v9809_v53 = vpop.f32.mrf.mxu1 }
 0x3f8   : > { %4654 = vrot.lane.b32.xlu1 %v7299_v43, %s7728_s16 }
 0x3f9   : > { %v3417_v44 = vpop.permute.xlu0 %3416 }
 0x3fa   : > { %v4891_v46 = vpop.permute.xlu1 %4890  ;;  %3491 = vst.msk [vmem:[#allocation4 + $0x108] sm:$0xf] %vm3468_vm2, %v3417_v44  ;;  %v9813_v44 = vpop.f32.mrf.mxu1 }
 0x3fb   : > { %4965 = vst.msk [vmem:[#allocation4 + $0x100] sm:$0xf] %vm3982_vm4, %v4891_v46  ;;  %4908 = vrot.lane.b32.xlu0 %v7330_v33, %s7729_s28 }
 0x3fc   : > { %3948 = vrot.lane.b32.xlu1 %v9705_v26, %s7729_s28 }
 0x3fd   : > { %v4380_v13 = vpop.permute.xlu0 %4379  ;;  %7584 = vmatmul.mubr.msk.bf16.gmra.mxu0 %vm2972_vm6, %v7706_v8  ;;  %v5208_v12 = vld [vmem:[#allocation4 + $0xf0] sm:$0xff] }
 0x3fe   : > { %v3419_v56 = vpop.permute.xlu1 %3418  ;;  %4453 = vst.msk [vmem:[#allocation4 + $0x10c] sm:$0xf] %vm3468_vm2, %v4380_v13  ;;  %v9817_v13 = vpop.f32.mrf.mxu1 }
 0x3ff   : > { %3492 = vst.msk [vmem:[#allocation4 + $0x114] sm:$0xf] %vm3468_vm2, %v3419_v56 }
 0x400   : > { %4910 = vrot.lane.b32.xlu1 %v7331_v16, %s7729_s28 }
 0x401   : > { %v3674_v29 = vpop.permute.xlu0 %3673 }
 0x402   : > { %v4382_v38 = vpop.permute.xlu1 %4381  ;;  %v5210_v10 = vld [vmem:[#allocation4 + $0xfc] sm:$0xff]  ;;  %3748 = vst.msk [vmem:[#allocation4 + $0x108] sm:$0xf] %vm3725_vm3, %v3674_v29 }
 0x403   : > { %v7696_v17 = vld [vmem:[#allocation4 + $0xf4] ss:$12 sps:$4 sm:$0xff]   ;;  %4454 = vst.msk [vmem:[#allocation4 + $0x118] sm:$0xf] %vm3468_vm2, %v4382_v38  ;;  %v6732_v60 = vcombine.low %v5208_v12, %v5210_v10 }
 0x404   : > { %5783 = vmatprep.mubr.bf16.mxu1 %v7696_v17 }
 0x405   : > { %5784 = vmatmul.mubr.bf16.gmra.mxu1 %v6732_v60  ;;  %v4637_v58 = vpop.permute.xlu0 %4636  ;;  %v9821_v38 = vpop.f32.mrf.mxu1 }
 0x406   : > { %v3676_v34 = vpop.permute.xlu1 %3675  ;;  %4710 = vst.msk [vmem:[#allocation4 + $0x10c] sm:$0xf] %vm3725_vm3, %v4637_v58 }
 0x407   : > { %3749 = vst.msk [vmem:[#allocation4 + $0x114] sm:$0xf] %vm3725_vm3, %v3676_v34  ;;  %v9825_v10 = vpop.f32.mrf.mxu1 }
 0x409   : > { %v3931_v6 = vpop.permute.xlu0 %3930  ;;  %v9829_v34 = vpop.f32.mrf.mxu1 }
 0x40a   : > { %v4639_v51 = vpop.permute.xlu1 %4638  ;;  %4005 = vst.msk [vmem:[#allocation4 + $0x108] sm:$0xf] %vm3982_vm4, %v3931_v6 }
 0x40b   : > { %4711 = vst.msk [vmem:[#allocation4 + $0x118] sm:$0xf] %vm3725_vm3, %v4639_v51  ;;  %v9833_v6 = vpop.f32.mrf.mxu1 }
 0x40d   : > { %v4893_v24 = vpop.permute.xlu0 %4892 }
 0x40e   : > { %v3933_v40 = vpop.permute.xlu1 %3932  ;;  %4966 = vst.msk [vmem:[#allocation4 + $0x10c] sm:$0xf] %vm3982_vm4, %v4893_v24 }
 0x40f   : > { %4006 = vst.msk [vmem:[#allocation4 + $0x114] sm:$0xf] %vm3982_vm4, %v3933_v40 }
 0x411   : > { %v3421_v45 = vpop.permute.xlu0 %3420 }
 0x412   : > { %v4895_v35 = vpop.permute.xlu1 %4894  ;;  %3493 = vst.msk [vmem:[#allocation4 + $0x120] sm:$0xf] %vm3468_vm2, %v3421_v45 }
 0x413   : > { %4967 = vst.msk [vmem:[#allocation4 + $0x118] sm:$0xf] %vm3982_vm4, %v4895_v35 }
 0x415   : > { %v4384_v61 = vpop.permute.xlu0 %4383  ;;  %v5212_v22 = vld [vmem:[#allocation4 + $0x108] sm:$0xff] }
 0x416   : > { %v3423_v5 = vpop.permute.xlu1 %3422  ;;  %4455 = vst.msk [vmem:[#allocation4 + $0x124] sm:$0xf] %vm3468_vm2, %v4384_v61 }
 0x417   : > { %3494 = vst.msk [vmem:[#allocation4 + $0x12c] sm:$0xf] %vm3468_vm2, %v3423_v5 }
 0x419   : > { %v3678_v49 = vpop.permute.xlu0 %3677 }
 0x41a   : > { %v4386_v9 = vpop.permute.xlu1 %4385  ;;  %v5214_v20 = vld [vmem:[#allocation4 + $0x114] sm:$0xff]  ;;  %3750 = vst.msk [vmem:[#allocation4 + $0x120] sm:$0xf] %vm3725_vm3, %v3678_v49 }
 0x41b   : > { %v7698_v15 = vld [vmem:[#allocation4 + $0x10c] ss:$12 sps:$4 sm:$0xff]   ;;  %4456 = vst.msk [vmem:[#allocation4 + $0x130] sm:$0xf] %vm3468_vm2, %v4386_v9  ;;  %v6735_v59 = vcombine.low %v5212_v22, %v5214_v20 }
 0x41c   : > { %5791 = vmatprep.mubr.bf16.mxu1 %v7698_v15 }
 0x41d   : > { %5792 = vmatmul.mubr.bf16.gmra.mxu1 %v6735_v59  ;;  %v4641_v50 = vpop.permute.xlu0 %4640 }
 0x41e   : > { %v3680_v57 = vpop.permute.xlu1 %3679  ;;  %4712 = vst.msk [vmem:[#allocation4 + $0x124] sm:$0xf] %vm3725_vm3, %v4641_v50  ;;  %v9835_v35 = vpop.f32.mrf.mxu1 }
 0x41f   : > { %3751 = vst.msk [vmem:[#allocation4 + $0x12c] sm:$0xf] %vm3725_vm3, %v3680_v57 }
 0x420   : > { %v9839_v22 = vpop.f32.mrf.mxu1 }
 0x421   : > { %v3935_v36 = vpop.permute.xlu0 %3934 }
 0x422   : > { %v4643_v26 = vpop.permute.xlu1 %4642  ;;  %4007 = vst.msk [vmem:[#allocation4 + $0x120] sm:$0xf] %vm3982_vm4, %v3935_v36  ;;  %v9843_v57 = vpop.f32.mrf.mxu1 }
 0x423   : > { %4713 = vst.msk [vmem:[#allocation4 + $0x130] sm:$0xf] %vm3725_vm3, %v4643_v26 }
 0x424   : > { %v9847_v36 = vpop.f32.mrf.mxu1 }
 0x425   : > { %v4897_v39 = vpop.permute.xlu0 %4896 }
 0x426   : > { %v3937_v11 = vpop.permute.xlu1 %3936  ;;  %4968 = vst.msk [vmem:[#allocation4 + $0x124] sm:$0xf] %vm3982_vm4, %v4897_v39 }
 0x427   : > { %4008 = vst.msk [vmem:[#allocation4 + $0x12c] sm:$0xf] %vm3982_vm4, %v3937_v11 }
 0x429   : > { %v3425_v55 = vpop.permute.xlu0 %3424 }
 0x42a   : > { %v4899_v52 = vpop.permute.xlu1 %4898  ;;  %3495 = vst.msk [vmem:[#allocation4 + $0x138] sm:$0xf] %vm3468_vm2, %v3425_v55 }
 0x42b   : > { %4969 = vst.msk [vmem:[#allocation4 + $0x130] sm:$0xf] %vm3982_vm4, %v4899_v52 }
 0x42d   : > { %v4388_v2 = vpop.permute.xlu0 %4387  ;;  %v5216_v54 = vld [vmem:[#allocation4 + $0x120] sm:$0xff] }
 0x42e   : > { %v3427_v1 = vpop.permute.xlu1 %3426  ;;  %4457 = vst.msk [vmem:[#allocation4 + $0x13c] sm:$0xf] %vm3468_vm2, %v4388_v2 }
 0x42f   : > { %3496 = vst.msk [vmem:[#allocation4 + $0x144] sm:$0xf] %vm3468_vm2, %v3427_v1 }
 0x431   : > { %v3682_v41 = vpop.permute.xlu0 %3681 }
 0x432   : > { %v4390_v19 = vpop.permute.xlu1 %4389  ;;  %v5218_v23 = vld [vmem:[#allocation4 + $0x12c] sm:$0xff]  ;;  %3752 = vst.msk [vmem:[#allocation4 + $0x138] sm:$0xf] %vm3725_vm3, %v3682_v41 }
 0x433   : > { %v7700_v37 = vld [vmem:[#allocation4 + $0x124] ss:$12 sps:$4 sm:$0xff]   ;;  %4458 = vst.msk [vmem:[#allocation4 + $0x148] sm:$0xf] %vm3468_vm2, %v4390_v19  ;;  %v6738_v63 = vcombine.low %v5216_v54, %v5218_v23 }
 0x434   : > { %5799 = vmatprep.mubr.bf16.mxu1 %v7700_v37 }
 0x435   : > { %5800 = vmatmul.mubr.bf16.gmra.mxu1 %v6738_v63  ;;  %v4645_v0 = vpop.permute.xlu0 %4644  ;;  %v7429_v11 = vpop.f32.mrf.mxu1 }
 0x436   : > { %v3684_v42 = vpop.permute.xlu1 %3683  ;;  %4714 = vst.msk [vmem:[#allocation4 + $0x13c] sm:$0xf] %vm3725_vm3, %v4645_v0  ;;  %v7407_v0 = vadd.f32 %v9795_v27, %v9791_v4 }
 0x437   : > { %3753 = vst.msk [vmem:[#allocation4 + $0x144] sm:$0xf] %vm3725_vm3, %v3684_v42  ;;  %v7430_v55 = vpop.f32.mrf.mxu1 }
 0x439   : > { %v3939_v14 = vpop.permute.xlu0 %3938  ;;  %v7432_v2 = vpop.f32.mrf.mxu1 }
 0x43a   : > { %v4647_v21 = vpop.permute.xlu1 %4646  ;;  %4009 = vst.msk [vmem:[#allocation4 + $0x138] sm:$0xf] %vm3982_vm4, %v3939_v14  ;;  %v9863_v14 = vld [vmem:[%s9997_s4] ss:$0 sm:$0xff] }
 0x43b   : > { %4715 = vst.msk [vmem:[#allocation4 + $0x148] sm:$0xf] %vm3725_vm3, %v4647_v21  ;;  %v7433_v19 = vpop.f32.mrf.mxu1 }
 0x43d   : > { %v4901_v18 = vpop.permute.xlu0 %4900 }
 0x43e   : > { %v3941_v48 = vpop.permute.xlu1 %3940  ;;  %4970 = vst.msk [vmem:[#allocation4 + $0x13c] sm:$0xf] %vm3982_vm4, %v4901_v18 }
 0x43f   : > { %4010 = vst.msk [vmem:[#allocation4 + $0x144] sm:$0xf] %vm3982_vm4, %v3941_v48 }
 0x441   : > { %v3429_v32 = vpop.permute.xlu0 %3428 }
 0x442   : > { %v4903_v7 = vpop.permute.xlu1 %4902  ;;  %3497 = vst.msk [vmem:[#allocation4 + $0x150] sm:$0xf] %vm3468_vm2, %v3429_v32  ;;  %v7410_v32 = vadd.f32 %v9803_v25, %v9799_v47  ;;  %v7419_v47 = vadd.f32 %v9825_v10, %v9821_v38  ;;  %v7422_v38 = vadd.f32 %v9833_v6, %v9829_v34 }
 0x443   : > { %4971 = vst.msk [vmem:[#allocation4 + $0x148] sm:$0xf] %vm3982_vm4, %v4903_v7 }
 0x444   : > { %v5733_v6 = vadd.f32 %v7422_v38, %v9863_v14 }
 0x445   : > { %v4392_v31 = vpop.permute.xlu0 %4391  ;;  %v5220_v33 = vld [vmem:[#allocation4 + $0x138] sm:$0xff] }
 0x446   : > { %v3431_v43 = vpop.permute.xlu1 %3430  ;;  %4459 = vst.msk [vmem:[#allocation4 + $0x154] sm:$0xf] %vm3468_vm2, %v4392_v31 }
 0x447   : > { %3498 = vst.msk [vmem:[#allocation4 + $0x15c] sm:$0xf] %vm3468_vm2, %v3431_v43  ;;  %v5714_v43 = vadd.f32 %v7407_v0, %v9863_v14 }
 0x449   : > { %v3686_v30 = vpop.permute.xlu0 %3685 }
 0x44a   : > { %v4394_v28 = vpop.permute.xlu1 %4393  ;;  %v5222_v3 = vld [vmem:[#allocation4 + $0x144] sm:$0xff]  ;;  %3754 = vst.msk [vmem:[#allocation4 + $0x150] sm:$0xf] %vm3725_vm3, %v3686_v30 }
 0x44b   : > { %v7702_v46 = vld [vmem:[#allocation4 + $0x13c] ss:$12 sps:$4 sm:$0xff]   ;;  %4460 = vst.msk [vmem:[#allocation4 + $0x160] sm:$0xf] %vm3468_vm2, %v4394_v28  ;;  %v6741_v8 = vcombine.low %v5220_v33, %v5222_v3  ;;  %v5717_v3 = vadd.f32 %v7410_v32, %v9863_v14 }
 0x44c   : > { %5807 = vmatprep.mubr.bf16.mxu1 %v7702_v46 }
 0x44d   : > { %5808 = vmatmul.mubr.bf16.gmra.mxu1 %v6741_v8  ;;  %v4649_v56 = vpop.permute.xlu0 %4648  ;;  %v9854_v23 = vpop.f32.mrf.mxu1 }
 0x44e   : > { %v3688_v16 = vpop.permute.xlu1 %3687  ;;  %4716 = vst.msk [vmem:[#allocation4 + $0x154] sm:$0xf] %vm3725_vm3, %v4649_v56 }
 0x44f   : > { %3755 = vst.msk [vmem:[#allocation4 + $0x15c] sm:$0xf] %vm3725_vm3, %v3688_v16  ;;  %v9856_v63 = vpop.f32.mrf.mxu1  ;;  %v7413_v16 = vadd.f32 %v9809_v53, %v9805_v62  ;;  %v7416_v62 = vadd.f32 %v9817_v13, %v9813_v44 }
 0x451   : > { %v3943_v12 = vpop.permute.xlu0 %3942  ;;  %v9865_v18 = vpop.f32.mrf.mxu1  ;;  %v5725_v13 = vadd.f32 %v7416_v62, %v9863_v14 }
 0x452   : > { %v4651_v29 = vpop.permute.xlu1 %4650  ;;  %4011 = vst.msk [vmem:[#allocation4 + $0x150] sm:$0xf] %vm3982_vm4, %v3943_v12 }
 0x453   : > { %4717 = vst.msk [vmem:[#allocation4 + $0x160] sm:$0xf] %vm3725_vm3, %v4651_v29  ;;  %v9878_v30 = vpop.f32.mrf.mxu1 }
 0x455   : > { %v4905_v60 = vpop.permute.xlu0 %4904 }
 0x456   : > { %v3945_v17 = vpop.permute.xlu1 %3944  ;;  %4972 = vst.msk [vmem:[#allocation4 + $0x154] sm:$0xf] %vm3982_vm4, %v4905_v60 }
 0x457   : > { %4012 = vst.msk [vmem:[#allocation4 + $0x15c] sm:$0xf] %vm3982_vm4, %v3945_v17  ;;  %v5730_v17 = vadd.f32 %v7419_v47, %v9863_v14 }
 0x459   : > { %v3433_v51 = vpop.permute.xlu0 %3432 }
 0x45a   : > { %v4907_v58 = vpop.permute.xlu1 %4906  ;;  %3499 = vst.msk [vmem:[#allocation4 + $0x168] sm:$0xf] %vm3468_vm2, %v3433_v51  ;;  %v5722_v51 = vadd.f32 %v7413_v16, %v9863_v14 }
 0x45b   : > { %4973 = vst.msk [vmem:[#allocation4 + $0x160] sm:$0xf] %vm3982_vm4, %v4907_v58 }
 0x45d   : > { %v4396_v24 = vpop.permute.xlu0 %4395  ;;  %v5224_v61 = vld [vmem:[#allocation4 + $0x150] sm:$0xff] }
 0x45e   : > { %v3435_v40 = vpop.permute.xlu1 %3434  ;;  %4461 = vst.msk [vmem:[#allocation4 + $0x16c] sm:$0xf] %vm3468_vm2, %v4396_v24  ;;  %v7431_v24 = vadd.f32 %v7430_v55, %v7429_v11 }
 0x45f   : > { %3500 = vst.msk [vmem:[#allocation4 + $0x174] sm:$0xf] %vm3468_vm2, %v3435_v40 }
 0x461   : > { %v3690_v5 = vpop.permute.xlu0 %3689 }
 0x462   : > { %v4398_v45 = vpop.permute.xlu1 %4397  ;;  %v5226_v9 = vld [vmem:[#allocation4 + $0x15c] sm:$0xff]  ;;  %3756 = vst.msk [vmem:[#allocation4 + $0x168] sm:$0xf] %vm3725_vm3, %v3690_v5 }
 0x463   : > { %v7704_v49 = vld [vmem:[#allocation4 + $0x154] ss:$12 sps:$4 sm:$0xff]   ;;  %4462 = vst.msk [vmem:[#allocation4 + $0x178] sm:$0xf] %vm3468_vm2, %v4398_v45  ;;  %v6744_v20 = vcombine.low %v5224_v61, %v5226_v9  ;;  %v7425_v61 = vadd.f32 %v9839_v22, %v9835_v35 }
 0x464   : > { %5815 = vmatprep.mubr.bf16.mxu1 %v7704_v49  ;;  %v7434_v49 = vadd.f32 %v7433_v19, %v7432_v2  ;;  %v7437_v19 = vadd.f32 %v9856_v63, %v9854_v23 }
 0x465   : > { %5816 = vmatmul.mubr.bf16.gmra.mxu1 %v6744_v20  ;;  %v4653_v59 = vpop.permute.xlu0 %4652  ;;  %v7441_v46 = vpop.f32.mrf.mxu1  ;;  %v5738_v22 = vadd.f32 %v7425_v61, %v9863_v14 }
 0x466   : > { %v3692_v15 = vpop.permute.xlu1 %3691  ;;  %4718 = vst.msk [vmem:[#allocation4 + $0x16c] sm:$0xf] %vm3725_vm3, %v4653_v59  ;;  %v5754_v63 = vadd.f32 %v7437_v19, %v9863_v14 }
 0x467   : > { %3757 = vst.msk [vmem:[#allocation4 + $0x174] sm:$0xf] %vm3725_vm3, %v3692_v15  ;;  %v7442_v60 = vpop.f32.mrf.mxu1  ;;  %v5746_v15 = vadd.f32 %v7431_v24, %v9863_v14 }
 0x469   : > { %v3947_v26 = vpop.permute.xlu0 %3946  ;;  %v7444_v45 = vpop.f32.mrf.mxu1 }
 0x46a   : > { %v4655_v50 = vpop.permute.xlu1 %4654  ;;  %4013 = vst.msk [vmem:[#allocation4 + $0x168] sm:$0xf] %vm3982_vm4, %v3947_v26  ;;  %v7428_v26 = vadd.f32 %v9847_v36, %v9843_v57 }
 0x46b   : > { %4719 = vst.msk [vmem:[#allocation4 + $0x178] sm:$0xf] %vm3725_vm3, %v4655_v50  ;;  %v7445_v59 = vpop.f32.mrf.mxu1 }
 0x46c   : > { %v5741_v36 = vadd.f32 %v7428_v26, %v9863_v14 }
 0x46d   : > { %v4909_v52 = vpop.permute.xlu0 %4908 }
 0x46e   : > { %v3949_v39 = vpop.permute.xlu1 %3948  ;;  %4974 = vst.msk [vmem:[#allocation4 + $0x16c] sm:$0xf] %vm3982_vm4, %v4909_v52  ;;  %v7443_v52 = vadd.f32 %v7442_v60, %v7441_v46 }
 0x46f   : > { %4014 = vst.msk [vmem:[#allocation4 + $0x174] sm:$0xf] %vm3982_vm4, %v3949_v39 }
 0x470   : > { %v5762_v0 = vadd.f32 %v7443_v52, %v9863_v14 }
 0x472   : > { %v4911_v1 = vpop.permute.xlu1 %4910 }
 0x473   : > { %4975 = vst.msk [vmem:[#allocation4 + $0x178] sm:$0xf] %vm3982_vm4, %v4911_v1  ;;  %v5749_v1 = vadd.f32 %v7434_v49, %v9863_v14 }
 0x476   : > { %v7709_v54 = vld [vmem:[#allocation4 + $0x168] ss:$12 sps:$4 sm:$0xff]  }
 0x47a   : > { %v7707_v41 = vld [vmem:[#allocation4 + $0x16c] ss:$12 sps:$4 sm:$0xff]  }
 0x47b   : > { %5823 = vmatprep.mubr.bf16.mxu1 %v7707_v41 }
 0x47c   : > { %5824 = vmatmul.mubr.bf16.gmra.mxu1 %v7709_v54  ;;  %v7399_v37 = vpop.f32.mrf.mxu0 }
 0x47e   : > { %v7400_v42 = vpop.f32.mrf.mxu0 }
 0x47f   : > { %v7401_v48 = vadd.f32 %v7400_v42, %v7399_v37  ;;  %v7446_v37 = vadd.f32 %v7445_v59, %v7444_v45 }
 0x480   : > { %v7402_v21 = vpop.f32.mrf.mxu0 }
 0x481   : > { %v5706_v28 = vadd.f32 %v7401_v48, %v9863_v14  ;;  %v7440_v48 = vadd.f32 %v9878_v30, %v9865_v18 }
 0x482   : > { %v7403_v7 = vpop.f32.mrf.mxu0 }
 0x483   : > { %v7404_v27 = vadd.f32 %v7403_v7, %v7402_v21 }
 0x484   : > { %v7557_v4 = vpop.f32.mrf.mxu0 }
 0x485   : > { %v5875_v31 = vadd.f32 %v7557_v4, %v5714_v43  ;;  %v5709_v29 = vadd.f32 %v7404_v27, %v9863_v14  ;;  %v5765_v4 = vadd.f32 %v7446_v37, %v9863_v14 }
 0x486   : > { %v5866_v33 = vpop.f32.mrf.mxu0 }
 0x487   : > { %5995 = vst.msk [vmem:[%s9875_s20 + $0x10] sm:$0xff] %vm2972_vm6, %v5875_v31  ;;  %v5867_v25 = vadd.f32 %v5866_v33, %v5706_v28  ;;  %v5757_v28 = vadd.f32 %v7440_v48, %v9863_v14 }
 0x488   : > { %v7558_v8 = vpop.f32.mrf.mxu0 }
 0x489   : > { %5993 = vst.msk [vmem:[%s9875_s20] sm:$0xff] %vm2972_vm6, %v5867_v25  ;;  %v5878_v56 = vadd.f32 %v7558_v8, %v5717_v3 }
 0x48a   : > { %v5869_v12 = vpop.f32.mrf.mxu0 }
 0x48b   : > { %5996 = vst.msk [vmem:[%s9875_s20 + $0x18] sm:$0xff] %vm2972_vm6, %v5878_v56  ;;  %v5870_v10 = vadd.f32 %v5869_v12, %v5709_v29 }
 0x48c   : > { %v7561_v58 = vpop.f32.mrf.mxu0 }
 0x48d   : > { %5994 = vst.msk [vmem:[%s9875_s20 + $0x8] sm:$0xff] %vm2972_vm6, %v5870_v10  ;;  %v5891_v53 = vadd.f32 %v7561_v58, %v5730_v17 }
 0x48e   : > { %v5882_v40 = vpop.f32.mrf.mxu0 }
 0x48f   : > { %5999 = vst.msk [vmem:[%s9875_s20 + $0x30] sm:$0xff] %vm2972_vm6, %v5891_v53  ;;  %v5883_v34 = vadd.f32 %v5882_v40, %v5722_v51 }
 0x490   : > { %v7562_v5 = vpop.f32.mrf.mxu0 }
 0x491   : > { %5997 = vst.msk [vmem:[%s9875_s20 + $0x20] sm:$0xff] %vm2972_vm6, %v5883_v34  ;;  %v5894_v44 = vadd.f32 %v7562_v5, %v5733_v6 }
 0x492   : > { %v5885_v9 = vpop.f32.mrf.mxu0 }
 0x493   : > { %6000 = vst.msk [vmem:[%s9875_s20 + $0x38] sm:$0xff] %vm2972_vm6, %v5894_v44  ;;  %v5886_v20 = vadd.f32 %v5885_v9, %v5725_v13 }
 0x495   : > { %v7565_v50 = vpop.f32.mrf.mxu0  ;;  %5998 = vst.msk [vmem:[%s9875_s20 + $0x28] sm:$0xff] %vm2972_vm6, %v5886_v20  ;;  %v7447_v11 = vpop.f32.mrf.mxu1 }
 0x496   : > { %v5907_v35 = vadd.f32 %v7565_v50, %v5746_v15 }
 0x497   : > { %v5898_v39 = vpop.f32.mrf.mxu0  ;;  %v7448_v41 = vpop.f32.mrf.mxu1 }
 0x498   : > { %6003 = vst.msk [vmem:[%s9875_s20 + $0x50] sm:$0xff] %vm2972_vm6, %v5907_v35  ;;  %v5899_v55 = vadd.f32 %v5898_v39, %v5738_v22  ;;  %v7449_v31 = vadd.f32 %v7448_v41, %v7447_v11 }
 0x499   : > { %v7566_v2 = vpop.f32.mrf.mxu0  ;;  %v7450_v7 = vpop.f32.mrf.mxu1 }
 0x49a   : > { %6001 = vst.msk [vmem:[%s9875_s20 + $0x40] sm:$0xff] %vm2972_vm6, %v5899_v55  ;;  %v5910_v57 = vadd.f32 %v7566_v2, %v5749_v1  ;;  %v5770_v46 = vadd.f32 %v7449_v31, %v9863_v14 }
 0x49b   : > { %v5901_v54 = vpop.f32.mrf.mxu0  ;;  %v7451_v30 = vpop.f32.mrf.mxu1 }
 0x49c   : > { %6004 = vst.msk [vmem:[%s9875_s20 + $0x58] sm:$0xff] %vm2972_vm6, %v5910_v57  ;;  %v5902_v42 = vadd.f32 %v5901_v54, %v5741_v36  ;;  %v7452_v3 = vadd.f32 %v7451_v30, %v7450_v7 }
 0x49d   : > { %v7569_v21 = vpop.f32.mrf.mxu0 }
 0x49e   : > { %6002 = vst.msk [vmem:[%s9875_s20 + $0x48] sm:$0xff] %vm2972_vm6, %v5902_v42  ;;  %v5923_v23 = vadd.f32 %v7569_v21, %v5762_v0  ;;  %v5773_v29 = vadd.f32 %v7452_v3, %v9863_v14 }
 0x49f   : > { %v5914_v32 = vpop.f32.mrf.mxu0 }
 0x4a0   : > { %6007 = vst.msk [vmem:[%s9875_s20 + $0x70] sm:$0xff] %vm2972_vm6, %v5923_v23  ;;  %v5915_v43 = vadd.f32 %v5914_v32, %v5754_v63 }
 0x4a1   : > { %v7570_v27 = vpop.f32.mrf.mxu0 }
 0x4a2   : > { %6005 = vst.msk [vmem:[%s9875_s20 + $0x60] sm:$0xff] %vm2972_vm6, %v5915_v43  ;;  %v5926_v18 = vadd.f32 %v7570_v27, %v5765_v4 }
 0x4a3   : > { %v5917_v33 = vpop.f32.mrf.mxu0 }
 0x4a4   : > { %6008 = vst.msk [vmem:[%s9875_s20 + $0x78] sm:$0xff] %vm2972_vm6, %v5926_v18  ;;  %v5918_v47 = vadd.f32 %v5917_v33, %v5757_v28 }
 0x4a5   : > { %v7573_v25 = vpop.f32.mrf.mxu0 }
 0x4a6   : > { %6006 = vst.msk [vmem:[%s9875_s20 + $0x68] sm:$0xff] %vm2972_vm6, %v5918_v47 }
 0x4a7   : > { %v5930_v8 = vpop.f32.mrf.mxu0 }
 0x4a8   : > { %v5931_v16 = vadd.f32 %v5930_v8, %v5770_v46 }
 0x4a9   : > { %v7574_v56 = vpop.f32.mrf.mxu0 }
 0x4aa   : > { %6009 = vst.msk [vmem:[%s9875_s20 + $0x80] sm:$0xff] %vm2972_vm6, %v5931_v16 }
 0x4ab   : > { %v5933_v12 = vpop.f32.mrf.mxu0 }
 0x4ac   : > { %v5934_v38 = vadd.f32 %v5933_v12, %v5773_v29 }
 0x4ad   : > { %v7453_v10 = vpop.f32.mrf.mxu1  ;;  %v7577_v6 = vpop.f32.mrf.mxu0 }
 0x4ae   : > { %6010 = vst.msk [vmem:[%s9875_s20 + $0x88] sm:$0xff] %vm2972_vm6, %v5934_v38 }
 0x4af   : > { %v7454_v17 = vpop.f32.mrf.mxu1  ;;  %v5946_v5 = vpop.f32.mrf.mxu0 }
 0x4b0   : > { %v7455_v60 = vadd.f32 %v7454_v17, %v7453_v10 }
 0x4b1   : > { %v7456_v58 = vpop.f32.mrf.mxu1  ;;  %v7578_v49 = vpop.f32.mrf.mxu0 }
 0x4b2   : > { %v5778_v62 = vadd.f32 %v7455_v60, %v9863_v14 }
 0x4b3   : > { %v7457_v53 = vpop.f32.mrf.mxu1  ;;  %v5949_v26 = vpop.f32.mrf.mxu0 }
 0x4b4   : > { %v5939_v51 = vadd.f32 %v7573_v25, %v5778_v62  ;;  %v7458_v40 = vadd.f32 %v7457_v53, %v7456_v58 }
 0x4b5   : > { %v7581_v41 = vpop.f32.mrf.mxu0 }
 0x4b6   : > { %6011 = vst.msk [vmem:[%s9875_s20 + $0x90] sm:$0xff] %vm2972_vm6, %v5939_v51  ;;  %v5781_v24 = vadd.f32 %v7458_v40, %v9863_v14 }
 0x4b7   : > { %v5962_v37 = vpop.f32.mrf.mxu0 }
 0x4b8   : > { %v5942_v34 = vadd.f32 %v7574_v56, %v5781_v24 }
 0x4b9   : > { %v7582_v23 = vpop.f32.mrf.mxu0 }
 0x4ba   : > { %6012 = vst.msk [vmem:[%s9875_s20 + $0x98] sm:$0xff] %vm2972_vm6, %v5942_v34 }
 0x4bb   : > { %v5965_v4 = vpop.f32.mrf.mxu0 }
 0x4bd   : > { %v7585_v16 = vpop.f32.mrf.mxu0 }
 0x4bf   : > { %v5978_v29 = vpop.f32.mrf.mxu0 }
 0x4c1   : > { %v7586_v17 = vpop.f32.mrf.mxu0 }
 0x4c3   : > { %v5981_v51 = vpop.f32.mrf.mxu0 }
 0x4c5   : > { %v7459_v45 = vpop.f32.mrf.mxu1 }
 0x4c7   : > { %v7460_v61 = vpop.f32.mrf.mxu1 }
 0x4c8   : > { %v7461_v44 = vadd.f32 %v7460_v61, %v7459_v45 }
 0x4c9   : > { %v7462_v13 = vpop.f32.mrf.mxu1 }
 0x4ca   : > { %v5786_v9 = vadd.f32 %v7461_v44, %v9863_v14 }
 0x4cb   : > { %v7463_v20 = vpop.f32.mrf.mxu1 }
 0x4cc   : > { %v5947_v15 = vadd.f32 %v5946_v5, %v5786_v9  ;;  %v7464_v59 = vadd.f32 %v7463_v20, %v7462_v13 }
 0x4ce   : > { %6013 = vst.msk [vmem:[%s9875_s20 + $0xa0] sm:$0xff] %vm2972_vm6, %v5947_v15  ;;  %v5789_v50 = vadd.f32 %v7464_v59, %v9863_v14 }
 0x4d0   : > { %v5950_v35 = vadd.f32 %v5949_v26, %v5789_v50 }
 0x4d2   : > { %6014 = vst.msk [vmem:[%s9875_s20 + $0xa8] sm:$0xff] %vm2972_vm6, %v5950_v35 }
 0x4dd   : > { %v7465_v22 = vpop.f32.mrf.mxu1 }
 0x4df   : > { %v7466_v11 = vpop.f32.mrf.mxu1 }
 0x4e0   : > { %v7467_v39 = vadd.f32 %v7466_v11, %v7465_v22 }
 0x4e1   : > { %v7468_v52 = vpop.f32.mrf.mxu1 }
 0x4e2   : > { %v5794_v55 = vadd.f32 %v7467_v39, %v9863_v14 }
 0x4e3   : > { %v7469_v1 = vpop.f32.mrf.mxu1 }
 0x4e4   : > { %v5955_v2 = vadd.f32 %v7577_v6, %v5794_v55  ;;  %v7470_v19 = vadd.f32 %v7469_v1, %v7468_v52 }
 0x4e6   : > { %6015 = vst.msk [vmem:[%s9875_s20 + $0xb0] sm:$0xff] %vm2972_vm6, %v5955_v2  ;;  %v5797_v57 = vadd.f32 %v7470_v19, %v9863_v14 }
 0x4e8   : > { %v5958_v36 = vadd.f32 %v7578_v49, %v5797_v57 }
 0x4ea   : > { %6016 = vst.msk [vmem:[%s9875_s20 + $0xb8] sm:$0xff] %vm2972_vm6, %v5958_v36 }
 0x4f5   : > { %v7471_v54 = vpop.f32.mrf.mxu1 }
 0x4f7   : > { %v7472_v42 = vpop.f32.mrf.mxu1 }
 0x4f8   : > { %v7473_v0 = vadd.f32 %v7472_v42, %v7471_v54 }
 0x4f9   : > { %v7474_v21 = vpop.f32.mrf.mxu1 }
 0x4fa   : > { %v5802_v48 = vadd.f32 %v7473_v0, %v9863_v14 }
 0x4fb   : > { %v7475_v63 = vpop.f32.mrf.mxu1 }
 0x4fc   : > { %v5963_v7 = vadd.f32 %v5962_v37, %v5802_v48  ;;  %v7476_v32 = vadd.f32 %v7475_v63, %v7474_v21 }
 0x4fe   : > { %6017 = vst.msk [vmem:[%s9875_s20 + $0xc0] sm:$0xff] %vm2972_vm6, %v5963_v7  ;;  %v5805_v43 = vadd.f32 %v7476_v32, %v9863_v14 }
 0x500   : > { %v5966_v27 = vadd.f32 %v5965_v4, %v5805_v43 }
 0x502   : > { %6018 = vst.msk [vmem:[%s9875_s20 + $0xc8] sm:$0xff] %vm2972_vm6, %v5966_v27 }
 0x50d   : > { %v7477_v31 = vpop.f32.mrf.mxu1 }
 0x50f   : > { %v7478_v18 = vpop.f32.mrf.mxu1 }
 0x510   : > { %v7479_v28 = vadd.f32 %v7478_v18, %v7477_v31 }
 0x511   : > { %v7480_v30 = vpop.f32.mrf.mxu1 }
 0x512   : > { %v5810_v33 = vadd.f32 %v7479_v28, %v9863_v14 }
 0x513   : > { %v7481_v47 = vpop.f32.mrf.mxu1 }
 0x514   : > { %v5971_v25 = vadd.f32 %v7581_v41, %v5810_v33  ;;  %v7482_v3 = vadd.f32 %v7481_v47, %v7480_v30 }
 0x516   : > { %6019 = vst.msk [vmem:[%s9875_s20 + $0xd0] sm:$0xff] %vm2972_vm6, %v5971_v25  ;;  %v5813_v46 = vadd.f32 %v7482_v3, %v9863_v14 }
 0x518   : > { %v5974_v8 = vadd.f32 %v7582_v23, %v5813_v46 }
 0x51a   : > { %6020 = vst.msk [vmem:[%s9875_s20 + $0xd8] sm:$0xff] %vm2972_vm6, %v5974_v8 }
 0x525   : > { %v7483_v56 = vpop.f32.mrf.mxu1 }
 0x527   : > { %v7484_v12 = vpop.f32.mrf.mxu1 }
 0x528   : > { %v7485_v38 = vadd.f32 %v7484_v12, %v7483_v56 }
 0x529   : > { %v7486_v10 = vpop.f32.mrf.mxu1 }
 0x52a   : > { %v5818_v60 = vadd.f32 %v7485_v38, %v9863_v14 }
 0x52b   : > { %v7487_v58 = vpop.f32.mrf.mxu1 }
 0x52c   : > { %v7488_v62 = vadd.f32 %v7487_v58, %v7486_v10  ;;  %v5979_v53 = vadd.f32 %v5978_v29, %v5818_v60 }
 0x52e   : > { %6021 = vst.msk [vmem:[%s9875_s20 + $0xe0] sm:$0xff] %vm2972_vm6, %v5979_v53  ;;  %v5821_v40 = vadd.f32 %v7488_v62, %v9863_v14 }
 0x530   : > { %v5982_v24 = vadd.f32 %v5981_v51, %v5821_v40 }
 0x532   : > { %6022 = vst.msk [vmem:[%s9875_s20 + $0xe8] sm:$0xff] %vm2972_vm6, %v5982_v24 }
 0x53c   : > { %v7489_v34 = vpop.f32.mrf.mxu1 }
 0x53e   : > { %v7490_v6 = vpop.f32.mrf.mxu1 }
 0x53f   : > { %v7491_v45 = vadd.f32 %v7490_v6, %v7489_v34 }
 0x540   : > { %v7492_v5 = vpop.f32.mrf.mxu1 }
 0x541   : > { %v5826_v61 = vadd.f32 %v7491_v45, %v9863_v14 }
 0x542   : > { %v7493_v44 = vpop.f32.mrf.mxu1 }
 0x543   : > { %v5987_v13 = vadd.f32 %v7585_v16, %v5826_v61  ;;  %v7494_v9 = vadd.f32 %v7493_v44, %v7492_v5 }
 0x545   : > { %6023 = vst.msk [vmem:[%s9875_s20 + $0xf0] sm:$0xff] %vm2972_vm6, %v5987_v13  ;;  %v5829_v49 = vadd.f32 %v7494_v9, %v9863_v14 }
 0x547   : > { %v5990_v20 = vadd.f32 %v7586_v17, %v5829_v49 }
 0x549   : > { %6024 = vst.msk [vmem:[%s9875_s20 + $0xf8] sm:$0xff] %vm2972_vm6, %v5990_v20 }
 0x54a PF: > { %s15_s18 = sadd.s32 1, %s7717_s18  }
 0x54b   : > { %p12_p4 = scmp.ge.s32.totalorder %s15_s18, 6  }
 0x54d   :  { %14 = sbr.rel (!%p12_p4) target bundleno = 1 (0x1), region = 76 }

</bundles_post_ra>
